<compile_context>
chip_gen: v5e
topology: v5e:2x2
jax: 0.10.0
libtpu: 0.0.40
codegen_flags: <defaults>
</compile_context>

<pallas_src>
import numpy as np

import jax
import jax.numpy as jnp
from jax.experimental import pallas as pl
from jax.experimental.pallas import tpu as pltpu

NUM_CLASSES = 10
CFG = 16            # classifier input dim (== last conv channel count; avgpool -> 1x1)
C1 = 8              # first conv width
H_IN = W_IN = 28    # input spatial size (one 2x2 maxpool -> 14x14 for AvgPool2d(14,2))
HP = WP = 14        # pooled spatial size
N_POOL = HP * WP            # 196 valid pooled positions
ROWS = 200                  # 196 rounded up to a multiple of the 8-row sublane tile


def _make_gather_constants():
    """Constant 0/1 gather matrix for conv2's 3x3 taps (+ SAME padding) and the
    avg-pool weight row.  Built once in numpy; read once per kernel launch."""
    sel = np.zeros((9 * ROWS, ROWS), np.float32)
    for k in range(9):
        dh, dw = k // 3, k % 3
        for ho in range(HP):
            for wo in range(WP):
                hh, ww = ho + dh - 1, wo + dw - 1
                if 0 <= hh < HP and 0 <= ww < WP:
                    sel[k * ROWS + ho * WP + wo, hh * WP + ww] = 1.0
                # out-of-bounds taps stay an all-zero row == SAME zero padding
    pvec = np.zeros((1, ROWS), np.float32)
    pvec[0, :N_POOL] = 1.0 / N_POOL
    return sel, pvec


_SEL_CONST, _PVEC_CONST = _make_gather_constants()


# ------------------------------ fused kernel -------------------------------

def _vgg_fused_kernel(taps1_ref, w1_ref, b1_ref, sel_ref, w2_ref, b2_ref,
                      pvec_ref, wl_ref, bl_ref, o_ref):
    """Entire VGG forward for one batch element; nothing but logits leaves VMEM.

    taps1_ref: (1, 800, 27)  im2col of conv1, rows grouped into 4 parity classes
                             of 200 (196 valid + 4 zero-pad) rows each.
    w1_ref   : (27, 8)       conv1 weight (K = 9*Cin lane-dense)
    b1_ref   : (1, 8)
    sel_ref  : (1800, 200)   0/1 gather matrix: 9 conv2 taps (with zero padding)
    w2_ref   : (9, 8, 16)    conv2 per-tap weights
    b2_ref   : (1, 16)
    pvec_ref : (1, 200)      1/196 on the 196 valid pooled rows, 0 on pad rows
    wl_ref   : (16, 10)      classifier weight (transposed)
    bl_ref   : (1, 10)
    o_ref    : (1, 1, 10)
    """
    # conv1 + bias + ReLU: one lane-dense MXU matmul, M=800, K=27, N=8.
    t1 = taps1_ref[0]                                              # (800, 27)
    a1 = jnp.dot(t1, w1_ref[...], preferred_element_type=jnp.float32)
    a1 = jnp.maximum(a1 + b1_ref[...], 0.0)                        # (800, 8)

    # 2x2 maxpool: rows are pre-ordered as 4 parity classes of 200 rows, so the
    # pool is an elementwise max of four sublane-tile-aligned slabs (pure VPU).
    pooled = jnp.maximum(jnp.maximum(a1[0:ROWS],        a1[ROWS:2 * ROWS]),
                         jnp.maximum(a1[2 * ROWS:3 * ROWS], a1[3 * ROWS:4 * ROWS]))

    # conv2 tap gather (incl. SAME zero padding) as one selection matmul.
    taps2 = jnp.dot(sel_ref[...], pooled,
                    preferred_element_type=jnp.float32)            # (1800, 8)

    # conv2: accumulate the 9 taps' contributions (tiny in-VMEM matmuls).
    acc = jnp.zeros((ROWS, CFG), jnp.float32)
    for k in range(9):
        acc = acc + jnp.dot(taps2[k * ROWS:(k + 1) * ROWS], w2_ref[k],
                            preferred_element_type=jnp.float32)
    a2 = jnp.maximum(acc + b2_ref[...], 0.0)                       # (200, 16)

    # AvgPool2d(14,2) on a 14x14 map == masked global mean, then the classifier.
    pooled2 = jnp.dot(pvec_ref[...], a2,
                      preferred_element_type=jnp.float32)          # (1, 16)
    o_ref[0] = (jnp.dot(pooled2, wl_ref[...],
                        preferred_element_type=jnp.float32) + bl_ref[...])


# ------------------------------- model glue --------------------------------

def _build_conv1_taps(x_nhwc):
    """Lane-dense im2col for conv1 with rows grouped into 2x2-pool parity classes.

    Returns (N, 800, 27): class c = (h%2, w%2); within a class, row j = ho*14+wo
    holds the 27-wide 3x3 patch for input pixel (2*ho + h%2, 2*wo + w%2);
    rows 196..199 of each class are zero padding (sublane-tile alignment).
    Pure index manipulation on a ~9 KB input — XLA fuses it into one cheap op.
    """
    n = x_nhwc.shape[0]
    xp = jnp.pad(x_nhwc, ((0, 0), (1, 1), (1, 1), (0, 0)))          # (N, 30, 30, 3)
    patches = jnp.concatenate(
        [xp[:, dh:dh + H_IN, dw:dw + W_IN, :] for dh in range(3) for dw in range(3)],
        axis=-1)                                                    # (N, 28, 28, 27)
    classes = []
    for dh2 in range(2):
        for dw2 in range(2):
            p = patches[:, dh2::2, dw2::2, :].reshape(n, N_POOL, 27)
            p = jnp.pad(p, ((0, 0), (0, ROWS - N_POOL), (0, 0)))    # (N, 200, 27)
            classes.append(p)
    return jnp.concatenate(classes, axis=1)                         # (N, 800, 27)


def make_params(key):
    """Deterministic init matching VGG._initialize_weights conventions."""
    k1, k2, k3 = jax.random.split(key, 3)
    # Conv2d kaiming_normal(mode='fan_out'): std = sqrt(2 / (kh*kw*Cout)); bias = 0
    w1 = jax.random.normal(k1, (3, 3, 3, C1), jnp.float32) * np.sqrt(2.0 / (9 * C1))
    b1 = jnp.zeros((C1,), jnp.float32)
    w2 = jax.random.normal(k2, (3, 3, C1, CFG), jnp.float32) * np.sqrt(2.0 / (9 * CFG))
    b2 = jnp.zeros((CFG,), jnp.float32)
    # Linear: N(0, 0.01), bias = 0  (stored transposed: (Cin, num_classes))
    wl = jax.random.normal(k3, (CFG, NUM_CLASSES), jnp.float32) * 0.01
    bl = jnp.zeros((NUM_CLASSES,), jnp.float32)
    return dict(w1=w1, b1=b1, w2=w2, b2=b2, wl=wl, bl=bl)


def vgg_forward(params, x_nchw):
    x = jnp.transpose(x_nchw, (0, 2, 3, 1)).astype(jnp.float32)     # NCHW -> NHWC
    n, h, w, cin = x.shape
    # TODO(synk): general sliding-window AvgPool2d(14,2) for feature maps larger
    # than 14x14 is not implemented; this model's features produce exactly 14x14.
    assert (h, w, cin) == (H_IN, W_IN, 3), "fused path expects 3x28x28 inputs"

    taps1 = _build_conv1_taps(x)                                    # (N, 800, 27)
    w1f = params["w1"].reshape(9 * 3, C1)                           # (27, 8)
    w2f = params["w2"].reshape(9, C1, CFG)                          # (9, 8, 16)
    b1r = params["b1"].reshape(1, C1)
    b2r = params["b2"].reshape(1, CFG)
    blr = params["bl"].reshape(1, NUM_CLASSES)
    sel = jnp.asarray(_SEL_CONST)                                   # (1800, 200)
    pvec = jnp.asarray(_PVEC_CONST)                                 # (1, 200)

    out = pl.pallas_call(
        _vgg_fused_kernel,
        out_shape=jax.ShapeDtypeStruct((n, 1, NUM_CLASSES), jnp.float32),
        grid=(n,),
        in_specs=[
            pl.BlockSpec((1, 4 * ROWS, 27), lambda i: (i, 0, 0)),   # per-batch im2col
            pl.BlockSpec((27, C1), lambda i: (0, 0)),
            pl.BlockSpec((1, C1), lambda i: (0, 0)),
            pl.BlockSpec((9 * ROWS, ROWS), lambda i: (0, 0)),       # constant gather
            pl.BlockSpec((9, C1, CFG), lambda i: (0, 0, 0)),
            pl.BlockSpec((1, CFG), lambda i: (0, 0)),
            pl.BlockSpec((1, ROWS), lambda i: (0, 0)),
            pl.BlockSpec((CFG, NUM_CLASSES), lambda i: (0, 0)),
            pl.BlockSpec((1, NUM_CLASSES), lambda i: (0, 0)),
        ],
        out_specs=pl.BlockSpec((1, 1, NUM_CLASSES), lambda i: (i, 0, 0)),
        compiler_params=pltpu.CompilerParams(
            dimension_semantics=("parallel",),       # lets v7x split batch over 2 TCs
            vmem_limit_bytes=32 * 1024 * 1024,       # explicit budget, fits all gens
        ),
    )(taps1, w1f, b1r, sel, w2f, b2r, pvec, params["wl"], blr)
    return out.reshape(n, NUM_CLASSES)


def vgg_reference(params, x_nchw):
    """Pure-JAX reference for numerical sanity checking."""
    x = jnp.transpose(x_nchw, (0, 2, 3, 1)).astype(jnp.float32)

    def conv(x, w, b):
        y = jax.lax.conv_general_dilated(
            x, w, window_strides=(1, 1), padding="SAME",
            dimension_numbers=("NHWC", "HWIO", "NHWC"),
            precision=jax.lax.Precision.HIGHEST)
        return jnp.maximum(y + b, 0.0)

    x = conv(x, params["w1"], params["b1"])
    n, h, wd, c = x.shape
    x = x.reshape(n, h // 2, 2, wd // 2, 2, c).max(axis=(2, 4))
    x = conv(x, params["w2"], params["b2"])
    pooled = x.mean(axis=(1, 2))
    return pooled @ params["wl"] + params["bl"]


if __name__ == "__main__":
    key = jax.random.PRNGKey(0)
    pkey, xkey = jax.random.split(key)
    params = make_params(pkey)
    # Small input consistent with the module: NCHW (like PyTorch), 28x28 so the
    # feature stack (one 2x2 maxpool) yields the 14x14 map AvgPool2d(14,2) expects.
    x = jax.random.normal(xkey, (2, 3, 28, 28), jnp.float32)

    out = jax.jit(vgg_forward)(params, x)
    out = jax.block_until_ready(out)

    ref = vgg_reference(params, x)
    np.testing.assert_allclose(np.asarray(out), np.asarray(ref), rtol=2e-2, atol=2e-2)
    assert out.shape == (2, NUM_CLASSES) and out.dtype == jnp.float32

    print("KERNEL_OK")
</pallas_src>

<mosaic_0001>
module attributes {stable_mosaic.version = 11 : i64} {
  func.func @_vgg_fused_kernel(%arg0: i32, %arg1: memref<1x800x27xf32, #tpu.memory_space<vmem>>, %arg2: memref<27x8xf32, #tpu.memory_space<vmem>>, %arg3: memref<1x8xf32, #tpu.memory_space<vmem>>, %arg4: memref<1800x200xf32, #tpu.memory_space<vmem>>, %arg5: memref<9x8x16xf32, #tpu.memory_space<vmem>>, %arg6: memref<1x16xf32, #tpu.memory_space<vmem>>, %arg7: memref<1x200xf32, #tpu.memory_space<vmem>>, %arg8: memref<16x10xf32, #tpu.memory_space<vmem>>, %arg9: memref<1x10xf32, #tpu.memory_space<vmem>>, %arg10: memref<1x1x10xf32, #tpu.memory_space<vmem>>) attributes {dimension_semantics = [#tpu.dimension_semantics<parallel>], iteration_bounds = array<i64: 2>, scalar_prefetch = 0 : i64, scratch_operands = 0 : i64, tpu.core_type = #tpu.core_type<tc>, window_params = [{transform_indices = @transform_0, window_bounds = array<i64: 1, 800, 27>}, {pipeline_mode = #tpu.pipeline_mode<synchronous>, transform_indices = @transform_1, window_bounds = array<i64: 27, 8>}, {pipeline_mode = #tpu.pipeline_mode<synchronous>, transform_indices = @transform_2, window_bounds = array<i64: 1, 8>}, {pipeline_mode = #tpu.pipeline_mode<synchronous>, transform_indices = @transform_3, window_bounds = array<i64: 1800, 200>}, {pipeline_mode = #tpu.pipeline_mode<synchronous>, transform_indices = @transform_4, window_bounds = array<i64: 9, 8, 16>}, {pipeline_mode = #tpu.pipeline_mode<synchronous>, transform_indices = @transform_5, window_bounds = array<i64: 1, 16>}, {pipeline_mode = #tpu.pipeline_mode<synchronous>, transform_indices = @transform_6, window_bounds = array<i64: 1, 200>}, {pipeline_mode = #tpu.pipeline_mode<synchronous>, transform_indices = @transform_7, window_bounds = array<i64: 16, 10>}, {pipeline_mode = #tpu.pipeline_mode<synchronous>, transform_indices = @transform_8, window_bounds = array<i64: 1, 10>}, {transform_indices = @transform_9, window_bounds = array<i64: 1, 1, 10>}]} {
    %c0 = arith.constant 0 : index
    %c0_0 = arith.constant 0 : index
    %c0_1 = arith.constant 0 : index
    %0 = vector.load %arg1[%c0, %c0_0, %c0_1] : memref<1x800x27xf32, #tpu.memory_space<vmem>>, vector<1x800x27xf32>
    %1 = vector.shape_cast %0 : vector<1x800x27xf32> to vector<800x27xf32>
    %c0_2 = arith.constant 0 : index
    %c0_3 = arith.constant 0 : index
    %2 = vector.load %arg2[%c0_2, %c0_3] : memref<27x8xf32, #tpu.memory_space<vmem>>, vector<27x8xf32>
    %cst = arith.constant dense<0.000000e+00> : vector<800x8xf32>
    %3 = tpu.matmul %1, %2, %cst {dimension_numbers = #tpu.dot_dimension_numbers<[1], [0], [0], [1], [0, 0, 1, 1], [], []>} : vector<800x27xf32>, vector<27x8xf32>, vector<800x8xf32> -> vector<800x8xf32>
    %c0_4 = arith.constant 0 : index
    %c0_5 = arith.constant 0 : index
    %4 = vector.load %arg3[%c0_4, %c0_5] : memref<1x8xf32, #tpu.memory_space<vmem>>, vector<1x8xf32>
    %5 = vector.broadcast %4 : vector<1x8xf32> to vector<800x8xf32>
    %6 = arith.addf %3, %5 : vector<800x8xf32>
    %cst_6 = arith.constant 0.000000e+00 : f32
    %7 = vector.broadcast %cst_6 : f32 to vector<800x8xf32>
    %8 = arith.maximumf %6, %7 : vector<800x8xf32>
    %9 = vector.extract_strided_slice %8 {offsets = [0, 0], sizes = [200, 8], strides = [1, 1]} : vector<800x8xf32> to vector<200x8xf32>
    %10 = vector.extract_strided_slice %8 {offsets = [200, 0], sizes = [200, 8], strides = [1, 1]} : vector<800x8xf32> to vector<200x8xf32>
    %11 = arith.maximumf %9, %10 : vector<200x8xf32>
    %12 = vector.extract_strided_slice %8 {offsets = [400, 0], sizes = [200, 8], strides = [1, 1]} : vector<800x8xf32> to vector<200x8xf32>
    %13 = vector.extract_strided_slice %8 {offsets = [600, 0], sizes = [200, 8], strides = [1, 1]} : vector<800x8xf32> to vector<200x8xf32>
    %14 = arith.maximumf %12, %13 : vector<200x8xf32>
    %15 = arith.maximumf %11, %14 : vector<200x8xf32>
    %c0_7 = arith.constant 0 : index
    %c0_8 = arith.constant 0 : index
    %16 = vector.load %arg4[%c0_7, %c0_8] : memref<1800x200xf32, #tpu.memory_space<vmem>>, vector<1800x200xf32>
    %cst_9 = arith.constant dense<0.000000e+00> : vector<1800x8xf32>
    %17 = tpu.matmul %16, %15, %cst_9 {dimension_numbers = #tpu.dot_dimension_numbers<[1], [0], [0], [1], [0, 0, 1, 1], [], []>} : vector<1800x200xf32>, vector<200x8xf32>, vector<1800x8xf32> -> vector<1800x8xf32>
    %cst_10 = arith.constant 0.000000e+00 : f32
    %18 = vector.broadcast %cst_10 : f32 to vector<200x16xf32>
    %19 = vector.extract_strided_slice %17 {offsets = [0, 0], sizes = [200, 8], strides = [1, 1]} : vector<1800x8xf32> to vector<200x8xf32>
    %c0_11 = arith.constant 0 : index
    %c0_12 = arith.constant 0 : index
    %c0_13 = arith.constant 0 : index
    %20 = vector.load %arg5[%c0_11, %c0_12, %c0_13] : memref<9x8x16xf32, #tpu.memory_space<vmem>>, vector<1x8x16xf32>
    %21 = vector.shape_cast %20 : vector<1x8x16xf32> to vector<8x16xf32>
    %cst_14 = arith.constant dense<0.000000e+00> : vector<200x16xf32>
    %22 = tpu.matmul %19, %21, %cst_14 {dimension_numbers = #tpu.dot_dimension_numbers<[1], [0], [0], [1], [0, 0, 1, 1], [], []>} : vector<200x8xf32>, vector<8x16xf32>, vector<200x16xf32> -> vector<200x16xf32>
    %23 = arith.addf %18, %22 : vector<200x16xf32>
    %24 = vector.extract_strided_slice %17 {offsets = [200, 0], sizes = [200, 8], strides = [1, 1]} : vector<1800x8xf32> to vector<200x8xf32>
    %c1 = arith.constant 1 : index
    %c0_15 = arith.constant 0 : index
    %c0_16 = arith.constant 0 : index
    %25 = vector.load %arg5[%c1, %c0_15, %c0_16] : memref<9x8x16xf32, #tpu.memory_space<vmem>>, vector<1x8x16xf32>
    %26 = vector.shape_cast %25 : vector<1x8x16xf32> to vector<8x16xf32>
    %cst_17 = arith.constant dense<0.000000e+00> : vector<200x16xf32>
    %27 = tpu.matmul %24, %26, %cst_17 {dimension_numbers = #tpu.dot_dimension_numbers<[1], [0], [0], [1], [0, 0, 1, 1], [], []>} : vector<200x8xf32>, vector<8x16xf32>, vector<200x16xf32> -> vector<200x16xf32>
    %28 = arith.addf %23, %27 : vector<200x16xf32>
    %29 = vector.extract_strided_slice %17 {offsets = [400, 0], sizes = [200, 8], strides = [1, 1]} : vector<1800x8xf32> to vector<200x8xf32>
    %c2 = arith.constant 2 : index
    %c0_18 = arith.constant 0 : index
    %c0_19 = arith.constant 0 : index
    %30 = vector.load %arg5[%c2, %c0_18, %c0_19] : memref<9x8x16xf32, #tpu.memory_space<vmem>>, vector<1x8x16xf32>
    %31 = vector.shape_cast %30 : vector<1x8x16xf32> to vector<8x16xf32>
    %cst_20 = arith.constant dense<0.000000e+00> : vector<200x16xf32>
    %32 = tpu.matmul %29, %31, %cst_20 {dimension_numbers = #tpu.dot_dimension_numbers<[1], [0], [0], [1], [0, 0, 1, 1], [], []>} : vector<200x8xf32>, vector<8x16xf32>, vector<200x16xf32> -> vector<200x16xf32>
    %33 = arith.addf %28, %32 : vector<200x16xf32>
    %34 = vector.extract_strided_slice %17 {offsets = [600, 0], sizes = [200, 8], strides = [1, 1]} : vector<1800x8xf32> to vector<200x8xf32>
    %c3 = arith.constant 3 : index
    %c0_21 = arith.constant 0 : index
    %c0_22 = arith.constant 0 : index
    %35 = vector.load %arg5[%c3, %c0_21, %c0_22] : memref<9x8x16xf32, #tpu.memory_space<vmem>>, vector<1x8x16xf32>
    %36 = vector.shape_cast %35 : vector<1x8x16xf32> to vector<8x16xf32>
    %cst_23 = arith.constant dense<0.000000e+00> : vector<200x16xf32>
    %37 = tpu.matmul %34, %36, %cst_23 {dimension_numbers = #tpu.dot_dimension_numbers<[1], [0], [0], [1], [0, 0, 1, 1], [], []>} : vector<200x8xf32>, vector<8x16xf32>, vector<200x16xf32> -> vector<200x16xf32>
    %38 = arith.addf %33, %37 : vector<200x16xf32>
    %39 = vector.extract_strided_slice %17 {offsets = [800, 0], sizes = [200, 8], strides = [1, 1]} : vector<1800x8xf32> to vector<200x8xf32>
    %c4 = arith.constant 4 : index
    %c0_24 = arith.constant 0 : index
    %c0_25 = arith.constant 0 : index
    %40 = vector.load %arg5[%c4, %c0_24, %c0_25] : memref<9x8x16xf32, #tpu.memory_space<vmem>>, vector<1x8x16xf32>
    %41 = vector.shape_cast %40 : vector<1x8x16xf32> to vector<8x16xf32>
    %cst_26 = arith.constant dense<0.000000e+00> : vector<200x16xf32>
    %42 = tpu.matmul %39, %41, %cst_26 {dimension_numbers = #tpu.dot_dimension_numbers<[1], [0], [0], [1], [0, 0, 1, 1], [], []>} : vector<200x8xf32>, vector<8x16xf32>, vector<200x16xf32> -> vector<200x16xf32>
    %43 = arith.addf %38, %42 : vector<200x16xf32>
    %44 = vector.extract_strided_slice %17 {offsets = [1000, 0], sizes = [200, 8], strides = [1, 1]} : vector<1800x8xf32> to vector<200x8xf32>
    %c5 = arith.constant 5 : index
    %c0_27 = arith.constant 0 : index
    %c0_28 = arith.constant 0 : index
    %45 = vector.load %arg5[%c5, %c0_27, %c0_28] : memref<9x8x16xf32, #tpu.memory_space<vmem>>, vector<1x8x16xf32>
    %46 = vector.shape_cast %45 : vector<1x8x16xf32> to vector<8x16xf32>
    %cst_29 = arith.constant dense<0.000000e+00> : vector<200x16xf32>
    %47 = tpu.matmul %44, %46, %cst_29 {dimension_numbers = #tpu.dot_dimension_numbers<[1], [0], [0], [1], [0, 0, 1, 1], [], []>} : vector<200x8xf32>, vector<8x16xf32>, vector<200x16xf32> -> vector<200x16xf32>
    %48 = arith.addf %43, %47 : vector<200x16xf32>
    %49 = vector.extract_strided_slice %17 {offsets = [1200, 0], sizes = [200, 8], strides = [1, 1]} : vector<1800x8xf32> to vector<200x8xf32>
    %c6 = arith.constant 6 : index
    %c0_30 = arith.constant 0 : index
    %c0_31 = arith.constant 0 : index
    %50 = vector.load %arg5[%c6, %c0_30, %c0_31] : memref<9x8x16xf32, #tpu.memory_space<vmem>>, vector<1x8x16xf32>
    %51 = vector.shape_cast %50 : vector<1x8x16xf32> to vector<8x16xf32>
    %cst_32 = arith.constant dense<0.000000e+00> : vector<200x16xf32>
    %52 = tpu.matmul %49, %51, %cst_32 {dimension_numbers = #tpu.dot_dimension_numbers<[1], [0], [0], [1], [0, 0, 1, 1], [], []>} : vector<200x8xf32>, vector<8x16xf32>, vector<200x16xf32> -> vector<200x16xf32>
    %53 = arith.addf %48, %52 : vector<200x16xf32>
    %54 = vector.extract_strided_slice %17 {offsets = [1400, 0], sizes = [200, 8], strides = [1, 1]} : vector<1800x8xf32> to vector<200x8xf32>
    %c7 = arith.constant 7 : index
    %c0_33 = arith.constant 0 : index
    %c0_34 = arith.constant 0 : index
    %55 = vector.load %arg5[%c7, %c0_33, %c0_34] : memref<9x8x16xf32, #tpu.memory_space<vmem>>, vector<1x8x16xf32>
    %56 = vector.shape_cast %55 : vector<1x8x16xf32> to vector<8x16xf32>
    %cst_35 = arith.constant dense<0.000000e+00> : vector<200x16xf32>
    %57 = tpu.matmul %54, %56, %cst_35 {dimension_numbers = #tpu.dot_dimension_numbers<[1], [0], [0], [1], [0, 0, 1, 1], [], []>} : vector<200x8xf32>, vector<8x16xf32>, vector<200x16xf32> -> vector<200x16xf32>
    %58 = arith.addf %53, %57 : vector<200x16xf32>
    %59 = vector.extract_strided_slice %17 {offsets = [1600, 0], sizes = [200, 8], strides = [1, 1]} : vector<1800x8xf32> to vector<200x8xf32>
    %c8 = arith.constant 8 : index
    %c0_36 = arith.constant 0 : index
    %c0_37 = arith.constant 0 : index
    %60 = vector.load %arg5[%c8, %c0_36, %c0_37] : memref<9x8x16xf32, #tpu.memory_space<vmem>>, vector<1x8x16xf32>
    %61 = vector.shape_cast %60 : vector<1x8x16xf32> to vector<8x16xf32>
    %cst_38 = arith.constant dense<0.000000e+00> : vector<200x16xf32>
    %62 = tpu.matmul %59, %61, %cst_38 {dimension_numbers = #tpu.dot_dimension_numbers<[1], [0], [0], [1], [0, 0, 1, 1], [], []>} : vector<200x8xf32>, vector<8x16xf32>, vector<200x16xf32> -> vector<200x16xf32>
    %63 = arith.addf %58, %62 : vector<200x16xf32>
    %c0_39 = arith.constant 0 : index
    %c0_40 = arith.constant 0 : index
    %64 = vector.load %arg6[%c0_39, %c0_40] : memref<1x16xf32, #tpu.memory_space<vmem>>, vector<1x16xf32>
    %65 = vector.broadcast %64 : vector<1x16xf32> to vector<200x16xf32>
    %66 = arith.addf %63, %65 : vector<200x16xf32>
    %cst_41 = arith.constant 0.000000e+00 : f32
    %67 = vector.broadcast %cst_41 : f32 to vector<200x16xf32>
    %68 = arith.maximumf %66, %67 : vector<200x16xf32>
    %c0_42 = arith.constant 0 : index
    %c0_43 = arith.constant 0 : index
    %69 = vector.load %arg7[%c0_42, %c0_43] : memref<1x200xf32, #tpu.memory_space<vmem>>, vector<1x200xf32>
    %cst_44 = arith.constant dense<0.000000e+00> : vector<1x16xf32>
    %70 = tpu.matmul %69, %68, %cst_44 {dimension_numbers = #tpu.dot_dimension_numbers<[1], [0], [0], [1], [0, 0, 1, 1], [], []>} : vector<1x200xf32>, vector<200x16xf32>, vector<1x16xf32> -> vector<1x16xf32>
    %c0_45 = arith.constant 0 : index
    %c0_46 = arith.constant 0 : index
    %71 = vector.load %arg8[%c0_45, %c0_46] : memref<16x10xf32, #tpu.memory_space<vmem>>, vector<16x10xf32>
    %cst_47 = arith.constant dense<0.000000e+00> : vector<1x10xf32>
    %72 = tpu.matmul %70, %71, %cst_47 {dimension_numbers = #tpu.dot_dimension_numbers<[1], [0], [0], [1], [0, 0, 1, 1], [], []>} : vector<1x16xf32>, vector<16x10xf32>, vector<1x10xf32> -> vector<1x10xf32>
    %c0_48 = arith.constant 0 : index
    %c0_49 = arith.constant 0 : index
    %73 = vector.load %arg9[%c0_48, %c0_49] : memref<1x10xf32, #tpu.memory_space<vmem>>, vector<1x10xf32>
    %74 = arith.addf %72, %73 : vector<1x10xf32>
    %c0_50 = arith.constant 0 : index
    %c0_51 = arith.constant 0 : index
    %c0_52 = arith.constant 0 : index
    %75 = vector.load %arg10[%c0_50, %c0_51, %c0_52] : memref<1x1x10xf32, #tpu.memory_space<vmem>>, vector<1x1x10xf32>
    %76 = vector.shape_cast %75 : vector<1x1x10xf32> to vector<1x10xf32>
    %77 = vector.shape_cast %74 : vector<1x10xf32> to vector<1x1x10xf32>
    tpu.vector_store %arg10[%c0_50, %c0_51, %c0_52], %77 {strides = array<i32>} : memref<1x1x10xf32, #tpu.memory_space<vmem>>, vector<1x1x10xf32>,
    return
  }
  func.func @transform_0(%arg0: i32) -> (i32, i32, i32) {
    %c0_i32 = arith.constant 0 : i32
    %c0_i32_0 = arith.constant 0 : i32
    %c0_i32_1 = arith.constant 0 : i32
    return %arg0, %c0_i32, %c0_i32_0 : i32, i32, i32
  }
  func.func @transform_1(%arg0: i32) -> (i32, i32) {
    %c0_i32 = arith.constant 0 : i32
    %c0_i32_0 = arith.constant 0 : i32
    %c0_i32_1 = arith.constant 0 : i32
    return %c0_i32, %c0_i32_0 : i32, i32
  }
  func.func @transform_2(%arg0: i32) -> (i32, i32) {
    %c0_i32 = arith.constant 0 : i32
    %c0_i32_0 = arith.constant 0 : i32
    %c0_i32_1 = arith.constant 0 : i32
    return %c0_i32, %c0_i32_0 : i32, i32
  }
  func.func @transform_3(%arg0: i32) -> (i32, i32) {
    %c0_i32 = arith.constant 0 : i32
    %c0_i32_0 = arith.constant 0 : i32
    %c0_i32_1 = arith.constant 0 : i32
    return %c0_i32, %c0_i32_0 : i32, i32
  }
  func.func @transform_4(%arg0: i32) -> (i32, i32, i32) {
    %c0_i32 = arith.constant 0 : i32
    %c0_i32_0 = arith.constant 0 : i32
    %c0_i32_1 = arith.constant 0 : i32
    %c0_i32_2 = arith.constant 0 : i32
    return %c0_i32, %c0_i32_0, %c0_i32_1 : i32, i32, i32
  }
  func.func @transform_5(%arg0: i32) -> (i32, i32) {
    %c0_i32 = arith.constant 0 : i32
    %c0_i32_0 = arith.constant 0 : i32
    %c0_i32_1 = arith.constant 0 : i32
    return %c0_i32, %c0_i32_0 : i32, i32
  }
  func.func @transform_6(%arg0: i32) -> (i32, i32) {
    %c0_i32 = arith.constant 0 : i32
    %c0_i32_0 = arith.constant 0 : i32
    %c0_i32_1 = arith.constant 0 : i32
    return %c0_i32, %c0_i32_0 : i32, i32
  }
  func.func @transform_7(%arg0: i32) -> (i32, i32) {
    %c0_i32 = arith.constant 0 : i32
    %c0_i32_0 = arith.constant 0 : i32
    %c0_i32_1 = arith.constant 0 : i32
    return %c0_i32, %c0_i32_0 : i32, i32
  }
  func.func @transform_8(%arg0: i32) -> (i32, i32) {
    %c0_i32 = arith.constant 0 : i32
    %c0_i32_0 = arith.constant 0 : i32
    %c0_i32_1 = arith.constant 0 : i32
    return %c0_i32, %c0_i32_0 : i32, i32
  }
  func.func @transform_9(%arg0: i32) -> (i32, i32, i32) {
    %c0_i32 = arith.constant 0 : i32
    %c0_i32_0 = arith.constant 0 : i32
    %c0_i32_1 = arith.constant 0 : i32
    return %arg0, %c0_i32, %c0_i32_0 : i32, i32, i32
  }
}

</mosaic_0001>

<bundles_post_ra>
// kernel: vgg_forward.1
= control target key start
LH: loop header
LB: loop body
LE: loop exit
PB: predicated region body
PF: predicated region fallthrough
CT: control target
= control target key end

     0   :  { %14 = vsyncpa [#allocation3], 0  ;;  %s10565_s0 = inlined_call_operand.vmem [shape: f32[2,800,27], index: 0, kind: input, shape index: {}]   ;;  %s10566_s1 = inlined_call_operand.vmem [shape: f32[27,8], index: 1, kind: input, shape index: {}]   ;;  %s10567_s2 = inlined_call_operand.vmem [shape: f32[1,8], index: 2, kind: input, shape index: {}]   ;;  %s10568_s3 = inlined_call_operand.vmem [shape: f32[1800,200], index: 3, kind: input, shape index: {}]   ;;  %s10569_s4 = inlined_call_operand.vmem [shape: f32[9,8,16], index: 4, kind: input, shape index: {}]   ;;  %s10570_s5 = inlined_call_operand.vmem [shape: f32[1,16], index: 5, kind: input, shape index: {}]   ;;  %s10571_s6 = inlined_call_operand.vmem [shape: f32[1,200], index: 6, kind: input, shape index: {}]   ;;  %s10572_s7 = inlined_call_operand.vmem [shape: f32[16,10], index: 7, kind: input, shape index: {}]   ;;  %s10573_s8 = inlined_call_operand.vmem [shape: f32[1,10], index: 8, kind: input, shape index: {}]   ;;  %s10574_s9 = inlined_call_operand.hbm [shape: f32[2,1,10], index: 9, kind: output, shape index: {}]  }
   0x1   :  { %16 = vsyncpa [#allocation3 + $0x1], 0  ;;  %s6397_s30 = smov 0   ;;  %s6399_s10 = smov 0  }
   0x2   :  { %s6401_s11 = smov 0   ;;  %s6403_s12 = smov 0  }
   0x3 LB: > { %s6418_s13 = sadd.s32 4294967295, %s6345_s12   ;;  %s5639_s14 = sadd.s32 4294967294, %s6345_s12   ;;  %s6345_s12 = sphi %s6403_s12, %s11013_s12   ;;  %s6341_s11 = sphi %s6401_s11, %s11012_s11   ;;  %s6337_s10 = sphi %s6399_s10, %s11011_s10   ;;  %s6333_s30 = sphi %s6397_s30, %s11010_s30  }
   0x4   : > { %s6422_s15 = sadd.s32 1, %s6345_s12   ;;  %s223_s16 = sadd.s32 1, %s6341_s11 }
   0x5   : > { %s220_s17 = ssub.s32 %s6345_s12, %s6422_s15  ;;  %p233_p0 = scmp.ne.s32.totalorder %s6341_s11, %s6337_s10 }
   0x6   : > { %p221_p1 = scmp.eq.s32.totalorder %s220_s17, 0  ;;  %p234_p2 = scmp.eq.s32.totalorder %s6418_s13, 1 }
   0x7   : > { %p239_p3 = scmp.ne.s32.totalorder %s6337_s10, %s6333_s30  ;;  %p240_p4 = scmp.eq.s32.totalorder %s5639_s14, 1 }
   0x8   : > { %s6433_s18 = scalar_select %p221_p1, %s6341_s11, %s223_s16  }
   0x9   : > { %p6435_p5 = por %p234_p2, %p233_p0  ;;  %p6439_p6 = por %p240_p4, %p239_p3 }
   0xa   : > { %p5642_p7 = scmp.ge.s32.totalorder %s6345_s12, 1  ;;  %p290_p8 = scmp.lt.s32.totalorder %s6345_s12, 3 }
   0xc   : > { %p291_p9 = pnand %p5642_p7, %p290_p8 }
   0xe   : > { %294 = sbr.rel (%p291_p9) target bundleno = 3232 (0xca0), region = 56 }
  0x13   : > { %v433_v0 = vld [vmem:[%s10566_s1 + $0x18] sm:$0x7]  ;;  %vm739_vm0 = vcmask 1042432   ;;  %v432_v1 = vld [vmem:[%s10566_s1 + $0x10] sm:$0xff]  ;;  %p325_p10 = scmp.lt.s32.totalorder %s6418_s13, 1  ;;  %v431_v2 = vld [vmem:[%s10566_s1 + $0x8] sm:$0xff]  ;;  %s5580_s29 = scalar_lea.hbm %s10574_s9, %s6418_s13 }
  0x14   : > { %5644 = vmatpush.msk.msra.mxu0 %vm739_vm0, %v433_v0  ;;  %v430_v3 = vld [vmem:[%s10566_s1] sm:$0xff]  ;;  %vm438_vm1 = vcmask 220160   ;;  %vm1685_vm2 = vcmask 588800   ;;  %vm3748_vm3 = vcmask 64512   ;;  %vm5545_vm4 = vcmask 130048   ;;  %s323_s26 = sand.u32 1, %s6337_s10  }
  0x15   : > { %s326_s27 = scalar_select %p325_p10, %s6418_s13, 1  ;;  %vm5569_vm5 = vcmask 73728  }
  0x16   : > { %756 = vmatpush.msra.mxu0 %v432_v1  ;;  %s324_s17 = scalar_lea.vmem [#allocation2], %s323_s26  ;;  %s5584_s22 = sshll.u32 %s5580_s29, 4  ;;  %s5585_s22 = int_to_ptr.hbm [resolvable:$true] %s5584_s22 }
  0x17   : > { %s6241_s14 = smul.u32 800, %s326_s27  ;;  %s5572_s23 = scalar_lea.sflag [#allocation3], %s323_s26 }
  0x18   : > { %757 = vmatpush.msra.mxu0 %v431_v2  ;;  %s6297_s24 = sshra.s32 %s5585_s22, 4  ;;  %s6303_s28 = scalar_lea.hbm %s10574_s9, 2  ;;  %s6298_s24 = int_to_ptr.hbm [resolvable:$true] %s6297_s24 }
  0x19   : > { %s6462_s21 = scalar_lea.vmem %s10565_s0, %s6241_s14  ;;  %s6299_s25 = scalar_lea.hbm %s6298_s24, 1 }
  0x1a   : > { %758 = vmatpush.msra.mxu0 %v430_v3  ;;  %v330_v4 = vld [vmem:[%s6462_s21] sm:$0xff]  ;;  %v331_v5 = vld [vmem:[%s6462_s21 + $0x8] sm:$0xff]  ;;  %v332_v6 = vld [vmem:[%s6462_s21 + $0x10] sm:$0xff]  ;;  %p6300_p11 = scmp.ne.s32.totalorder %s6298_s24, %s6299_s25  ;;  %p6304_p0 = scmp.lt.s32.totalorder %s6298_s24, %s10574_s9 }
  0x1b   : > { %5645 = vmatmul.msk.f32.vlgmr.msra.gmra.mxu0 %vm438_vm1, %v330_v4  ;;  %v333_v7 = vld [vmem:[%s6462_s21 + $0x18] sm:$0xff]  ;;  %v334_v8 = vld [vmem:[%s6462_s21 + $0x20] sm:$0xff]  ;;  %v335_v9 = vld [vmem:[%s6462_s21 + $0x28] sm:$0xff]  ;;  %p6305_p1 = scmp.lt.s32.totalorder %s6303_s28, %s6299_s25 }
  0x1c   : > { %v336_v10 = vld [vmem:[%s6462_s21 + $0x30] sm:$0xff]  ;;  %v337_v11 = vld [vmem:[%s6462_s21 + $0x38] sm:$0xff]  ;;  %v338_v12 = vld [vmem:[%s6462_s21 + $0x40] sm:$0xff]  ;;  %p6301_p12 = pnand %p6300_p11, %p6435_p5 }
  0x1d   : > { %v339_v13 = vld [vmem:[%s6462_s21 + $0x48] sm:$0xff]  ;;  %v340_v14 = vld [vmem:[%s6462_s21 + $0x50] sm:$0xff]  ;;  %v341_v15 = vld [vmem:[%s6462_s21 + $0x58] sm:$0xff]  ;;  %p6306_p2 = por %p6305_p1, %p6304_p0 }
  0x1e   : > { %v342_v16 = vld [vmem:[%s6462_s21 + $0x60] sm:$0xff]  ;;  %v343_v17 = vld [vmem:[%s6462_s21 + $0x68] sm:$0xff]  ;;  %v344_v18 = vld [vmem:[%s6462_s21 + $0x70] sm:$0xff]  ;;  %p6302_p13 = pneg %p6301_p12 }
  0x1f   : > { %v345_v19 = vld [vmem:[%s6462_s21 + $0x78] sm:$0xff]  ;;  %v346_v21 = vld [vmem:[%s6462_s21 + $0x80] sm:$0xff]  ;;  %v347_v23 = vld [vmem:[%s6462_s21 + $0x88] sm:$0xff] }
  0x20   : > { %v348_v25 = vld [vmem:[%s6462_s21 + $0x90] sm:$0xff]  ;;  %v349_v27 = vld [vmem:[%s6462_s21 + $0x98] sm:$0xff]  ;;  %v350_v29 = vld [vmem:[%s6462_s21 + $0xa0] sm:$0xff]  ;;  %p6307_p3 = pnand %p6306_p2, %p6302_p13 }
  0x21   : > { %v351_v31 = vld [vmem:[%s6462_s21 + $0xa8] sm:$0xff]  ;;  %v352_v33 = vld [vmem:[%s6462_s21 + $0xb0] sm:$0xff]  ;;  %v353_v35 = vld [vmem:[%s6462_s21 + $0xb8] sm:$0xff] }
  0x22   : > { %v354_v37 = vld [vmem:[%s6462_s21 + $0xc0] sm:$0xff]  ;;  %v355_v39 = vld [vmem:[%s6462_s21 + $0xc8] sm:$0xff]  ;;  %v356_v41 = vld [vmem:[%s6462_s21 + $0xd0] sm:$0xff] }
  0x23   : > { %5646 = vmatmul.msk.f32.gmra.mxu0 %vm438_vm1, %v331_v5  ;;  %v357_v43 = vld [vmem:[%s6462_s21 + $0xd8] sm:$0xff]  ;;  %v358_v45 = vld [vmem:[%s6462_s21 + $0xe0] sm:$0xff]  ;;  %v359_v47 = vld [vmem:[%s6462_s21 + $0xe8] sm:$0xff] }
  0x24   : > { %v360_v49 = vld [vmem:[%s6462_s21 + $0xf0] sm:$0xff]  ;;  %v361_v51 = vld [vmem:[%s6462_s21 + $0xf8] sm:$0xff]  ;;  %v362_v53 = vld [vmem:[%s6462_s21 + $0x100] sm:$0xff] }
  0x25   : > { %v363_v55 = vld [vmem:[%s6462_s21 + $0x108] sm:$0xff]  ;;  %v364_v57 = vld [vmem:[%s6462_s21 + $0x110] sm:$0xff]  ;;  %v365_v59 = vld [vmem:[%s6462_s21 + $0x118] sm:$0xff] }
  0x26   : > { %v366_v61 = vld [vmem:[%s6462_s21 + $0x120] sm:$0xff]  ;;  %v367_v63 = vld [vmem:[%s6462_s21 + $0x128] sm:$0xff]  ;;  %v368_v1 = vld [vmem:[%s6462_s21 + $0x130] sm:$0xff] }
  0x27   : > { %v369_v3 = vld [vmem:[%s6462_s21 + $0x138] sm:$0xff]  ;;  %v370_v5 = vld [vmem:[%s6462_s21 + $0x140] sm:$0xff] }
  0x2b   : > { %5647 = vmatmul.msk.f32.gmra.mxu0 %vm438_vm1, %v332_v6 }
  0x33   : > { %5648 = vmatmul.msk.f32.gmra.mxu0 %vm438_vm1, %v333_v7  ;;  %v371_v7 = vld [vmem:[%s6462_s21 + $0x148] sm:$0xff] }
  0x3b   : > { %5649 = vmatmul.msk.f32.gmra.mxu0 %vm438_vm1, %v334_v8 }
  0x43   : > { %5650 = vmatmul.msk.f32.gmra.mxu0 %vm438_vm1, %v335_v9  ;;  %v372_v9 = vld [vmem:[%s6462_s21 + $0x150] sm:$0xff] }
  0x4b   : > { %5651 = vmatmul.msk.f32.gmra.mxu0 %vm438_vm1, %v336_v10 }
  0x53   : > { %5652 = vmatmul.msk.f32.gmra.mxu0 %vm438_vm1, %v337_v11  ;;  %v373_v11 = vld [vmem:[%s6462_s21 + $0x158] sm:$0xff] }
  0x5b   : > { %5653 = vmatmul.msk.f32.gmra.mxu0 %vm438_vm1, %v338_v12 }
  0x63   : > { %5654 = vmatmul.msk.f32.gmra.mxu0 %vm438_vm1, %v339_v13  ;;  %v374_v13 = vld [vmem:[%s6462_s21 + $0x160] sm:$0xff] }
  0x6b   : > { %5655 = vmatmul.msk.f32.gmra.mxu0 %vm438_vm1, %v340_v14 }
  0x73   : > { %5656 = vmatmul.msk.f32.gmra.mxu0 %vm438_vm1, %v341_v15  ;;  %v375_v15 = vld [vmem:[%s6462_s21 + $0x168] sm:$0xff] }
  0x7b   : > { %5657 = vmatmul.msk.f32.gmra.mxu0 %vm438_vm1, %v342_v16 }
  0x83   : > { %5658 = vmatmul.msk.f32.gmra.mxu0 %vm438_vm1, %v343_v17  ;;  %v376_v17 = vld [vmem:[%s6462_s21 + $0x170] sm:$0xff] }
  0x8b   : > { %5659 = vmatmul.msk.f32.gmra.mxu0 %vm438_vm1, %v344_v18 }
  0x93   : > { %5660 = vmatmul.msk.f32.gmra.mxu0 %vm438_vm1, %v345_v19  ;;  %v377_v19 = vld [vmem:[%s6462_s21 + $0x178] sm:$0xff] }
  0x98   : > { %v6496_v20 = vpop.f32.mrf.mxu0 }
  0x99   : > { %10580 = vst [vmem:[#allocation5_spill] sm:$0xff] %v6496_v20 }
  0x9b   : > { %5661 = vmatmul.msk.f32.gmra.mxu0 %vm438_vm1, %v346_v21 }
  0xa0   : > { %v6500_v22 = vpop.f32.mrf.mxu0 }
  0xa3   : > { %5662 = vmatmul.msk.f32.gmra.mxu0 %vm438_vm1, %v347_v23  ;;  %v378_v23 = vld [vmem:[%s6462_s21 + $0x180] sm:$0xff] }
  0xa8   : > { %v6504_v24 = vpop.f32.mrf.mxu0 }
  0xab   : > { %5663 = vmatmul.msk.f32.gmra.mxu0 %vm438_vm1, %v348_v25 }
  0xb0   : > { %v6508_v26 = vpop.f32.mrf.mxu0 }
  0xb3   : > { %5664 = vmatmul.msk.f32.gmra.mxu0 %vm438_vm1, %v349_v27  ;;  %v379_v27 = vld [vmem:[%s6462_s21 + $0x188] sm:$0xff] }
  0xb8   : > { %v6512_v28 = vpop.f32.mrf.mxu0 }
  0xbb   : > { %5665 = vmatmul.msk.f32.gmra.mxu0 %vm438_vm1, %v350_v29 }
  0xc0   : > { %v6516_v30 = vpop.f32.mrf.mxu0 }
  0xc3   : > { %5666 = vmatmul.msk.f32.gmra.mxu0 %vm438_vm1, %v351_v31  ;;  %v380_v31 = vld [vmem:[%s6462_s21 + $0x190] sm:$0xff] }
  0xc8   : > { %v6520_v32 = vpop.f32.mrf.mxu0 }
  0xcb   : > { %5667 = vmatmul.msk.f32.gmra.mxu0 %vm438_vm1, %v352_v33 }
  0xd0   : > { %v6524_v34 = vpop.f32.mrf.mxu0 }
  0xd3   : > { %5668 = vmatmul.msk.f32.gmra.mxu0 %vm438_vm1, %v353_v35  ;;  %v381_v35 = vld [vmem:[%s6462_s21 + $0x198] sm:$0xff] }
  0xd8   : > { %v6528_v36 = vpop.f32.mrf.mxu0 }
  0xdb   : > { %5669 = vmatmul.msk.f32.gmra.mxu0 %vm438_vm1, %v354_v37 }
  0xe0   : > { %v6532_v38 = vpop.f32.mrf.mxu0 }
  0xe3   : > { %5670 = vmatmul.msk.f32.gmra.mxu0 %vm438_vm1, %v355_v39  ;;  %v382_v39 = vld [vmem:[%s6462_s21 + $0x1a0] sm:$0xff] }
  0xe8   : > { %v6536_v40 = vpop.f32.mrf.mxu0 }
  0xeb   : > { %5671 = vmatmul.msk.f32.gmra.mxu0 %vm438_vm1, %v356_v41 }
  0xf0   : > { %v6540_v42 = vpop.f32.mrf.mxu0 }
  0xf3   : > { %5672 = vmatmul.msk.f32.gmra.mxu0 %vm438_vm1, %v357_v43  ;;  %v383_v43 = vld [vmem:[%s6462_s21 + $0x1a8] sm:$0xff] }
  0xf8   : > { %v6544_v44 = vpop.f32.mrf.mxu0 }
  0xfb   : > { %5673 = vmatmul.msk.f32.gmra.mxu0 %vm438_vm1, %v358_v45 }
 0x100   : > { %v6548_v46 = vpop.f32.mrf.mxu0 }
 0x103   : > { %5674 = vmatmul.msk.f32.gmra.mxu0 %vm438_vm1, %v359_v47  ;;  %v384_v47 = vld [vmem:[%s6462_s21 + $0x1b0] sm:$0xff] }
 0x108   : > { %v6552_v48 = vpop.f32.mrf.mxu0 }
 0x10b   : > { %5675 = vmatmul.msk.f32.gmra.mxu0 %vm438_vm1, %v360_v49 }
 0x110   : > { %v6556_v50 = vpop.f32.mrf.mxu0 }
 0x113   : > { %5676 = vmatmul.msk.f32.gmra.mxu0 %vm438_vm1, %v361_v51  ;;  %v385_v51 = vld [vmem:[%s6462_s21 + $0x1b8] sm:$0xff] }
 0x118   : > { %v6560_v52 = vpop.f32.mrf.mxu0 }
 0x119   : > { %10581 = vst [vmem:[#allocation6_spill] sm:$0xff] %v6560_v52 }
 0x11b   : > { %5677 = vmatmul.msk.f32.gmra.mxu0 %vm438_vm1, %v362_v53 }
 0x120   : > { %v6564_v54 = vpop.f32.mrf.mxu0 }
 0x121   : > { %10582 = vst [vmem:[#allocation7_spill] sm:$0xff] %v6564_v54 }
 0x123   : > { %5678 = vmatmul.msk.f32.gmra.mxu0 %vm438_vm1, %v363_v55  ;;  %v386_v55 = vld [vmem:[%s6462_s21 + $0x1c0] sm:$0xff] }
 0x128   : > { %v6568_v56 = vpop.f32.mrf.mxu0 }
 0x129   : > { %10583 = vst [vmem:[#allocation8_spill] sm:$0xff] %v6568_v56 }
 0x12b   : > { %5679 = vmatmul.msk.f32.gmra.mxu0 %vm438_vm1, %v364_v57 }
 0x130   : > { %v6572_v58 = vpop.f32.mrf.mxu0 }
 0x131   : > { %10584 = vst [vmem:[#allocation9_spill] sm:$0xff] %v6572_v58 }
 0x133   : > { %5680 = vmatmul.msk.f32.gmra.mxu0 %vm438_vm1, %v365_v59  ;;  %v387_v59 = vld [vmem:[%s6462_s21 + $0x1c8] sm:$0xff] }
 0x138   : > { %v6576_v60 = vpop.f32.mrf.mxu0 }
 0x139   : > { %10585 = vst [vmem:[#allocation10_spill] sm:$0xff] %v6576_v60 }
 0x13b   : > { %5681 = vmatmul.msk.f32.gmra.mxu0 %vm438_vm1, %v366_v61 }
 0x140   : > { %v6580_v62 = vpop.f32.mrf.mxu0 }
 0x141   : > { %10586 = vst [vmem:[#allocation11_spill] sm:$0xff] %v6580_v62 }
 0x143   : > { %5682 = vmatmul.msk.f32.gmra.mxu0 %vm438_vm1, %v367_v63  ;;  %v388_v63 = vld [vmem:[%s6462_s21 + $0x1d0] sm:$0xff] }
 0x148   : > { %v6584_v0 = vpop.f32.mrf.mxu0 }
 0x149   : > { %10587 = vst [vmem:[#allocation12_spill] sm:$0xff] %v6584_v0  ;;  %v429_v0 = vld [vmem:[%s6462_s21 + $0x318] sm:$0xff] }
 0x14b   : > { %5683 = vmatmul.msk.f32.gmra.mxu0 %vm438_vm1, %v368_v1 }
 0x150   : > { %v6588_v2 = vpop.f32.mrf.mxu0 }
 0x151   : > { %10588 = vst [vmem:[#allocation13_spill] sm:$0xff] %v6588_v2  ;;  %v428_v2 = vld [vmem:[%s6462_s21 + $0x310] sm:$0xff] }
 0x153   : > { %5684 = vmatmul.msk.f32.gmra.mxu0 %vm438_vm1, %v369_v3  ;;  %v389_v3 = vld [vmem:[%s6462_s21 + $0x1d8] sm:$0xff] }
 0x158   : > { %v6592_v4 = vpop.f32.mrf.mxu0 }
 0x159   : > { %10589 = vst [vmem:[#allocation14_spill] sm:$0xff] %v6592_v4  ;;  %v427_v4 = vld [vmem:[%s6462_s21 + $0x308] sm:$0xff] }
 0x15b   : > { %5685 = vmatmul.msk.f32.gmra.mxu0 %vm438_vm1, %v370_v5 }
 0x160   : > { %v6596_v6 = vpop.f32.mrf.mxu0 }
 0x161   : > { %10590 = vst [vmem:[#allocation15_spill] sm:$0xff] %v6596_v6 }
 0x163   : > { %5686 = vmatmul.msk.f32.gmra.mxu0 %vm438_vm1, %v371_v7  ;;  %v390_v7 = vld [vmem:[%s6462_s21 + $0x1e0] sm:$0xff] }
 0x168   : > { %v6600_v8 = vpop.f32.mrf.mxu0 }
 0x16b   : > { %5687 = vmatmul.msk.f32.gmra.mxu0 %vm438_vm1, %v372_v9 }
 0x170   : > { %v6604_v10 = vpop.f32.mrf.mxu0 }
 0x173   : > { %5688 = vmatmul.msk.f32.gmra.mxu0 %vm438_vm1, %v373_v11  ;;  %v391_v11 = vld [vmem:[%s6462_s21 + $0x1e8] sm:$0xff] }
 0x178   : > { %v6608_v12 = vpop.f32.mrf.mxu0 }
 0x17b   : > { %5689 = vmatmul.msk.f32.gmra.mxu0 %vm438_vm1, %v374_v13 }
 0x180   : > { %v6612_v14 = vpop.f32.mrf.mxu0 }
 0x183   : > { %5690 = vmatmul.msk.f32.gmra.mxu0 %vm438_vm1, %v375_v15  ;;  %v392_v15 = vld [vmem:[%s6462_s21 + $0x1f0] sm:$0xff] }
 0x188   : > { %v6616_v16 = vpop.f32.mrf.mxu0 }
 0x18b   : > { %5691 = vmatmul.msk.f32.gmra.mxu0 %vm438_vm1, %v376_v17 }
 0x190   : > { %v6620_v18 = vpop.f32.mrf.mxu0 }
 0x193   : > { %5692 = vmatmul.msk.f32.gmra.mxu0 %vm438_vm1, %v377_v19  ;;  %v393_v19 = vld [vmem:[%s6462_s21 + $0x1f8] sm:$0xff] }
 0x198   : > { %v6624_v21 = vpop.f32.mrf.mxu0 }
 0x19b   : > { %5693 = vmatmul.msk.f32.gmra.mxu0 %vm438_vm1, %v378_v23 }
 0x1a0   : > { %v6628_v25 = vpop.f32.mrf.mxu0 }
 0x1a3   : > { %5694 = vmatmul.msk.f32.gmra.mxu0 %vm438_vm1, %v379_v27  ;;  %v394_v27 = vld [vmem:[%s6462_s21 + $0x200] sm:$0xff] }
 0x1a8   : > { %v6632_v29 = vpop.f32.mrf.mxu0 }
 0x1ab   : > { %5695 = vmatmul.msk.f32.gmra.mxu0 %vm438_vm1, %v380_v31 }
 0x1b0   : > { %v6636_v33 = vpop.f32.mrf.mxu0 }
 0x1b3   : > { %5696 = vmatmul.msk.f32.gmra.mxu0 %vm438_vm1, %v381_v35  ;;  %v395_v35 = vld [vmem:[%s6462_s21 + $0x208] sm:$0xff] }
 0x1b8   : > { %v6640_v37 = vpop.f32.mrf.mxu0 }
 0x1bb   : > { %5697 = vmatmul.msk.f32.gmra.mxu0 %vm438_vm1, %v382_v39 }
 0x1c0   : > { %v6644_v41 = vpop.f32.mrf.mxu0 }
 0x1c3   : > { %5698 = vmatmul.msk.f32.gmra.mxu0 %vm438_vm1, %v383_v43  ;;  %v396_v43 = vld [vmem:[%s6462_s21 + $0x210] sm:$0xff] }
 0x1c8   : > { %v6648_v45 = vpop.f32.mrf.mxu0 }
 0x1cb   : > { %5699 = vmatmul.msk.f32.gmra.mxu0 %vm438_vm1, %v384_v47 }
 0x1d0   : > { %v6652_v49 = vpop.f32.mrf.mxu0 }
 0x1d3   : > { %5700 = vmatmul.msk.f32.gmra.mxu0 %vm438_vm1, %v385_v51  ;;  %v397_v51 = vld [vmem:[%s6462_s21 + $0x218] sm:$0xff] }
 0x1d8   : > { %v6656_v53 = vpop.f32.mrf.mxu0 }
 0x1db   : > { %5701 = vmatmul.msk.f32.gmra.mxu0 %vm438_vm1, %v386_v55 }
 0x1e0   : > { %v6660_v57 = vpop.f32.mrf.mxu0 }
 0x1e1   : > { %10591 = vst [vmem:[#allocation16_spill] sm:$0xff] %v6660_v57 }
 0x1e3   : > { %5702 = vmatmul.msk.f32.gmra.mxu0 %vm438_vm1, %v387_v59  ;;  %v398_v59 = vld [vmem:[%s6462_s21 + $0x220] sm:$0xff] }
 0x1e8   : > { %v6664_v61 = vpop.f32.mrf.mxu0 }
 0x1e9   : > { %10592 = vst [vmem:[#allocation17_spill] sm:$0xff] %v6664_v61 }
 0x1eb   : > { %5703 = vmatmul.msk.f32.gmra.mxu0 %vm438_vm1, %v388_v63 }
 0x1f0   : > { %v6668_v1 = vpop.f32.mrf.mxu0 }
 0x1f1   : > { %10593 = vst [vmem:[#allocation18_spill] sm:$0xff] %v6668_v1 }
 0x1f3   : > { %5704 = vmatmul.msk.f32.gmra.mxu0 %vm438_vm1, %v389_v3  ;;  %v399_v3 = vld [vmem:[%s6462_s21 + $0x228] sm:$0xff] }
 0x1f8   : > { %v6672_v5 = vpop.f32.mrf.mxu0 }
 0x1f9   : > { %10594 = vst [vmem:[#allocation19_spill] sm:$0xff] %v6672_v5 }
 0x1fb   : > { %5705 = vmatmul.msk.f32.gmra.mxu0 %vm438_vm1, %v390_v7 }
 0x200   : > { %v6676_v9 = vpop.f32.mrf.mxu0 }
 0x201   : > { %10595 = vst [vmem:[#allocation20_spill] sm:$0xff] %v6676_v9 }
 0x203   : > { %5706 = vmatmul.msk.f32.gmra.mxu0 %vm438_vm1, %v391_v11  ;;  %v400_v11 = vld [vmem:[%s6462_s21 + $0x230] sm:$0xff] }
 0x208   : > { %v6680_v13 = vpop.f32.mrf.mxu0 }
 0x209   : > { %10596 = vst [vmem:[#allocation21_spill] sm:$0xff] %v6680_v13 }
 0x20b   : > { %5707 = vmatmul.msk.f32.gmra.mxu0 %vm438_vm1, %v392_v15 }
 0x210   : > { %v6684_v17 = vpop.f32.mrf.mxu0 }
 0x211   : > { %10597 = vst [vmem:[#allocation22_spill] sm:$0xff] %v6684_v17 }
 0x213   : > { %5708 = vmatmul.msk.f32.gmra.mxu0 %vm438_vm1, %v393_v19  ;;  %v401_v19 = vld [vmem:[%s6462_s21 + $0x238] sm:$0xff] }
 0x218   : > { %v6688_v23 = vpop.f32.mrf.mxu0 }
 0x219   : > { %10598 = vst [vmem:[#allocation23_spill] sm:$0xff] %v6688_v23 }
 0x21b   : > { %5709 = vmatmul.msk.f32.gmra.mxu0 %vm438_vm1, %v394_v27 }
 0x220   : > { %v6692_v31 = vpop.f32.mrf.mxu0 }
 0x221   : > { %10599 = vst [vmem:[#allocation24_spill] sm:$0xff] %v6692_v31 }
 0x223   : > { %5710 = vmatmul.msk.f32.gmra.mxu0 %vm438_vm1, %v395_v35  ;;  %v402_v35 = vld [vmem:[%s6462_s21 + $0x240] sm:$0xff] }
 0x228   : > { %v6696_v39 = vpop.f32.mrf.mxu0 }
 0x229   : > { %10600 = vst [vmem:[#allocation25_spill] sm:$0xff] %v6696_v39 }
 0x22b   : > { %5711 = vmatmul.msk.f32.gmra.mxu0 %vm438_vm1, %v396_v43 }
 0x230   : > { %v6700_v47 = vpop.f32.mrf.mxu0 }
 0x231   : > { %10601 = vst [vmem:[#allocation26_spill] sm:$0xff] %v6700_v47 }
 0x233   : > { %5712 = vmatmul.msk.f32.gmra.mxu0 %vm438_vm1, %v397_v51  ;;  %v403_v51 = vld [vmem:[%s6462_s21 + $0x248] sm:$0xff] }
 0x238   : > { %v6704_v55 = vpop.f32.mrf.mxu0 }
 0x239   : > { %10602 = vst [vmem:[#allocation27_spill] sm:$0xff] %v6704_v55 }
 0x23b   : > { %5713 = vmatmul.msk.f32.gmra.mxu0 %vm438_vm1, %v398_v59 }
 0x240   : > { %v6708_v63 = vpop.f32.mrf.mxu0 }
 0x243   : > { %5714 = vmatmul.msk.f32.gmra.mxu0 %vm438_vm1, %v399_v3  ;;  %v404_v3 = vld [vmem:[%s6462_s21 + $0x250] sm:$0xff] }
 0x248   : > { %v6712_v7 = vpop.f32.mrf.mxu0 }
 0x24b   : > { %5715 = vmatmul.msk.f32.gmra.mxu0 %vm438_vm1, %v400_v11 }
 0x250   : > { %v6716_v15 = vpop.f32.mrf.mxu0 }
 0x253   : > { %5716 = vmatmul.msk.f32.gmra.mxu0 %vm438_vm1, %v401_v19  ;;  %v405_v19 = vld [vmem:[%s6462_s21 + $0x258] sm:$0xff] }
 0x258   : > { %v6720_v27 = vpop.f32.mrf.mxu0 }
 0x25b   : > { %5717 = vmatmul.msk.f32.gmra.mxu0 %vm438_vm1, %v402_v35  ;;  %v406_v35 = vld [vmem:[%s6462_s21 + $0x260] sm:$0xff] }
 0x260   : > { %v6724_v43 = vpop.f32.mrf.mxu0 }
 0x263   : > { %5718 = vmatmul.msk.f32.gmra.mxu0 %vm438_vm1, %v403_v51  ;;  %v407_v51 = vld [vmem:[%s6462_s21 + $0x268] sm:$0xff] }
 0x268   : > { %v6728_v59 = vpop.f32.mrf.mxu0 }
 0x26b   : > { %5719 = vmatmul.msk.f32.gmra.mxu0 %vm438_vm1, %v404_v3  ;;  %v408_v3 = vld [vmem:[%s6462_s21 + $0x270] sm:$0xff] }
 0x270   : > { %v6732_v11 = vpop.f32.mrf.mxu0 }
 0x273   : > { %5720 = vmatmul.msk.f32.gmra.mxu0 %vm438_vm1, %v405_v19  ;;  %v409_v19 = vld [vmem:[%s6462_s21 + $0x278] sm:$0xff] }
 0x278   : > { %v6736_v52 = vpop.f32.mrf.mxu0 }
 0x27b   : > { %5721 = vmatmul.msk.f32.gmra.mxu0 %vm438_vm1, %v406_v35  ;;  %v410_v35 = vld [vmem:[%s6462_s21 + $0x280] sm:$0xff] }
 0x280   : > { %v6740_v57 = vpop.f32.mrf.mxu0 }
 0x283   : > { %5722 = vmatmul.msk.f32.gmra.mxu0 %vm438_vm1, %v407_v51  ;;  %v411_v51 = vld [vmem:[%s6462_s21 + $0x288] sm:$0xff] }
 0x288   : > { %v6744_v61 = vpop.f32.mrf.mxu0 }
 0x28b   : > { %5723 = vmatmul.msk.f32.gmra.mxu0 %vm438_vm1, %v408_v3  ;;  %v412_v3 = vld [vmem:[%s6462_s21 + $0x290] sm:$0xff] }
 0x290   : > { %v6748_v13 = vpop.f32.mrf.mxu0 }
 0x293   : > { %5724 = vmatmul.msk.f32.gmra.mxu0 %vm438_vm1, %v409_v19  ;;  %v413_v19 = vld [vmem:[%s6462_s21 + $0x298] sm:$0xff] }
 0x298   : > { %v6752_v9 = vpop.f32.mrf.mxu0 }
 0x29b   : > { %5725 = vmatmul.msk.f32.gmra.mxu0 %vm438_vm1, %v410_v35  ;;  %v414_v35 = vld [vmem:[%s6462_s21 + $0x2a0] sm:$0xff] }
 0x2a0   : > { %v6756_v17 = vpop.f32.mrf.mxu0 }
 0x2a3   : > { %5726 = vmatmul.msk.f32.gmra.mxu0 %vm438_vm1, %v411_v51  ;;  %v415_v51 = vld [vmem:[%s6462_s21 + $0x2a8] sm:$0xff] }
 0x2a8   : > { %v6760_v5 = vpop.f32.mrf.mxu0 }
 0x2a9   : > { %10603 = vst [vmem:[#allocation28_spill] sm:$0xff] %v6760_v5 }
 0x2ab   : > { %5727 = vmatmul.msk.f32.gmra.mxu0 %vm438_vm1, %v412_v3  ;;  %v416_v3 = vld [vmem:[%s6462_s21 + $0x2b0] sm:$0xff] }
 0x2b0   : > { %v6764_v1 = vpop.f32.mrf.mxu0 }
 0x2b1   : > { %10604 = vst [vmem:[#allocation29_spill] sm:$0xff] %v6764_v1 }
 0x2b3   : > { %5728 = vmatmul.msk.f32.gmra.mxu0 %vm438_vm1, %v413_v19  ;;  %v417_v19 = vld [vmem:[%s6462_s21 + $0x2b8] sm:$0xff] }
 0x2b8   : > { %v6768_v23 = vpop.f32.mrf.mxu0 }
 0x2b9   : > { %10605 = vst [vmem:[#allocation30_spill] sm:$0xff] %v6768_v23 }
 0x2bb   : > { %5729 = vmatmul.msk.f32.gmra.mxu0 %vm438_vm1, %v414_v35  ;;  %v418_v35 = vld [vmem:[%s6462_s21 + $0x2c0] sm:$0xff] }
 0x2c0   : > { %v6772_v58 = vpop.f32.mrf.mxu0 }
 0x2c1   : > { %10606 = vst [vmem:[#allocation31_spill] sm:$0xff] %v6772_v58 }
 0x2c3   : > { %5730 = vmatmul.msk.f32.gmra.mxu0 %vm438_vm1, %v415_v51  ;;  %v419_v51 = vld [vmem:[%s6462_s21 + $0x2c8] sm:$0xff] }
 0x2c8   : > { %v6776_v5 = vpop.f32.mrf.mxu0 }
 0x2c9   : > { %10607 = vst [vmem:[#allocation32_spill] sm:$0xff] %v6776_v5 }
 0x2cb   : > { %5731 = vmatmul.msk.f32.gmra.mxu0 %vm438_vm1, %v416_v3  ;;  %v420_v3 = vld [vmem:[%s6462_s21 + $0x2d0] sm:$0xff] }
 0x2d0   : > { %v6780_v1 = vpop.f32.mrf.mxu0 }
 0x2d1   : > { %10608 = vst [vmem:[#allocation33_spill] sm:$0xff] %v6780_v1 }
 0x2d3   : > { %5732 = vmatmul.msk.f32.gmra.mxu0 %vm438_vm1, %v417_v19  ;;  %v421_v19 = vld [vmem:[%s6462_s21 + $0x2d8] sm:$0xff] }
 0x2d8   : > { %v6784_v23 = vpop.f32.mrf.mxu0 }
 0x2d9   : > { %10609 = vst [vmem:[#allocation34_spill] sm:$0xff] %v6784_v23 }
 0x2db   : > { %5733 = vmatmul.msk.f32.gmra.mxu0 %vm438_vm1, %v418_v35  ;;  %v422_v35 = vld [vmem:[%s6462_s21 + $0x2e0] sm:$0xff] }
 0x2e0   : > { %v6788_v58 = vpop.f32.mrf.mxu0 }
 0x2e1   : > { %10610 = vst [vmem:[#allocation35_spill] sm:$0xff] %v6788_v58 }
 0x2e3   : > { %5734 = vmatmul.msk.f32.gmra.mxu0 %vm438_vm1, %v419_v51  ;;  %v423_v51 = vld [vmem:[%s6462_s21 + $0x2e8] sm:$0xff] }
 0x2e8   : > { %v6792_v5 = vpop.f32.mrf.mxu0 }
 0x2e9   : > { %10611 = vst [vmem:[#allocation36_spill] sm:$0xff] %v6792_v5 }
 0x2eb   : > { %5735 = vmatmul.msk.f32.gmra.mxu0 %vm438_vm1, %v420_v3  ;;  %v424_v3 = vld [vmem:[%s6462_s21 + $0x2f0] sm:$0xff] }
 0x2f0   : > { %v6796_v1 = vpop.f32.mrf.mxu0 }
 0x2f1   : > { %10612 = vst [vmem:[#allocation37_spill] sm:$0xff] %v6796_v1 }
 0x2f3   : > { %5736 = vmatmul.msk.f32.gmra.mxu0 %vm438_vm1, %v421_v19  ;;  %v425_v19 = vld [vmem:[%s6462_s21 + $0x2f8] sm:$0xff] }
 0x2f8   : > { %v6800_v23 = vpop.f32.mrf.mxu0 }
 0x2f9   : > { %10613 = vst [vmem:[#allocation38_spill] sm:$0xff] %v6800_v23 }
 0x2fb   : > { %5737 = vmatmul.msk.f32.gmra.mxu0 %vm438_vm1, %v422_v35  ;;  %v426_v35 = vld [vmem:[%s6462_s21 + $0x300] sm:$0xff]  ;;  %s5582_s21 = sshll.u32 %s324_s17, 4  ;;  %s5583_s21 = int_to_ptr.vmem [resolvable:$true] %s5582_s21 }
 0x300   : > { %v6804_v58 = vpop.f32.mrf.mxu0 }
 0x301   : > { %10614 = vst [vmem:[#allocation39_spill] sm:$0xff] %v6804_v58 }
 0x303   : > { %5738 = vmatmul.msk.f32.gmra.mxu0 %vm438_vm1, %v423_v51 }
 0x308   : > { %v6808_v5 = vpop.f32.mrf.mxu0 }
 0x30b   : > { %5739 = vmatmul.msk.f32.gmra.mxu0 %vm438_vm1, %v424_v3 }
 0x310   : > { %v6812_v31 = vpop.f32.mrf.mxu0 }
 0x313   : > { %5740 = vmatmul.msk.f32.gmra.mxu0 %vm438_vm1, %v425_v19 }
 0x318   : > { %v6816_v56 = vpop.f32.mrf.mxu0 }
 0x31b   : > { %5741 = vmatmul.msk.f32.gmra.mxu0 %vm438_vm1, %v426_v35 }
 0x320   : > { %v6820_v54 = vpop.f32.mrf.mxu0 }
 0x323   : > { %5742 = vmatmul.msk.f32.gmra.mxu0 %vm438_vm1, %v427_v4  ;;  %v6839_v4 = vld [vmem:[%s10567_s2] ss:$0 sm:$0xff] }
 0x324   : > { %v6847_v39 = vadd.f32 %v6839_v4, %v6512_v28  ;;  %v6855_v6 = vadd.f32 %v6839_v4, %v6520_v32  ;;  %v6859_v1 = vadd.f32 %v6839_v4, %v6524_v34  ;;  %v6867_v28 = vadd.f32 %v6839_v4, %v6532_v38 }
 0x325   : > { %v6875_v32 = vadd.f32 %v6839_v4, %v6540_v42  ;;  %v6879_v34 = vadd.f32 %v6839_v4, %v6544_v44  ;;  %v803_v38 = vadd.f32 %v6839_v4, %v6552_v48  ;;  %v6889_v47 = vadd.f32 %v6839_v4, %v6500_v22 }
 0x326   : > { %10616 = vst [vmem:[#allocation41_spill] sm:$0xff] %v6847_v39  ;;  %v806_v42 = vadd.f32 %v6839_v4, %v6556_v50  ;;  %v6910_v55 = vadd.f32 %v6839_v4, %v6600_v8  ;;  %v6914_v48 = vadd.f32 %v6839_v4, %v6604_v10  ;;  %v881_v58 = vadd.f32 %v6839_v4, %v6656_v53 }
 0x327   : > { %10618 = vst [vmem:[#allocation43_spill] sm:$0xff] %v6889_v47  ;;  %v6920_v22 = vadd.f32 %v6839_v4, %v6608_v12  ;;  %v6933_v10 = vadd.f32 %v6839_v4, %v6620_v18  ;;  %v6937_v53 = vadd.f32 %v6839_v4, %v6624_v21  ;;  %v878_v12 = vadd.f32 %v6839_v4, %v6652_v49 }
 0x328   : > { %v6824_v51 = vpop.f32.mrf.mxu0  ;;  %10620 = vst [vmem:[#allocation45_spill] sm:$0xff] %v6910_v55  ;;  %v956_v18 = vadd.f32 %v6839_v4, %v6756_v17  ;;  %v875_v49 = vadd.f32 %v6839_v4, %v6648_v45  ;;  %v947_v45 = vadd.f32 %v6839_v4, %v6744_v61  ;;  %v941_v61 = vadd.f32 %v6839_v4, %v6736_v52 }
 0x329   : > { %10621 = vst [vmem:[#allocation46_spill] sm:$0xff] %v6914_v48 }
 0x32a   : > { %10622 = vst [vmem:[#allocation47_spill] sm:$0xff] %v6920_v22  ;;  %v1125_v50 = vmax.f32 %v956_v18, 0.0  ;;  %v1098_v48 = vmax.f32 %v875_v49, 0.0 }
 0x32b   : > { %5743 = vmatmul.msk.f32.gmra.mxu0 %vm438_vm1, %v428_v2  ;;  %v6843_v2 = vadd.f32 %v6839_v4, %v6508_v26  ;;  %v6863_v26 = vadd.f32 %v6839_v4, %v6528_v36  ;;  %v6883_v36 = vadd.f32 %v6839_v4, %v6548_v46  ;;  %v1075_v46 = vmax.f32 %v806_v42, 0.0 }
 0x32c   : > { %v6949_v42 = vadd.f32 %v6839_v4, %v6632_v29  ;;  %v869_v29 = vadd.f32 %v6839_v4, %v6640_v37 }
 0x32d   : > { %10615 = vst [vmem:[#allocation40_spill] sm:$0xff] %v6843_v2  ;;  %v1073_v23 = vmax.f32 %v6883_v36, 0.0  ;;  %v1074_v2 = vmax.f32 %v803_v38, 0.0  ;;  %v6924_v36 = vadd.f32 %v6839_v4, %v6612_v14  ;;  %v6928_v38 = vadd.f32 %v6839_v4, %v6616_v16 }
 0x32e   : > { %v953_v14 = vadd.f32 %v6839_v4, %v6752_v9  ;;  %v6945_v16 = vadd.f32 %v6839_v4, %v6628_v25  ;;  %v1100_v9 = vmax.f32 %v881_v58, 0.0  ;;  %v950_v25 = vadd.f32 %v6839_v4, %v6748_v13 }
 0x330   : > { %v6828_v3 = vpop.f32.mrf.mxu0  ;;  %v1124_v58 = vmax.f32 %v953_v14, 0.0  ;;  %v1123_v37 = vmax.f32 %v950_v25, 0.0  ;;  %v1122_v14 = vmax.f32 %v947_v45, 0.0  ;;  %v1096_v25 = vmax.f32 %v869_v29, 0.0 }
 0x333   : > { %5744 = vmatmul.msk.f32.gmra.mxu0 %vm438_vm1, %v429_v0  ;;  %v6851_v0 = vadd.f32 %v6839_v4, %v6516_v30  ;;  %v6871_v30 = vadd.f32 %v6839_v4, %v6536_v40  ;;  %v6893_v40 = vadd.f32 %v6839_v4, %v6504_v24 }
 0x335   : > { %10617 = vst [vmem:[#allocation42_spill] sm:$0xff] %v6851_v0 }
 0x336   : > { %10619 = vst [vmem:[#allocation44_spill] sm:$0xff] %v6893_v40  ;;  %v1099_v40 = vmax.f32 %v878_v12, 0.0 }
 0x338   : > { %v6832_v19 = vpop.f32.mrf.mxu0 }
 0x339   : > { %v1013_v18 = vadd.f32 %v6839_v4, %v6832_v19 }
 0x340   : > { %v6834_v62 = vpop.f32.mrf.mxu0 }
 0x348   : > { %v1018_v35 = vpop.f32.mrf.mxu0 }
 0x349   : > { %v1019_v13 = vadd.f32 %v6839_v4, %v1018_v35  ;;  %v1174_v35 = vmax.f32 %v1074_v2, %v1099_v40 }
 0x350   : > { %v1021_v60 = vpop.f32.mrf.mxu0 }
 0x351   : > { %v1022_v24 = vadd.f32 %v6839_v4, %v1021_v60  ;;  %v944_v60 = vadd.f32 %v6839_v4, %v6740_v57 }
 0x358   : > { %v1024_v20 = vpop.f32.mrf.mxu0 }
 0x359   : > { %v1025_v21 = vadd.f32 %v6839_v4, %v1024_v20 }
 0x35b   : > { %v1148_v55 = vmax.f32 %v1025_v21, 0.0  ;;  %v1146_v21 = vmax.f32 %v1019_v13, 0.0 }
 0x35d   : > { %v1198_v57 = vmax.f32 %v1123_v37, %v1148_v55  ;;  %v935_v55 = vadd.f32 %v6839_v4, %v6728_v59  ;;  %v10624_v59 = vmax.f32 %v6875_v32, 0.0  ;;  %v1001_v32 = vadd.f32 %v6839_v4, %v6816_v56 }
 0x35f   : > { %v1118_v13 = vmax.f32 %v935_v55, 0.0 }
 0x360   : > { %v1027_v44 = vpop.f32.mrf.mxu0 }
 0x361   : > { %v1028_v8 = vadd.f32 %v6839_v4, %v1027_v44  ;;  %v6956_v44 = vadd.f32 %v6839_v4, %v6636_v33  ;;  %v872_v33 = vadd.f32 %v6839_v4, %v6644_v41  ;;  %v1147_v41 = vmax.f32 %v1022_v24, 0.0 }
 0x363   : > { %v1149_v17 = vmax.f32 %v1028_v8, 0.0  ;;  %v1175_v8 = vmax.f32 %v1075_v46, %v1100_v9  ;;  %v1097_v22 = vmax.f32 %v872_v33, 0.0  ;;  %v938_v46 = vadd.f32 %v6839_v4, %v6732_v11 }
 0x364   : > { %v1197_v40 = vmax.f32 %v1122_v14, %v1147_v41  ;;  %v1095_v19 = vmax.f32 %v6956_v44, 0.0  ;;  %v1120_v9 = vmax.f32 %v941_v61, 0.0  ;;  %v10623_v11 = vmax.f32 %v6879_v34, 0.0 }
 0x365   : > { %v1199_v0 = vmax.f32 %v1124_v58, %v1149_v17  ;;  %v932_v44 = vadd.f32 %v6839_v4, %v6724_v43  ;;  %v1171_v33 = vmax.f32 %v10624_v59, %v1096_v25  ;;  %v1004_v34 = vadd.f32 %v6839_v4, %v6820_v54  ;;  %v10635_v59 = vld [vmem:[#allocation42_spill] sm:$0xff] }
 0x366   : > { %v1172_v29 = vmax.f32 %v10623_v11, %v1097_v22  ;;  %v1093_v58 = vmax.f32 %v6945_v16, 0.0  ;;  %v10625_v43 = vmax.f32 %v6871_v30, 0.0  ;;  %v926_v16 = vadd.f32 %v6839_v4, %v6716_v15  ;;  %v10632_v11 = vld [vmem:[#allocation38_spill] sm:$0xff] }
 0x367   : > { %v1224_v2 = vmax.f32 %v1174_v35, %v1199_v0  ;;  %v1094_v0 = vmax.f32 %v6949_v42, 0.0  ;;  %v929_v42 = vadd.f32 %v6839_v4, %v6720_v27  ;;  %v1117_v41 = vmax.f32 %v932_v44, 0.0 }
 0x368   : > { %v1030_v47 = vpop.f32.mrf.mxu0  ;;  %v10626_v27 = vmax.f32 %v6867_v28, 0.0  ;;  %v998_v61 = vadd.f32 %v6839_v4, %v6812_v31  ;;  %v1141_v56 = vmax.f32 %v1004_v34, 0.0  ;;  %v995_v28 = vadd.f32 %v6839_v4, %v6808_v5  ;;  %v10637_v34 = vld [vmem:[#allocation37_spill] sm:$0xff] }
 0x369   : > { %v1031_v20 = vadd.f32 %v6839_v4, %v1030_v47  ;;  %v1016_v47 = vadd.f32 %v6839_v4, %v6834_v62  ;;  %v1121_v62 = vmax.f32 %v944_v60, 0.0  ;;  %v1170_v60 = vmax.f32 %v10625_v43, %v1095_v19  ;;  %v10630_v19 = vld [vmem:[#allocation27_spill] sm:$0xff]  ;;  %v10639_v43 = vld [vmem:[#allocation46_spill] sm:$0xff] }
 0x36a   : > { %v1169_v30 = vmax.f32 %v10626_v27, %v1094_v0  ;;  %v1116_v15 = vmax.f32 %v929_v42, 0.0  ;;  %v10634_v0 = vld [vmem:[#allocation26_spill] sm:$0xff]  ;;  %v10638_v42 = vld [vmem:[#allocation15_spill] sm:$0xff] }
 0x36b   : > { %v1150_v39 = vmax.f32 %v1031_v20, 0.0  ;;  %v1145_v52 = vmax.f32 %v1016_v47, 0.0  ;;  %v1196_v17 = vmax.f32 %v1121_v62, %v1146_v21  ;;  %v1119_v20 = vmax.f32 %v938_v46, 0.0 }
 0x36c   : > { %v1092_v47 = vmax.f32 %v6937_v53, 0.0  ;;  %v923_v53 = vadd.f32 %v6839_v4, %v6712_v7  ;;  %v10627_v21 = vmax.f32 %v6863_v26, 0.0  ;;  %v1090_v46 = vmax.f32 %v6928_v38, 0.0 }
 0x36d   : > { %v1200_v12 = vmax.f32 %v1125_v50, %v1150_v39  ;;  %v1173_v39 = vmax.f32 %v1073_v23, %v1098_v48  ;;  %v1010_v50 = vadd.f32 %v6839_v4, %v6828_v3  ;;  %v1007_v23 = vadd.f32 %v6839_v4, %v6824_v51 }
 0x36e   : > { %v1144_v48 = vmax.f32 %v1013_v18, 0.0  ;;  %v1222_v51 = vmax.f32 %v1172_v29, %v1197_v40  ;;  %v1195_v45 = vmax.f32 %v1120_v9, %v1145_v52  ;;  %v1221_v54 = vmax.f32 %v1171_v33, %v1196_v17 }
 0x36f   : > { %v1225_v49 = vmax.f32 %v1175_v8, %v1200_v12  ;;  %v1223_v3 = vmax.f32 %v1173_v39, %v1198_v57  ;;  %v1143_v22 = vmax.f32 %v1010_v50, 0.0  ;;  %v1142_v37 = vmax.f32 %v1007_v23, 0.0  ;;  %v10629_v50 = vld [vmem:[#allocation39_spill] sm:$0xff] }
 0x370   : > { %v6981_v24 = vpop.f32.mrf.mxu0  ;;  %v1194_v8 = vmax.f32 %v1119_v20, %v1144_v48  ;;  %v1220_v14 = vmax.f32 %v1170_v60, %v1195_v45  ;;  %v1091_v18 = vmax.f32 %v6933_v10, 0.0  ;;  %v1140_v57 = vmax.f32 %v1001_v32, 0.0  ;;  %v10640_v32 = vld [vmem:[#allocation25_spill] sm:$0xff] }
 0x371   : > { %2361 = vmatpush.msrb.mxu0 %v1225_v49  ;;  %6207 = vmatpush.msra.mxu1 %v1225_v49  ;;  %v1193_v35 = vmax.f32 %v1118_v13, %v1143_v22  ;;  %v1168_v49 = vmax.f32 %v10627_v21, %v1093_v58  ;;  %v1192_v25 = vmax.f32 %v1117_v41, %v1142_v37  ;;  %v1115_v62 = vmax.f32 %v926_v16, 0.0 }
 0x372   : > { %v1219_v31 = vmax.f32 %v1169_v30, %v1194_v8  ;;  %v920_v10 = vadd.f32 %v6839_v4, %v6708_v63  ;;  %v10628_v7 = vmax.f32 %v6859_v1, 0.0  ;;  %v992_v26 = vadd.f32 %v6839_v4, %v10629_v50 }
 0x373   : > { %2362 = vmatpush.msrb.mxu0 %v1224_v2  ;;  %6208 = vmatpush.msra.mxu1 %v1224_v2  ;;  %v1139_v52 = vmax.f32 %v998_v61, 0.0  ;;  %v1218_v5 = vmax.f32 %v1168_v49, %v1193_v35  ;;  %v1191_v2 = vmax.f32 %v1116_v15, %v1141_v56  ;;  %v1089_v40 = vmax.f32 %v6924_v36, 0.0  ;;  %v10643_v61 = vld [vmem:[#allocation5_spill] sm:$0xff]  ;;  %v10646_v15 = vld [vmem:[#allocation40_spill] sm:$0xff] }
 0x374   : > { %v1167_v39 = vmax.f32 %v10628_v7, %v1092_v47  ;;  %v917_v38 = vadd.f32 %v6839_v4, %v10630_v19  ;;  %v1114_v55 = vmax.f32 %v923_v53, 0.0  ;;  %v10631_v63 = vmax.f32 %v6855_v6, 0.0 }
 0x375   : > { %2363 = vmatpush.msrb.mxu0 %v1223_v3  ;;  %6209 = vmatpush.msra.mxu1 %v1223_v3  ;;  %v989_v1 = vadd.f32 %v6839_v4, %v10632_v11  ;;  %v1138_v29 = vmax.f32 %v995_v28, 0.0  ;;  %v1190_v48 = vmax.f32 %v1115_v62, %v1140_v57  ;;  %v10633_v3 = vld [vmem:[#allocation47_spill] sm:$0xff]  ;;  %v914_v36 = vadd.f32 %v6839_v4, %v10634_v0  ;;  %v1299_v11 = vld [vmem:[%s10568_s3 + $0x200] sm:$0xff] }
 0x376   : > { %v1166_v9 = vmax.f32 %v10631_v63, %v1091_v18  ;;  %v1217_v23 = vmax.f32 %v1167_v39, %v1192_v25  ;;  %v1088_v17 = vmax.f32 %v10633_v3, 0.0  ;;  %v1113_v44 = vmax.f32 %v920_v10, 0.0  ;;  %v10645_v18 = vld [vmem:[#allocation45_spill] sm:$0xff] }
 0x377   : > { %2364 = vmatpush.msrb.mxu0 %v1222_v51  ;;  %6210 = vmatpush.msra.mxu1 %v1222_v51  ;;  %v10636_v33 = vmax.f32 %v10635_v59, 0.0  ;;  %v986_v22 = vadd.f32 %v6839_v4, %v10637_v34  ;;  %v1137_v51 = vmax.f32 %v992_v26, 0.0  ;;  %v1189_v58 = vmax.f32 %v1114_v55, %v1139_v52  ;;  %v1239_v3 = vld [vmem:[%s10568_s3 + $0x20] sm:$0xff]  ;;  %v10650_v34 = vld [vmem:[#allocation11_spill] sm:$0xff] }
 0x378   : > { %v7009_v12 = vpop.f32.mrf.mxu0  ;;  %v1216_v45 = vmax.f32 %v1166_v9, %v1191_v2  ;;  %v836_v13 = vadd.f32 %v6839_v4, %v10638_v42  ;;  %v1087_v60 = vmax.f32 %v10639_v43, 0.0  ;;  %v911_v37 = vadd.f32 %v6839_v4, %v10640_v32  ;;  %v1235_v9 = vld [vmem:[%s10568_s3] sm:$0xff] }
 0x379   : > { %2365 = vmatpush.msrb.mxu0 %v1221_v54  ;;  %6211 = vmatpush.msra.mxu1 %v1221_v54  ;;  %v1165_v6 = vmax.f32 %v10636_v33, %v1090_v46  ;;  %v10641_v54 = vld [vmem:[#allocation41_spill] sm:$0xff]  ;;  %v1112_v16 = vmax.f32 %v917_v38, 0.0  ;;  %v1136_v41 = vmax.f32 %v989_v1, 0.0  ;;  %v1188_v30 = vmax.f32 %v1113_v44, %v1138_v29  ;;  %v10648_v46 = vld [vmem:[#allocation43_spill] sm:$0xff]  ;;  %v10649_v33 = vld [vmem:[#allocation10_spill] sm:$0xff] }
 0x37a   : > { %v10642_v8 = vmax.f32 %v10641_v54, 0.0  ;;  %v761_v56 = vadd.f32 %v6839_v4, %v10643_v61  ;;  %v1086_v53 = vmax.f32 %v10645_v18, 0.0  ;;  %v10647_v21 = vmax.f32 %v10646_v15, 0.0  ;;  %v1237_v29 = vld [vmem:[%s10568_s3 + $0x10] sm:$0xff] }
 0x37b   : > { %2366 = vmatpush.msrb.mxu0 %v1220_v14  ;;  %6212 = vmatpush.msra.mxu1 %v1220_v14  ;;  %v1215_v27 = vmax.f32 %v1165_v6, %v1190_v48  ;;  %v10644_v14 = vld [vmem:[#allocation44_spill] sm:$0xff]  ;;  %v1111_v28 = vmax.f32 %v914_v36, 0.0  ;;  %v1135_v57 = vmax.f32 %v986_v22, 0.0  ;;  %v1187_v25 = vmax.f32 %v1112_v16, %v1137_v51  ;;  %v1241_v36 = vld [vmem:[%s10568_s3 + $0x30] sm:$0xff]  ;;  %v10657_v16 = vld [vmem:[#allocation9_spill] sm:$0xff] }
 0x37c   : > { %v1164_v47 = vmax.f32 %v10642_v8, %v1089_v40  ;;  %v1062_v35 = vmax.f32 %v10644_v14, 0.0  ;;  %v1163_v49 = vmax.f32 %v10647_v21, %v1088_v17  ;;  %v1061_v10 = vmax.f32 %v10648_v46, 0.0  ;;  %v1303_v17 = vld [vmem:[%s10568_s3 + $0x220] sm:$0xff]  ;;  %v1305_v44 = vld [vmem:[%s10568_s3 + $0x230] sm:$0xff] }
 0x37d   : > { %2367 = vmatpush.msrb.mxu0 %v1219_v31  ;;  %6213 = vmatpush.msra.mxu1 %v1219_v31  ;;  %v1085_v62 = vmax.f32 %v836_v13, 0.0  ;;  %v1110_v7 = vmax.f32 %v911_v37, 0.0  ;;  %v1186_v26 = vmax.f32 %v1111_v28, %v1136_v41  ;;  %v7087_v6 = vadd.f32 %v6839_v4, %v10649_v33  ;;  %v10651_v51 = vld [vmem:[#allocation12_spill] sm:$0xff]  ;;  %v10653_v13 = vld [vmem:[#allocation14_spill] sm:$0xff]  ;;  %v10659_v21 = vld [vmem:[#allocation35_spill] sm:$0xff] }
 0x37e   : > { %v1214_v31 = vmax.f32 %v1164_v47, %v1189_v58  ;;  %v1213_v39 = vmax.f32 %v1163_v49, %v1188_v30  ;;  %v1162_v50 = vmax.f32 %v1062_v35, %v1087_v60  ;;  %v1161_v40 = vmax.f32 %v1061_v10, %v1086_v53  ;;  %v10652_v58 = vld [vmem:[#allocation13_spill] sm:$0xff]  ;;  %v10654_v60 = vld [vmem:[#allocation7_spill] sm:$0xff]  ;;  %v10655_v37 = vld [vmem:[#allocation8_spill] sm:$0xff] }
 0x37f   : > { %2368 = vmatpush.msrb.mxu0 %v1218_v5  ;;  %6214 = vmatpush.msra.mxu1 %v1218_v5  ;;  %v1060_v5 = vmax.f32 %v761_v56, 0.0  ;;  %v1185_v19 = vmax.f32 %v1110_v7, %v1135_v57  ;;  %v7091_v22 = vadd.f32 %v6839_v4, %v10650_v34  ;;  %v830_v42 = vadd.f32 %v6839_v4, %v10652_v58  ;;  %v10656_v8 = vld [vmem:[#allocation24_spill] sm:$0xff]  ;;  %v10658_v53 = vld [vmem:[#allocation23_spill] sm:$0xff]  ;;  %v10660_v57 = vld [vmem:[#allocation18_spill] sm:$0xff] }
 0x380   : > { %v7039_v20 = vpop.f32.mrf.mxu0  ;;  %v1212_v2 = vmax.f32 %v1162_v50, %v1187_v25  ;;  %v1211_v38 = vmax.f32 %v1161_v40, %v1186_v26  ;;  %v833_v43 = vadd.f32 %v6839_v4, %v10653_v13  ;;  %v7101_v32 = vadd.f32 %v6839_v4, %v10654_v60  ;;  %v1243_v56 = vld [vmem:[%s10568_s3 + $0x40] sm:$0xff] }
 0x381   : > { %2369 = vmatpush.msrb.mxu0 %v1217_v23  ;;  %6215 = vmatpush.msra.mxu1 %v1217_v23  ;;  %v1160_v55 = vmax.f32 %v1060_v5, %v1085_v62  ;;  %v1301_v23 = vld [vmem:[%s10568_s3 + $0x210] sm:$0xff]  ;;  %v7105_v54 = vadd.f32 %v6839_v4, %v10655_v37  ;;  %v908_v47 = vadd.f32 %v6839_v4, %v10656_v8  ;;  %v1081_v30 = vmax.f32 %v7091_v22, 0.0  ;;  %v1307_v14 = vld [vmem:[%s10568_s3 + $0x240] sm:$0xff] }
 0x382   : > { %v7111_v41 = vadd.f32 %v6839_v4, %v10657_v16  ;;  %v1083_v18 = vmax.f32 %v830_v42, 0.0  ;;  %v905_v15 = vadd.f32 %v6839_v4, %v10658_v53  ;;  %v980_v49 = vadd.f32 %v6839_v4, %v10659_v21  ;;  %v10661_v25 = vld [vmem:[#allocation36_spill] sm:$0xff]  ;;  %v10662_v62 = vld [vmem:[#allocation19_spill] sm:$0xff]  ;;  %v10664_v5 = vld [vmem:[#allocation34_spill] sm:$0xff] }
 0x383   : > { %2370 = vmatpush.msrb.mxu0 %v1216_v45  ;;  %6216 = vmatpush.msra.mxu1 %v1216_v45  ;;  %v1210_v63 = vmax.f32 %v1160_v55, %v1185_v19  ;;  %v827_v45 = vadd.f32 %v6839_v4, %v10651_v51  ;;  %v1084_v28 = vmax.f32 %v833_v43, 0.0  ;;  %v983_v46 = vadd.f32 %v6839_v4, %v10661_v25  ;;  %v10665_v19 = vld [vmem:[#allocation20_spill] sm:$0xff]  ;;  %v1245_v37 = vld [vmem:[%s10568_s3 + $0x50] sm:$0xff] }
 0x384   : > { %v7135_v7 = vadd.f32 %v6839_v4, %v10662_v62  ;;  %v1109_v26 = vmax.f32 %v908_v47, 0.0  ;;  %v10669_v16 = vld [vmem:[#allocation31_spill] sm:$0xff]  ;;  %v1034_v22 = vadd.f32 %v6839_v4, %v6981_v24 }
 0x385   : > { %2371 = vmatpush.msrb.mxu0 %v1215_v27  ;;  %6217 = vmatpush.msra.mxu1 %v1215_v27  ;;  %v1080_v27 = vmax.f32 %v7087_v6, 0.0  ;;  %v1082_v35 = vmax.f32 %v827_v45, 0.0  ;;  %v10668_v45 = vld [vmem:[#allocation32_spill] sm:$0xff] }
 0x386   : > { %v1184_v51 = vmax.f32 %v1084_v28, %v1109_v26  ;;  %v10670_v28 = vld [vmem:[#allocation30_spill] sm:$0xff]  ;;  %v10672_v26 = vld [vmem:[#allocation29_spill] sm:$0xff] }
 0x387   : > { %2372 = vmatpush.msrb.mxu0 %v1214_v31  ;;  %6218 = vmatpush.msra.mxu1 %v1214_v31  ;;  %v7128_v31 = vadd.f32 %v6839_v4, %v10660_v57  ;;  %v965_v57 = vadd.f32 %v6839_v4, %v10670_v28  ;;  %v1262_v28 = vld [vmem:[%s10568_s3 + $0xd8] sm:$0xff] }
 0x388   : > { %v7059_v52 = vpop.f32.mrf.mxu0 }
 0x389   : > { %2373 = vmatpush.msrb.mxu0 %v1213_v39  ;;  %6219 = vmatpush.msra.mxu1 %v1213_v39  ;;  %v10663_v39 = vld [vmem:[#allocation22_spill] sm:$0xff]  ;;  %v1043_v42 = vadd.f32 %v6839_v4, %v7059_v52  ;;  %v1040_v52 = vadd.f32 %v6839_v4, %v7039_v20  ;;  %v10671_v20 = vld [vmem:[#allocation17_spill] sm:$0xff] }
 0x38a   : > { %v902_v50 = vadd.f32 %v6839_v4, %v10663_v39  ;;  %v887_v39 = vadd.f32 %v6839_v4, %v10671_v20  ;;  %v1261_v20 = vld [vmem:[%s10568_s3 + $0xd0] sm:$0xff] }
 0x38b   : > { %2374 = vmatpush.msrb.mxu0 %v1212_v2  ;;  %6220 = vmatpush.msra.mxu1 %v1212_v2  ;;  %v977_v2 = vadd.f32 %v6839_v4, %v10664_v5  ;;  %v962_v5 = vadd.f32 %v6839_v4, %v10672_v26  ;;  %v1327_v26 = vld [vmem:[%s10568_s3 + $0x2e0] sm:$0xff] }
 0x38c   : > { %v1107_v34 = vmax.f32 %v902_v50, 0.0  ;;  %v1104_v50 = vmax.f32 %v7135_v7, 0.0 }
 0x38d   : > { %2375 = vmatpush.msrb.mxu0 %v1211_v38  ;;  %6221 = vmatpush.msra.mxu1 %v1211_v38  ;;  %v896_v38 = vadd.f32 %v6839_v4, %v10665_v19  ;;  %v1132_v58 = vmax.f32 %v977_v2, 0.0 }
 0x38f   : > { %2376 = vmatpush.msrb.mxu0 %v1210_v63  ;;  %6222 = vmatpush.msra.mxu1 %v1210_v63  ;;  %v1105_v21 = vmax.f32 %v896_v38, 0.0  ;;  %v1079_v38 = vmax.f32 %v7111_v41, 0.0  ;;  %v1078_v41 = vmax.f32 %v7105_v54, 0.0 }
 0x390   : > { %v1045_v1 = vpop.f32.mrf.mxu0  ;;  %2377 = vmatmul.f32.vlgmr.msrb.gmra.mxu0 %v1235_v9  ;;  %2473 = vmatmul.f32.vlgmr.msra.gmra.mxu1 %v1299_v11  ;;  %v10666_v11 = vld [vmem:[#allocation21_spill] sm:$0xff] }
 0x391   : > { %v1180_v7 = vmax.f32 %v1080_v27, %v1105_v21  ;;  %v1102_v27 = vmax.f32 %v887_v39, 0.0  ;;  %v1255_v21 = vld [vmem:[%s10568_s3 + $0xa0] sm:$0xff]  ;;  %v1325_v39 = vld [vmem:[%s10568_s3 + $0x2d0] sm:$0xff] }
 0x398   : > { %v1048_v48 = vpop.f32.mrf.mxu0  ;;  %2380 = vmatmul.f32.gmra.mxu0 %v1237_v29  ;;  %2476 = vmatmul.f32.gmra.mxu1 %v1301_v23  ;;  %v899_v29 = vadd.f32 %v6839_v4, %v10666_v11  ;;  %v1108_v23 = vmax.f32 %v905_v15, 0.0 }
 0x399   : > { %v1049_v55 = vadd.f32 %v6839_v4, %v1048_v48  ;;  %v971_v48 = vadd.f32 %v6839_v4, %v10668_v45 }
 0x39a   : > { %v1106_v8 = vmax.f32 %v899_v29, 0.0  ;;  %v1183_v47 = vmax.f32 %v1083_v18, %v1108_v23  ;;  %v1037_v18 = vadd.f32 %v6839_v4, %v7009_v12  ;;  %v1247_v29 = vld [vmem:[%s10568_s3 + $0x60] sm:$0xff] }
 0x39b   : > { %v1156_v13 = vmax.f32 %v1049_v55, 0.0  ;;  %v1130_v25 = vmax.f32 %v971_v48, 0.0  ;;  %v1103_v55 = vmax.f32 %v7128_v31, 0.0  ;;  %v10673_v31 = vld [vmem:[#allocation16_spill] sm:$0xff] }
 0x39c   : > { %v884_v6 = vadd.f32 %v6839_v4, %v10673_v31  ;;  %v10674_v23 = vld [vmem:[#allocation28_spill] sm:$0xff] }
 0x39d   : > { %v959_v24 = vadd.f32 %v6839_v4, %v10674_v23  ;;  %v1335_v23 = vld [vmem:[%s10568_s3 + $0x320] sm:$0xff] }
 0x3a0   : > { %v1051_v0 = vpop.f32.mrf.mxu0  ;;  %2383 = vmatmul.f32.gmra.mxu0 %v1239_v3  ;;  %2479 = vmatmul.f32.gmra.mxu1 %v1303_v17  ;;  %v10667_v3 = vld [vmem:[#allocation33_spill] sm:$0xff] }
 0x3a1   : > { %v1052_v10 = vadd.f32 %v6839_v4, %v1051_v0  ;;  %v974_v17 = vadd.f32 %v6839_v4, %v10667_v3  ;;  %v1133_v0 = vmax.f32 %v980_v49, 0.0  ;;  %v1182_v49 = vmax.f32 %v1082_v35, %v1107_v34  ;;  %v1311_v3 = vld [vmem:[%s10568_s3 + $0x260] sm:$0xff] }
 0x3a2   : > { %v1181_v35 = vmax.f32 %v1081_v30, %v1106_v8  ;;  %v1128_v30 = vmax.f32 %v965_v57, 0.0  ;;  %v1077_v34 = vmax.f32 %v7101_v32, 0.0  ;;  %v1249_v32 = vld [vmem:[%s10568_s3 + $0x70] sm:$0xff] }
 0x3a3   : > { %v1313_v8 = vld [vmem:[%s10568_s3 + $0x270] sm:$0xff] }
 0x3a4   : > { %v1257_v57 = vld [vmem:[%s10568_s3 + $0xb0] sm:$0xff] }
 0x3a8   : > { %v1054_v59 = vpop.f32.mrf.mxu0  ;;  %2386 = vmatmul.f32.gmra.mxu0 %v1241_v36  ;;  %2482 = vmatmul.f32.gmra.mxu1 %v1305_v44  ;;  %v1134_v36 = vmax.f32 %v983_v46, 0.0  ;;  %v1046_v44 = vadd.f32 %v6839_v4, %v1045_v1  ;;  %v1309_v1 = vld [vmem:[%s10568_s3 + $0x250] sm:$0xff]  ;;  %v1154_v46 = vmax.f32 %v1043_v42, 0.0  ;;  %v1126_v42 = vmax.f32 %v959_v24, 0.0  ;;  %v1278_v24 = vld [vmem:[%s10568_s3 + $0x158] sm:$0xff] }
 0x3a9   : > { %v1055_v61 = vadd.f32 %v6839_v4, %v1054_v59  ;;  %v1157_v59 = vmax.f32 %v1052_v10, 0.0 }
 0x3ab   : > { %v1158_v63 = vmax.f32 %v1055_v61, 0.0  ;;  %v968_v61 = vadd.f32 %v6839_v4, %v10669_v16  ;;  %v1207_v53 = vmax.f32 %v1132_v58, %v1157_v59  ;;  %v10675_v59 = vld [vmem:[#allocation6_spill] sm:$0xff]  ;;  %v1101_v58 = vmax.f32 %v884_v6, 0.0 }
 0x3ac   : > { %v809_v54 = vadd.f32 %v6839_v4, %v10675_v59  ;;  %v1256_v16 = vld [vmem:[%s10568_s3 + $0xa8] sm:$0xff] }
 0x3ad   : > { %v1208_v43 = vmax.f32 %v1133_v0, %v1158_v63  ;;  %v1129_v2 = vmax.f32 %v968_v61, 0.0  ;;  %v1232_v19 = vmax.f32 %v1182_v49, %v1207_v53  ;;  %v1152_v63 = vmax.f32 %v1037_v18, 0.0  ;;  %v1251_v61 = vld [vmem:[%s10568_s3 + $0x80] sm:$0xff]  ;;  %v1317_v53 = vld [vmem:[%s10568_s3 + $0x290] sm:$0xff]  ;;  %v1264_v18 = vld [vmem:[%s10568_s3 + $0xe8] sm:$0xff] }
 0x3ae   : > { %v1127_v0 = vmax.f32 %v962_v5, 0.0  ;;  %v1319_v49 = vld [vmem:[%s10568_s3 + $0x2a0] sm:$0xff]  ;;  %v1270_v5 = vld [vmem:[%s10568_s3 + $0x118] sm:$0xff]  ;;  %v1280_v59 = vld [vmem:[%s10568_s3 + $0x168] sm:$0xff] }
 0x3af   : > { %v1233_v62 = vmax.f32 %v1183_v47, %v1208_v43 }
 0x3b0   : > { %v1057_v40 = vpop.f32.mrf.mxu0  ;;  %2389 = vmatmul.f32.gmra.mxu0 %v1243_v56  ;;  %2485 = vmatmul.f32.gmra.mxu1 %v1307_v14  ;;  %v1131_v56 = vmax.f32 %v974_v17, 0.0  ;;  %v1155_v14 = vmax.f32 %v1046_v44, 0.0  ;;  %v1179_v17 = vmax.f32 %v1079_v38, %v1104_v50  ;;  %v1202_v45 = vmax.f32 %v1127_v0, %v1152_v63  ;;  %v1268_v50 = vld [vmem:[%s10568_s3 + $0x108] sm:$0xff] }
 0x3b1   : > { %v1058_v9 = vadd.f32 %v6839_v4, %v1057_v40  ;;  %v1153_v40 = vmax.f32 %v1040_v52, 0.0  ;;  %v1258_v52 = vld [vmem:[%s10568_s3 + $0xb8] sm:$0xff] }
 0x3b2   : > { %v1206_v10 = vmax.f32 %v1131_v56, %v1156_v13  ;;  %v1205_v12 = vmax.f32 %v1130_v25, %v1155_v14  ;;  %v1177_v13 = vmax.f32 %v1077_v34, %v1102_v27  ;;  %v1315_v56 = vld [vmem:[%s10568_s3 + $0x280] sm:$0xff]  ;;  %v1253_v14 = vld [vmem:[%s10568_s3 + $0x90] sm:$0xff] }
 0x3b3   : > { %v1159_v33 = vmax.f32 %v1058_v9, 0.0  ;;  %v1204_v9 = vmax.f32 %v1129_v2, %v1154_v46  ;;  %v1321_v25 = vld [vmem:[%s10568_s3 + $0x2b0] sm:$0xff]  ;;  %v1259_v46 = vld [vmem:[%s10568_s3 + $0xc0] sm:$0xff] }
 0x3b4   : > { %v1231_v11 = vmax.f32 %v1181_v35, %v1206_v10  ;;  %v1230_v44 = vmax.f32 %v1180_v7, %v1205_v12  ;;  %v1227_v4 = vmax.f32 %v1177_v13, %v1202_v45  ;;  %v1323_v10 = vld [vmem:[%s10568_s3 + $0x2c0] sm:$0xff]  ;;  %v1265_v2 = vld [vmem:[%s10568_s3 + $0xf0] sm:$0xff]  ;;  %v1272_v12 = vld [vmem:[%s10568_s3 + $0x128] sm:$0xff] }
 0x3b5   : > { %v1209_v60 = vmax.f32 %v1134_v36, %v1159_v33  ;;  %v1203_v36 = vmax.f32 %v1128_v30, %v1153_v40  ;;  %v1151_v33 = vmax.f32 %v1034_v22, 0.0  ;;  %v1229_v48 = vmax.f32 %v1179_v17, %v1204_v9  ;;  %v1263_v35 = vld [vmem:[%s10568_s3 + $0xe0] sm:$0xff]  ;;  %v1329_v40 = vld [vmem:[%s10568_s3 + $0x2f0] sm:$0xff]  ;;  %v1274_v22 = vld [vmem:[%s10568_s3 + $0x138] sm:$0xff] }
 0x3b6   : > { %v1331_v7 = vld [vmem:[%s10568_s3 + $0x300] sm:$0xff]  ;;  %v1269_v9 = vld [vmem:[%s10568_s3 + $0x110] sm:$0xff] }
 0x3b7   : > { %v1234_v15 = vmax.f32 %v1184_v51, %v1209_v60  ;;  %v1178_v51 = vmax.f32 %v1078_v41, %v1103_v55  ;;  %v1076_v60 = vmax.f32 %v809_v54, 0.0  ;;  %v1267_v55 = vld [vmem:[%s10568_s3 + $0x100] sm:$0xff]  ;;  %v1646_v41 = vld [vmem:[%s10568_s3 + $0xcd8] sm:$0xff] }
 0x3b8   : > { %2392 = vmatmul.f32.gmra.mxu0 %v1245_v37  ;;  %2488 = vmatmul.f32.gmra.mxu1 %v1309_v1  ;;  %v1201_v37 = vmax.f32 %v1126_v42, %v1151_v33  ;;  %v1271_v27 = vld [vmem:[%s10568_s3 + $0x120] sm:$0xff]  ;;  %v1650_v54 = vld [vmem:[%s10568_s3 + $0xcf8] sm:$0xff] }
 0x3b9   : > { %3060 = vmatpush.msra.mxu0 %v1234_v15  ;;  %6223 = vmatpush.msra.mxu2 %v1234_v15  ;;  %v1228_v43 = vmax.f32 %v1178_v51, %v1203_v36  ;;  %v1176_v1 = vmax.f32 %v1076_v60, %v1101_v58  ;;  %v1273_v36 = vld [vmem:[%s10568_s3 + $0x130] sm:$0xff]  ;;  %v1275_v51 = vld [vmem:[%s10568_s3 + $0x140] sm:$0xff]  ;;  %v1652_v58 = vld [vmem:[%s10568_s3 + $0xd08] sm:$0xff] }
 0x3ba   : > { %6224 = vmatpush.msra.mxu3 %v1234_v15  ;;  %v1260_v15 = vld [vmem:[%s10568_s3 + $0xc8] sm:$0xff]  ;;  %v1339_v45 = vld [vmem:[%s10568_s3 + $0x340] sm:$0xff]  ;;  %v1341_v60 = vld [vmem:[%s10568_s3 + $0x350] sm:$0xff] }
 0x3bb   : > { %3061 = vmatpush.msra.mxu0 %v1233_v62  ;;  %6225 = vmatpush.msra.mxu2 %v1233_v62  ;;  %v1226_v47 = vmax.f32 %v1176_v1, %v1201_v37  ;;  %v1284_v37 = vld [vmem:[%s10568_s3 + $0x188] sm:$0xff] }
 0x3bc   : > { %6226 = vmatpush.msra.mxu3 %v1233_v62  ;;  %v1266_v62 = vld [vmem:[%s10568_s3 + $0xf8] sm:$0xff] }
 0x3bd   : > { %3062 = vmatpush.msra.mxu0 %v1232_v19  ;;  %6227 = vmatpush.msra.mxu2 %v1232_v19 }
 0x3be   : > { %6228 = vmatpush.msra.mxu3 %v1232_v19 }
 0x3bf   : > { %3063 = vmatpush.msra.mxu0 %v1231_v11  ;;  %6229 = vmatpush.msra.mxu2 %v1231_v11 }
 0x3c0   : > { %6230 = vmatpush.msra.mxu3 %v1231_v11  ;;  %2395 = vmatmul.f32.gmra.mxu0 %v1247_v29  ;;  %v1333_v11 = vld [vmem:[%s10568_s3 + $0x310] sm:$0xff]  ;;  %v1276_v29 = vld [vmem:[%s10568_s3 + $0x148] sm:$0xff] }
 0x3c1   : > { %2491 = vmatmul.f32.gmra.mxu1 %v1311_v3  ;;  %3064 = vmatpush.msra.mxu0 %v1230_v44  ;;  %v1648_v3 = vld [vmem:[%s10568_s3 + $0xce8] sm:$0xff] }
 0x3c2   : > { %6231 = vmatpush.msra.mxu2 %v1230_v44  ;;  %6232 = vmatpush.msra.mxu3 %v1230_v44  ;;  %v1337_v44 = vld [vmem:[%s10568_s3 + $0x330] sm:$0xff] }
 0x3c3   : > { %3065 = vmatpush.msra.mxu0 %v1229_v48 }
 0x3c4   : > { %6233 = vmatpush.msra.mxu2 %v1229_v48  ;;  %6234 = vmatpush.msra.mxu3 %v1229_v48  ;;  %v1282_v48 = vld [vmem:[%s10568_s3 + $0x178] sm:$0xff] }
 0x3c5   : > { %3066 = vmatpush.msra.mxu0 %v1228_v43 }
 0x3c6   : > { %6235 = vmatpush.msra.mxu2 %v1228_v43  ;;  %6236 = vmatpush.msra.mxu3 %v1228_v43  ;;  %v1277_v43 = vld [vmem:[%s10568_s3 + $0x150] sm:$0xff] }
 0x3c7   : > { %3067 = vmatpush.msra.mxu0 %v1227_v4 }
 0x3c8   : > { %6237 = vmatpush.msra.mxu2 %v1227_v4  ;;  %6238 = vmatpush.msra.mxu3 %v1227_v4  ;;  %v1654_v4 = vld [vmem:[%s10568_s3 + $0xd18] sm:$0xff] }
 0x3c9   : > { %2398 = vmatmul.f32.gmra.mxu0 %v1249_v32  ;;  %2494 = vmatmul.f32.gmra.mxu1 %v1313_v8  ;;  %v1279_v8 = vld [vmem:[%s10568_s3 + $0x160] sm:$0xff] }
 0x3ca   : > { %3068 = vmatpush.msra.mxu0 %v1226_v47  ;;  %6239 = vmatpush.msra.mxu2 %v1226_v47 }
 0x3cb   : > { %6240 = vmatpush.msra.mxu3 %v1226_v47  ;;  %5755 = vmatmul.msk.f32.vlgmr.msra.gmra.mxu2 %vm1685_vm2, %v1256_v16  ;;  %v1343_v47 = vld [vmem:[%s10568_s3 + $0x360] sm:$0xff]  ;;  %v1286_v16 = vld [vmem:[%s10568_s3 + $0x198] sm:$0xff] }
 0x3cc   : > { %5950 = vmatmul.msk.f32.vlgmr.msra.gmra.mxu3 %vm1685_vm2, %v1646_v41  ;;  %v1289_v41 = vld [vmem:[%s10568_s3 + $0x1b0] sm:$0xff] }
 0x3d1   : > { %2401 = vmatmul.f32.gmra.mxu0 %v1251_v61  ;;  %2497 = vmatmul.f32.gmra.mxu1 %v1315_v56  ;;  %v1656_v61 = vld [vmem:[%s10568_s3 + $0xd28] sm:$0xff] }
 0x3d3   : > { %5756 = vmatmul.msk.f32.gmra.mxu2 %vm1685_vm2, %v1258_v52 }
 0x3d4   : > { %5951 = vmatmul.msk.f32.gmra.mxu3 %vm1685_vm2, %v1648_v3  ;;  %v1666_v3 = vld [vmem:[%s10568_s3 + $0xd78] sm:$0xff] }
 0x3d9   : > { %2404 = vmatmul.f32.gmra.mxu0 %v1253_v14  ;;  %2500 = vmatmul.f32.gmra.mxu1 %v1317_v53  ;;  %v1281_v14 = vld [vmem:[%s10568_s3 + $0x170] sm:$0xff] }
 0x3da   : > { %v1345_v53 = vld [vmem:[%s10568_s3 + $0x370] sm:$0xff] }
 0x3db   : > { %5757 = vmatmul.msk.f32.gmra.mxu2 %vm1685_vm2, %v1260_v15  ;;  %v1288_v15 = vld [vmem:[%s10568_s3 + $0x1a8] sm:$0xff] }
 0x3dc   : > { %5952 = vmatmul.msk.f32.gmra.mxu3 %vm1685_vm2, %v1650_v54  ;;  %v1355_v54 = vld [vmem:[%s10568_s3 + $0x3c0] sm:$0xff] }
 0x3e1   : > { %2407 = vmatmul.f32.gmra.mxu0 %v1255_v21  ;;  %2503 = vmatmul.f32.gmra.mxu1 %v1319_v49  ;;  %v1658_v21 = vld [vmem:[%s10568_s3 + $0xd38] sm:$0xff] }
 0x3e3   : > { %5758 = vmatmul.msk.f32.gmra.mxu2 %vm1685_vm2, %v1262_v28 }
 0x3e4   : > { %5953 = vmatmul.msk.f32.gmra.mxu3 %vm1685_vm2, %v1652_v58 }
 0x3e9   : > { %2410 = vmatmul.f32.gmra.mxu0 %v1257_v57  ;;  %2506 = vmatmul.f32.gmra.mxu1 %v1321_v25  ;;  %v1283_v57 = vld [vmem:[%s10568_s3 + $0x180] sm:$0xff] }
 0x3ea   : > { %v1347_v25 = vld [vmem:[%s10568_s3 + $0x380] sm:$0xff] }
 0x3eb   : > { %5759 = vmatmul.msk.f32.gmra.mxu2 %vm1685_vm2, %v1264_v18 }
 0x3ec   : > { %5954 = vmatmul.msk.f32.gmra.mxu3 %vm1685_vm2, %v1654_v4 }
 0x3f1   : > { %2413 = vmatmul.f32.gmra.mxu0 %v1259_v46  ;;  %2509 = vmatmul.f32.gmra.mxu1 %v1323_v10  ;;  %v1290_v46 = vld [vmem:[%s10568_s3 + $0x1b8] sm:$0xff]  ;;  %v1660_v10 = vld [vmem:[%s10568_s3 + $0xd48] sm:$0xff] }
 0x3f3   : > { %5760 = vmatmul.msk.f32.gmra.mxu2 %vm1685_vm2, %v1266_v62 }
 0x3f4   : > { %5955 = vmatmul.msk.f32.gmra.mxu3 %vm1685_vm2, %v1656_v61 }
 0x3f9   : > { %2416 = vmatmul.f32.gmra.mxu0 %v1261_v20  ;;  %2512 = vmatmul.f32.gmra.mxu1 %v1325_v39  ;;  %v1285_v39 = vld [vmem:[%s10568_s3 + $0x190] sm:$0xff] }
 0x3fb   : > { %5761 = vmatmul.msk.f32.gmra.mxu2 %vm1685_vm2, %v1268_v50  ;;  %v1349_v50 = vld [vmem:[%s10568_s3 + $0x390] sm:$0xff] }
 0x3fc   : > { %5956 = vmatmul.msk.f32.gmra.mxu3 %vm1685_vm2, %v1658_v21  ;;  %v1302_v21 = vld [vmem:[%s10568_s3 + $0x218] sm:$0xff] }
 0x401   : > { %2419 = vmatmul.f32.gmra.mxu0 %v1263_v35  ;;  %2515 = vmatmul.f32.gmra.mxu1 %v1327_v26  ;;  %v1292_v26 = vld [vmem:[%s10568_s3 + $0x1c8] sm:$0xff] }
 0x403   : > { %5762 = vmatmul.msk.f32.gmra.mxu2 %vm1685_vm2, %v1270_v5  ;;  %v1662_v5 = vld [vmem:[%s10568_s3 + $0xd58] sm:$0xff] }
 0x404   : > { %5957 = vmatmul.msk.f32.gmra.mxu3 %vm1685_vm2, %v1660_v10  ;;  %v1297_v10 = vld [vmem:[%s10568_s3 + $0x1f0] sm:$0xff] }
 0x409   : > { %2422 = vmatmul.f32.gmra.mxu0 %v1265_v2  ;;  %2518 = vmatmul.f32.gmra.mxu1 %v1329_v40 }
 0x40b   : > { %5763 = vmatmul.msk.f32.gmra.mxu2 %vm1685_vm2, %v1272_v12  ;;  %v1287_v12 = vld [vmem:[%s10568_s3 + $0x1a0] sm:$0xff] }
 0x40c   : > { %5958 = vmatmul.msk.f32.gmra.mxu3 %vm1685_vm2, %v1662_v5  ;;  %v1674_v5 = vld [vmem:[%s10568_s3 + $0xdb8] sm:$0xff] }
 0x40d   : > { %v7285_v19 = vpop.f32.mrf.mxu0  ;;  %v7287_v38 = vpop.f32.mrf.mxu1 }
 0x411   : > { %2425 = vmatmul.f32.gmra.mxu0 %v1267_v55  ;;  %2521 = vmatmul.f32.gmra.mxu1 %v1331_v7  ;;  %v1351_v55 = vld [vmem:[%s10568_s3 + $0x3a0] sm:$0xff] }
 0x413   : > { %5764 = vmatmul.msk.f32.gmra.mxu2 %vm1685_vm2, %v1274_v22  ;;  %v1294_v22 = vld [vmem:[%s10568_s3 + $0x1d8] sm:$0xff] }
 0x415   : > { %v7299_v30 = vpop.f32.mrf.mxu0  ;;  %v7301_v63 = vpop.f32.mrf.mxu1 }
 0x419   : > { %2428 = vmatmul.f32.gmra.mxu0 %v1269_v9  ;;  %2524 = vmatmul.f32.gmra.mxu1 %v1333_v11  ;;  %v1664_v9 = vld [vmem:[%s10568_s3 + $0xd68] sm:$0xff] }
 0x41a   : > { %5959 = vmatmul.msk.f32.gmra.mxu3 %vm1685_vm2, %v1664_v9  ;;  %v1236_v9 = vld [vmem:[%s10568_s3 + $0x8] sm:$0xff] }
 0x41b   : > { %5765 = vmatmul.msk.f32.gmra.mxu2 %vm1685_vm2, %v1276_v29 }
 0x41d   : > { %v7317_v31 = vpop.f32.mrf.mxu0  ;;  %v7319_v6 = vpop.f32.mrf.mxu1 }
 0x421   : > { %2431 = vmatmul.f32.gmra.mxu0 %v1271_v27  ;;  %2527 = vmatmul.f32.gmra.mxu1 %v1335_v23  ;;  %v1353_v27 = vld [vmem:[%s10568_s3 + $0x3b0] sm:$0xff] }
 0x422   : > { %5960 = vmatmul.msk.f32.gmra.mxu3 %vm1685_vm2, %v1666_v3 }
 0x423   : > { %5766 = vmatmul.msk.f32.gmra.mxu2 %vm1685_vm2, %v1278_v24  ;;  %v1296_v24 = vld [vmem:[%s10568_s3 + $0x1e8] sm:$0xff] }
 0x425   : > { %v7335_v17 = vpop.f32.mrf.mxu0  ;;  %v7337_v0 = vpop.f32.mrf.mxu1 }
 0x429   : > { %2434 = vmatmul.f32.gmra.mxu0 %v1273_v36  ;;  %2530 = vmatmul.f32.gmra.mxu1 %v1337_v44 }
 0x42b   : > { %5767 = vmatmul.msk.f32.gmra.mxu2 %vm1685_vm2, %v1280_v59  ;;  %v1291_v59 = vld [vmem:[%s10568_s3 + $0x1c0] sm:$0xff] }
 0x42d   : > { %v7353_v33 = vpop.f32.mrf.mxu0  ;;  %v7355_v34 = vpop.f32.mrf.mxu1 }
 0x431   : > { %2437 = vmatmul.f32.gmra.mxu0 %v1275_v51  ;;  %2533 = vmatmul.f32.gmra.mxu1 %v1339_v45  ;;  %v1298_v45 = vld [vmem:[%s10568_s3 + $0x1f8] sm:$0xff] }
 0x433   : > { %5768 = vmatmul.msk.f32.gmra.mxu2 %vm1685_vm2, %v1282_v48  ;;  %v1668_v48 = vld [vmem:[%s10568_s3 + $0xd88] sm:$0xff] }
 0x434   : > { %5961 = vmatmul.msk.f32.gmra.mxu3 %vm1685_vm2, %v1668_v48 }
 0x435   : > { %v7371_v42 = vpop.f32.mrf.mxu0  ;;  %v7373_v13 = vpop.f32.mrf.mxu1 }
 0x439   : > { %2440 = vmatmul.f32.gmra.mxu0 %v1277_v43  ;;  %2536 = vmatmul.f32.gmra.mxu1 %v1341_v60  ;;  %v1293_v60 = vld [vmem:[%s10568_s3 + $0x1d0] sm:$0xff] }
 0x43b   : > { %5769 = vmatmul.msk.f32.gmra.mxu2 %vm1685_vm2, %v1284_v37  ;;  %v1357_v37 = vld [vmem:[%s10568_s3 + $0x3d0] sm:$0xff] }
 0x43d   : > { %v7389_v1 = vpop.f32.mrf.mxu0 }
 0x43e   : > { %v7391_v32 = vpop.f32.mrf.mxu1 }
 0x441   : > { %2443 = vmatmul.f32.gmra.mxu0 %v1279_v8  ;;  %2539 = vmatmul.f32.gmra.mxu1 %v1343_v47  ;;  %v1300_v8 = vld [vmem:[%s10568_s3 + $0x208] sm:$0xff]  ;;  %v1670_v47 = vld [vmem:[%s10568_s3 + $0xd98] sm:$0xff] }
 0x442   : > { %5962 = vmatmul.msk.f32.gmra.mxu3 %vm1685_vm2, %v1670_v47 }
 0x443   : > { %5770 = vmatmul.msk.f32.gmra.mxu2 %vm1685_vm2, %v1286_v16 }
 0x446   : > { %v7407_v56 = vpop.f32.mrf.mxu0  ;;  %v7409_v52 = vpop.f32.mrf.mxu1 }
 0x449   : > { %2446 = vmatmul.f32.gmra.mxu0 %v1281_v14  ;;  %2542 = vmatmul.f32.gmra.mxu1 %v1345_v53  ;;  %v1295_v14 = vld [vmem:[%s10568_s3 + $0x1e0] sm:$0xff] }
 0x44a   : > { %v1359_v53 = vld [vmem:[%s10568_s3 + $0x3e0] sm:$0xff] }
 0x44b   : > { %5771 = vmatmul.msk.f32.gmra.mxu2 %vm1685_vm2, %v1288_v15 }
 0x44e   : > { %v7425_v49 = vpop.f32.mrf.mxu0  ;;  %v7427_v28 = vpop.f32.mrf.mxu1 }
 0x44f   : > { %v7435_v18 = vpop.f32.mrf.mxu2 }
 0x451   : > { %2449 = vmatmul.f32.gmra.mxu0 %v1283_v57  ;;  %2545 = vmatmul.f32.gmra.mxu1 %v1347_v25  ;;  %v1672_v57 = vld [vmem:[%s10568_s3 + $0xda8] sm:$0xff] }
 0x452   : > { %5963 = vmatmul.msk.f32.gmra.mxu3 %vm1685_vm2, %v1672_v57 }
 0x453   : > { %5772 = vmatmul.msk.f32.gmra.mxu2 %vm1685_vm2, %v1290_v46 }
 0x456   : > { %v7445_v62 = vpop.f32.mrf.mxu0  ;;  %v7447_v20 = vpop.f32.mrf.mxu1 }
 0x457   : > { %v7455_v35 = vpop.f32.mrf.mxu2 }
 0x459   : > { %2452 = vmatmul.f32.gmra.mxu0 %v1285_v39  ;;  %2548 = vmatmul.f32.gmra.mxu1 %v1349_v50  ;;  %v1361_v39 = vld [vmem:[%s10568_s3 + $0x3f0] sm:$0xff] }
 0x45a   : > { %5964 = vmatmul.msk.f32.gmra.mxu3 %vm1685_vm2, %v1674_v5 }
 0x45b   : > { %5773 = vmatmul.msk.f32.gmra.mxu2 %vm1685_vm2, %v1292_v26  ;;  %v1304_v26 = vld [vmem:[%s10568_s3 + $0x228] sm:$0xff] }
 0x45e   : > { %v7465_v2 = vpop.f32.mrf.mxu0  ;;  %v7467_v40 = vpop.f32.mrf.mxu1 }
 0x45f   : > { %v7475_v7 = vpop.f32.mrf.mxu2 }
 0x461   : > { %2455 = vmatmul.f32.gmra.mxu0 %v1287_v12  ;;  %2551 = vmatmul.f32.gmra.mxu1 %v1351_v55 }
 0x463   : > { %5774 = vmatmul.msk.f32.gmra.mxu2 %vm1685_vm2, %v1294_v22  ;;  %v1363_v22 = vld [vmem:[%s10568_s3 + $0x400] sm:$0xff] }
 0x466   : > { %v7485_v11 = vpop.f32.mrf.mxu0  ;;  %v7487_v29 = vpop.f32.mrf.mxu1 }
 0x467   : > { %v7495_v23 = vpop.f32.mrf.mxu2 }
 0x469   : > { %2458 = vmatmul.f32.gmra.mxu0 %v1289_v41  ;;  %2554 = vmatmul.f32.gmra.mxu1 %v1353_v27  ;;  %v1306_v27 = vld [vmem:[%s10568_s3 + $0x238] sm:$0xff] }
 0x46b   : > { %5775 = vmatmul.msk.f32.gmra.mxu2 %vm1685_vm2, %v1296_v24  ;;  %v1676_v24 = vld [vmem:[%s10568_s3 + $0xdc8] sm:$0xff] }
 0x46c   : > { %5965 = vmatmul.msk.f32.gmra.mxu3 %vm1685_vm2, %v1676_v24 }
 0x46e   : > { %v7505_v36 = vpop.f32.mrf.mxu0  ;;  %v7507_v44 = vpop.f32.mrf.mxu1 }
 0x46f   : > { %v7515_v51 = vpop.f32.mrf.mxu2 }
 0x471   : > { %2461 = vmatmul.f32.gmra.mxu0 %v1291_v59  ;;  %2557 = vmatmul.f32.gmra.mxu1 %v1355_v54  ;;  %v1365_v54 = vld [vmem:[%s10568_s3 + $0x410] sm:$0xff] }
 0x473   : > { %5776 = vmatmul.msk.f32.gmra.mxu2 %vm1685_vm2, %v1298_v45  ;;  %v1238_v45 = vld [vmem:[%s10568_s3 + $0x18] sm:$0xff] }
 0x476   : > { %v7525_v58 = vpop.f32.mrf.mxu0  ;;  %v7527_v43 = vpop.f32.mrf.mxu1 }
 0x477   : > { %v7535_v4 = vpop.f32.mrf.mxu2 }
 0x479   : > { %2464 = vmatmul.f32.gmra.mxu0 %v1293_v60  ;;  %2560 = vmatmul.f32.gmra.mxu1 %v1357_v37  ;;  %v1308_v60 = vld [vmem:[%s10568_s3 + $0x248] sm:$0xff]  ;;  %v1678_v37 = vld [vmem:[%s10568_s3 + $0xdd8] sm:$0xff] }
 0x47a   : > { %5966 = vmatmul.msk.f32.gmra.mxu3 %vm1685_vm2, %v1678_v37 }
 0x47b   : > { %5777 = vmatmul.msk.f32.gmra.mxu2 %vm1685_vm2, %v1300_v8  ;;  %v7627_v8 = vpop.f32.mrf.mxu3 }
 0x47c   : > { %10676 = vst [vmem:[#allocation39_spill] sm:$0xff] %v7627_v8 }
 0x47e   : > { %v7545_v16 = vpop.f32.mrf.mxu0  ;;  %v7547_v61 = vpop.f32.mrf.mxu1 }
 0x47f   : > { %v7555_v15 = vpop.f32.mrf.mxu2 }
 0x481   : > { %2467 = vmatmul.f32.gmra.mxu0 %v1295_v14  ;;  %2563 = vmatmul.f32.gmra.mxu1 %v1359_v53  ;;  %v1367_v53 = vld [vmem:[%s10568_s3 + $0x420] sm:$0xff] }
 0x483   : > { %5778 = vmatmul.msk.f32.gmra.mxu2 %vm1685_vm2, %v1302_v21  ;;  %v1240_v21 = vld [vmem:[%s10568_s3 + $0x28] sm:$0xff] }
 0x486   : > { %v7565_v25 = vpop.f32.mrf.mxu0  ;;  %v7567_v46 = vpop.f32.mrf.mxu1 }
 0x487   : > { %v7575_v50 = vpop.f32.mrf.mxu2 }
 0x489   : > { %2470 = vmatmul.f32.gmra.mxu0 %v1297_v10  ;;  %2566 = vmatmul.f32.gmra.mxu1 %v1361_v39  ;;  %v1310_v10 = vld [vmem:[%s10568_s3 + $0x258] sm:$0xff]  ;;  %v1680_v39 = vld [vmem:[%s10568_s3 + $0xde8] sm:$0xff] }
 0x48a   : > { %5967 = vmatmul.msk.f32.gmra.mxu3 %vm1685_vm2, %v1680_v39 }
 0x48b   : > { %5779 = vmatmul.msk.f32.gmra.mxu2 %vm1685_vm2, %v1304_v26  ;;  %v7650_v26 = vpop.f32.mrf.mxu3 }
 0x48c   : > { %10678 = vst [vmem:[#allocation38_spill] sm:$0xff] %v7650_v26  ;;  %v1246_v26 = vld [vmem:[%s10568_s3 + $0x58] sm:$0xff] }
 0x48e   : > { %v7585_v12 = vpop.f32.mrf.mxu0  ;;  %v7587_v55 = vpop.f32.mrf.mxu1 }
 0x48f   : > { %v7595_v41 = vpop.f32.mrf.mxu2 }
 0x491   : > { %2569 = vmatmul.f32.gmra.mxu1 %v1363_v22  ;;  %5745 = vmatmul.msk.f32.vlgmr.msra.gmra.mxu0 %vm1685_vm2, %v1236_v9  ;;  %v1369_v9 = vld [vmem:[%s10568_s3 + $0x430] sm:$0xff] }
 0x493   : > { %5780 = vmatmul.msk.f32.gmra.mxu2 %vm1685_vm2, %v1306_v27  ;;  %v1242_v27 = vld [vmem:[%s10568_s3 + $0x38] sm:$0xff] }
 0x496   : > { %v7606_v3 = vpop.f32.mrf.mxu0  ;;  %v7608_v59 = vpop.f32.mrf.mxu1 }
 0x497   : > { %v7616_v48 = vpop.f32.mrf.mxu2 }
 0x499   : > { %2572 = vmatmul.f32.gmra.mxu1 %v1365_v54  ;;  %5746 = vmatmul.msk.f32.gmra.mxu0 %vm1685_vm2, %v1238_v45  ;;  %v1312_v54 = vld [vmem:[%s10568_s3 + $0x268] sm:$0xff]  ;;  %v1682_v45 = vld [vmem:[%s10568_s3 + $0xdf8] sm:$0xff] }
 0x49a   : > { %5968 = vmatmul.msk.f32.gmra.mxu3 %vm1685_vm2, %v1682_v45 }
 0x49b   : > { %5781 = vmatmul.msk.f32.gmra.mxu2 %vm1685_vm2, %v1308_v60  ;;  %v7673_v60 = vpop.f32.mrf.mxu3 }
 0x49c   : > { %10680 = vst [vmem:[#allocation26_spill] sm:$0xff] %v7673_v60 }
 0x49e   : > { %v7629_v47 = vpop.f32.mrf.mxu0  ;;  %v7631_v14 = vpop.f32.mrf.mxu1 }
 0x49f   : > { %10677 = vst [vmem:[#allocation27_spill] sm:$0xff] %v7631_v14  ;;  %v7639_v57 = vpop.f32.mrf.mxu2  ;;  %v1250_v14 = vld [vmem:[%s10568_s3 + $0x78] sm:$0xff] }
 0x4a1   : > { %2575 = vmatmul.f32.gmra.mxu1 %v1367_v53  ;;  %5747 = vmatmul.msk.f32.gmra.mxu0 %vm1685_vm2, %v1240_v21  ;;  %v1371_v21 = vld [vmem:[%s10568_s3 + $0x440] sm:$0xff] }
 0x4a3   : > { %5782 = vmatmul.msk.f32.gmra.mxu2 %vm1685_vm2, %v1310_v10  ;;  %v1244_v10 = vld [vmem:[%s10568_s3 + $0x48] sm:$0xff] }
 0x4a6   : > { %v7652_v5 = vpop.f32.mrf.mxu0  ;;  %v7654_v22 = vpop.f32.mrf.mxu1 }
 0x4a7   : > { %10679 = vst [vmem:[#allocation47_spill] sm:$0xff] %v7654_v22  ;;  %v7662_v24 = vpop.f32.mrf.mxu2  ;;  %v1248_v22 = vld [vmem:[%s10568_s3 + $0x68] sm:$0xff] }
 0x4a9   : > { %2578 = vmatmul.f32.gmra.mxu1 %v1369_v9  ;;  %5748 = vmatmul.msk.f32.gmra.mxu0 %vm1685_vm2, %v1242_v27  ;;  %v1314_v9 = vld [vmem:[%s10568_s3 + $0x278] sm:$0xff]  ;;  %v1684_v27 = vld [vmem:[%s10568_s3 + $0xe08] sm:$0xff] }
 0x4aa   : > { %5969 = vmatmul.msk.f32.gmra.mxu3 %vm1685_vm2, %v1684_v27 }
 0x4ab   : > { %5783 = vmatmul.msk.f32.gmra.mxu2 %vm1685_vm2, %v1312_v54  ;;  %v7696_v54 = vpop.f32.mrf.mxu3 }
 0x4ac   : > { %10683 = vst [vmem:[#allocation15_spill] sm:$0xff] %v7696_v54 }
 0x4ae   : > { %v7675_v37 = vpop.f32.mrf.mxu0  ;;  %v7677_v53 = vpop.f32.mrf.mxu1 }
 0x4af   : > { %10681 = vst [vmem:[#allocation42_spill] sm:$0xff] %v7677_v53  ;;  %v7685_v39 = vpop.f32.mrf.mxu2  ;;  %v1375_v53 = vld [vmem:[%s10568_s3 + $0x460] sm:$0xff] }
 0x4b0   : > { %10682 = vst [vmem:[#allocation37_spill] sm:$0xff] %v7685_v39 }
 0x4b1   : > { %2581 = vmatmul.f32.gmra.mxu1 %v1371_v21  ;;  %5749 = vmatmul.msk.f32.gmra.mxu0 %vm1685_vm2, %v1244_v10  ;;  %v1373_v21 = vld [vmem:[%s10568_s3 + $0x450] sm:$0xff]  ;;  %v5970_v10 = vld [vmem:[%s10569_s4 + $0x8] sm:$0xff] }
 0x4b2   : > { %3839 = vmatpush.msrb.mxu3 %v5970_v10 }
 0x4b3   : > { %5784 = vmatmul.msk.f32.gmra.mxu2 %vm1685_vm2, %v1314_v9  ;;  %v1316_v9 = vld [vmem:[%s10568_s3 + $0x288] sm:$0xff]  ;;  %v7718_v27 = vpop.f32.mrf.mxu3 }
 0x4b4   : > { %10686 = vst [vmem:[#allocation41_spill] sm:$0xff] %v7718_v27 }
 0x4b6   : > { %v7698_v45 = vpop.f32.mrf.mxu0  ;;  %v7700_v60 = vpop.f32.mrf.mxu1 }
 0x4b7   : > { %10684 = vst [vmem:[#allocation46_spill] sm:$0xff] %v7700_v60  ;;  %v7708_v8 = vpop.f32.mrf.mxu2 }
 0x4b8   : > { %10685 = vst [vmem:[#allocation25_spill] sm:$0xff] %v7708_v8 }
 0x4b9   : > { %2584 = vmatmul.f32.gmra.mxu1 %v1373_v21  ;;  %5750 = vmatmul.msk.f32.gmra.mxu0 %vm1685_vm2, %v1246_v26  ;;  %v1318_v26 = vld [vmem:[%s10568_s3 + $0x298] sm:$0xff] }
 0x4bb   : > { %5785 = vmatmul.msk.f32.gmra.mxu2 %vm1685_vm2, %v1316_v9  ;;  %v7737_v21 = vpop.f32.mrf.mxu3 }
 0x4bc   : > { %10690 = vst [vmem:[#allocation40_spill] sm:$0xff] %v7737_v21  ;;  %v1379_v21 = vld [vmem:[%s10568_s3 + $0x480] sm:$0xff] }
 0x4be   : > { %v7720_v54 = vpop.f32.mrf.mxu0  ;;  %v7722_v60 = vpop.f32.mrf.mxu1 }
 0x4bf   : > { %10687 = vst [vmem:[#allocation5_spill] sm:$0xff] %v7720_v54  ;;  %v7730_v10 = vpop.f32.mrf.mxu2 }
 0x4c0   : > { %10688 = vst [vmem:[#allocation44_spill] sm:$0xff] %v7722_v60  ;;  %v1377_v60 = vld [vmem:[%s10568_s3 + $0x470] sm:$0xff] }
 0x4c1   : > { %10689 = vst [vmem:[#allocation45_spill] sm:$0xff] %v7730_v10  ;;  %2587 = vmatmul.f32.gmra.mxu1 %v1375_v53  ;;  %5751 = vmatmul.msk.f32.gmra.mxu0 %vm1685_vm2, %v1248_v22  ;;  %v1320_v22 = vld [vmem:[%s10568_s3 + $0x2a8] sm:$0xff] }
 0x4c3   : > { %5786 = vmatmul.msk.f32.gmra.mxu2 %vm1685_vm2, %v1318_v26 }
 0x4c6   : > { %v7739_v9 = vpop.f32.mrf.mxu0  ;;  %v7741_v27 = vpop.f32.mrf.mxu1 }
 0x4c7   : > { %10691 = vst [vmem:[#allocation43_spill] sm:$0xff] %v7739_v9  ;;  %v3145_v10 = vpop.f32.mrf.mxu2  ;;  %v7764_v9 = vpop.f32.mrf.mxu3 }
 0x4c8   : > { %10692 = vst [vmem:[#allocation10_spill] sm:$0xff] %v7741_v27  ;;  %v1252_v27 = vld [vmem:[%s10568_s3 + $0x88] sm:$0xff] }
 0x4c9   : > { %2590 = vmatmul.f32.gmra.mxu1 %v1377_v60  ;;  %5752 = vmatmul.msk.f32.gmra.mxu0 %vm1685_vm2, %v1250_v14  ;;  %10695 = vst [vmem:[#allocation13_spill] sm:$0xff] %v7764_v9  ;;  %v1322_v14 = vld [vmem:[%s10568_s3 + $0x2b8] sm:$0xff] }
 0x4ca   : > { %v1254_v9 = vld [vmem:[%s10568_s3 + $0x98] sm:$0xff] }
 0x4cb   : > { %5787 = vmatmul.msk.f32.gmra.mxu2 %vm1685_vm2, %v1320_v22 }
 0x4ce   : > { %v7754_v53 = vpop.f32.mrf.mxu0  ;;  %v7756_v26 = vpop.f32.mrf.mxu1 }
 0x4cf   : > { %10693 = vst [vmem:[#allocation11_spill] sm:$0xff] %v7754_v53  ;;  %v3148_v8 = vpop.f32.mrf.mxu2 }
 0x4d0   : > { %10694 = vst [vmem:[#allocation12_spill] sm:$0xff] %v7756_v26  ;;  %v1381_v26 = vld [vmem:[%s10568_s3 + $0x490] sm:$0xff] }
 0x4d1   : > { %2593 = vmatmul.f32.gmra.mxu1 %v1379_v21  ;;  %5753 = vmatmul.msk.f32.gmra.mxu0 %vm1685_vm2, %v1252_v27  ;;  %v1324_v27 = vld [vmem:[%s10568_s3 + $0x2c8] sm:$0xff]  ;;  %v7783_v21 = vpop.f32.mrf.mxu3 }
 0x4d2   : > { %10697 = vst [vmem:[#allocation7_spill] sm:$0xff] %v7783_v21  ;;  %v1385_v21 = vld [vmem:[%s10568_s3 + $0x4b0] sm:$0xff] }
 0x4d3   : > { %5788 = vmatmul.msk.f32.gmra.mxu2 %vm1685_vm2, %v1322_v14 }
 0x4d6   : > { %v2453_v60 = vpop.f32.mrf.mxu0  ;;  %v7771_v22 = vpop.f32.mrf.mxu1 }
 0x4d7   : > { %10696 = vst [vmem:[#allocation14_spill] sm:$0xff] %v7771_v22  ;;  %v3146_v53 = vadd.f32 %v3145_v10, %v2453_v60  ;;  %v3151_v39 = vpop.f32.mrf.mxu2  ;;  %v1383_v60 = vld [vmem:[%s10568_s3 + $0x4a0] sm:$0xff] }
 0x4d9   : > { %2596 = vmatmul.f32.gmra.mxu1 %v1381_v26  ;;  %5971 = vmatmul.msk.f32.vlgmr.msrb.gmra.mxu3 %vm3748_vm3, %v3146_v53  ;;  %v1326_v26 = vld [vmem:[%s10568_s3 + $0x2d8] sm:$0xff] }
 0x4da   : > { %5754 = vmatmul.msk.f32.gmra.mxu0 %vm1685_vm2, %v1254_v9  ;;  %v7797_v9 = vpop.f32.mrf.mxu3 }
 0x4db   : > { %5789 = vmatmul.msk.f32.gmra.mxu2 %vm1685_vm2, %v1324_v27  ;;  %10699 = vst [vmem:[#allocation24_spill] sm:$0xff] %v7797_v9  ;;  %v1387_v9 = vld [vmem:[%s10568_s3 + $0x4c0] sm:$0xff] }
 0x4de   : > { %v2456_v14 = vpop.f32.mrf.mxu0  ;;  %v7787_v10 = vpop.f32.mrf.mxu1 }
 0x4df   : > { %10698 = vst [vmem:[#allocation8_spill] sm:$0xff] %v7787_v10  ;;  %v3149_v22 = vadd.f32 %v3148_v8, %v2456_v14  ;;  %v3154_v54 = vpop.f32.mrf.mxu2  ;;  %v1328_v10 = vld [vmem:[%s10568_s3 + $0x2e8] sm:$0xff] }
 0x4e1   : > { %2599 = vmatmul.f32.gmra.mxu1 %v1383_v60  ;;  %5972 = vmatmul.msk.f32.gmra.mxu3 %vm3748_vm3, %v3149_v22 }
 0x4e2   : > { %v7809_v22 = vpop.f32.mrf.mxu3 }
 0x4e3   : > { %5790 = vmatmul.msk.f32.gmra.mxu2 %vm1685_vm2, %v1326_v26  ;;  %10701 = vst [vmem:[#allocation23_spill] sm:$0xff] %v7809_v22 }
 0x4e6   : > { %v2459_v53 = vpop.f32.mrf.mxu0  ;;  %v7799_v27 = vpop.f32.mrf.mxu1 }
 0x4e7   : > { %10700 = vst [vmem:[#allocation9_spill] sm:$0xff] %v7799_v27  ;;  %v3152_v8 = vadd.f32 %v3151_v39, %v2459_v53  ;;  %v3157_v14 = vpop.f32.mrf.mxu2  ;;  %v1330_v27 = vld [vmem:[%s10568_s3 + $0x2f8] sm:$0xff] }
 0x4e9   : > { %2602 = vmatmul.f32.gmra.mxu1 %v1385_v21  ;;  %5973 = vmatmul.msk.f32.gmra.mxu3 %vm3748_vm3, %v3152_v8  ;;  %v1389_v8 = vld [vmem:[%s10568_s3 + $0x4d0] sm:$0xff] }
 0x4eb   : > { %5791 = vmatmul.msk.f32.gmra.mxu2 %vm1685_vm2, %v1328_v10 }
 0x4ee   : > { %v2462_v60 = vpop.f32.mrf.mxu0  ;;  %v7811_v26 = vpop.f32.mrf.mxu1 }
 0x4ef   : > { %10702 = vst [vmem:[#allocation35_spill] sm:$0xff] %v7811_v26  ;;  %v3155_v39 = vadd.f32 %v3154_v54, %v2462_v60  ;;  %v3160_v53 = vpop.f32.mrf.mxu2  ;;  %v1332_v54 = vld [vmem:[%s10568_s3 + $0x308] sm:$0xff]  ;;  %v7829_v60 = vpop.f32.mrf.mxu3 }
 0x4f0   : > { %10704 = vst [vmem:[#allocation36_spill] sm:$0xff] %v7829_v60  ;;  %v1393_v60 = vld [vmem:[%s10568_s3 + $0x4f0] sm:$0xff] }
 0x4f1   : > { %2605 = vmatmul.f32.gmra.mxu1 %v1387_v9  ;;  %5974 = vmatmul.msk.f32.gmra.mxu3 %vm3748_vm3, %v3155_v39  ;;  %v1391_v39 = vld [vmem:[%s10568_s3 + $0x4e0] sm:$0xff] }
 0x4f3   : > { %5792 = vmatmul.msk.f32.gmra.mxu2 %vm1685_vm2, %v1330_v27 }
 0x4f6   : > { %v2465_v21 = vpop.f32.mrf.mxu0  ;;  %v7821_v10 = vpop.f32.mrf.mxu1 }
 0x4f7   : > { %10703 = vst [vmem:[#allocation18_spill] sm:$0xff] %v7821_v10  ;;  %v3158_v22 = vadd.f32 %v3157_v14, %v2465_v21  ;;  %v3163_v26 = vpop.f32.mrf.mxu2  ;;  %v1334_v10 = vld [vmem:[%s10568_s3 + $0x318] sm:$0xff] }
 0x4f9   : > { %2608 = vmatmul.f32.gmra.mxu1 %v1389_v8  ;;  %5975 = vmatmul.msk.f32.gmra.mxu3 %vm3748_vm3, %v3158_v22  ;;  %v7842_v8 = vpop.f32.mrf.mxu3 }
 0x4fa   : > { %10706 = vst [vmem:[#allocation22_spill] sm:$0xff] %v7842_v8  ;;  %v1338_v8 = vld [vmem:[%s10568_s3 + $0x338] sm:$0xff] }
 0x4fb   : > { %5793 = vmatmul.msk.f32.gmra.mxu2 %vm1685_vm2, %v1332_v54 }
 0x4fe   : > { %v2468_v9 = vpop.f32.mrf.mxu0  ;;  %v7833_v27 = vpop.f32.mrf.mxu1 }
 0x4ff   : > { %10705 = vst [vmem:[#allocation19_spill] sm:$0xff] %v7833_v27  ;;  %v3161_v14 = vadd.f32 %v3160_v53, %v2468_v9  ;;  %v3166_v21 = vpop.f32.mrf.mxu2  ;;  %v1336_v27 = vld [vmem:[%s10568_s3 + $0x328] sm:$0xff] }
 0x501   : > { %2611 = vmatmul.f32.gmra.mxu1 %v1391_v39  ;;  %5976 = vmatmul.msk.f32.gmra.mxu3 %vm3748_vm3, %v3161_v14  ;;  %v7855_v39 = vpop.f32.mrf.mxu3  ;;  %v1395_v14 = vld [vmem:[%s10568_s3 + $0x500] sm:$0xff] }
 0x502   : > { %10707 = vst [vmem:[#allocation34_spill] sm:$0xff] %v7855_v39  ;;  %v1340_v39 = vld [vmem:[%s10568_s3 + $0x348] sm:$0xff] }
 0x503   : > { %5794 = vmatmul.msk.f32.gmra.mxu2 %vm1685_vm2, %v1334_v10 }
 0x506   : > { %v2471_v22 = vpop.f32.mrf.mxu0  ;;  %v7845_v54 = vpop.f32.mrf.mxu1 }
 0x507   : > { %v3164_v53 = vadd.f32 %v3163_v26, %v2471_v22  ;;  %v3169_v9 = vpop.f32.mrf.mxu2  ;;  %v3167_v26 = vadd.f32 %v3166_v21, %v7287_v38 }
 0x508   : > { %v3170_v38 = vadd.f32 %v3169_v9, %v7301_v63  ;;  %v1342_v63 = vld [vmem:[%s10568_s3 + $0x358] sm:$0xff] }
 0x509   : > { %2614 = vmatmul.f32.gmra.mxu1 %v1393_v60  ;;  %5977 = vmatmul.msk.f32.gmra.mxu3 %vm3748_vm3, %v3164_v53  ;;  %v7873_v53 = vpop.f32.mrf.mxu3 }
 0x50a   : > { %10708 = vst [vmem:[#allocation20_spill] sm:$0xff] %v7873_v53 }
 0x50b   : > { %5795 = vmatmul.msk.f32.gmra.mxu2 %vm1685_vm2, %v1336_v27  ;;  %v1397_v27 = vld [vmem:[%s10568_s3 + $0x510] sm:$0xff] }
 0x50e   : > { %v7857_v10 = vpop.f32.mrf.mxu1 }
 0x50f   : > { %v3172_v22 = vpop.f32.mrf.mxu2 }
 0x511   : > { %2617 = vmatmul.f32.gmra.mxu1 %v1395_v14  ;;  %5978 = vmatmul.msk.f32.gmra.mxu3 %vm3748_vm3, %v3167_v26  ;;  %v1399_v14 = vld [vmem:[%s10568_s3 + $0x520] sm:$0xff]  ;;  %v3173_v26 = vadd.f32 %v3172_v22, %v7319_v6  ;;  %v7890_v9 = vpop.f32.mrf.mxu3 }
 0x512   : > { %10709 = vst [vmem:[#allocation21_spill] sm:$0xff] %v7890_v9  ;;  %v1346_v9 = vld [vmem:[%s10568_s3 + $0x378] sm:$0xff] }
 0x513   : > { %5796 = vmatmul.msk.f32.gmra.mxu2 %vm1685_vm2, %v1338_v8 }
 0x516   : > { %v7868_v60 = vpop.f32.mrf.mxu1 }
 0x517   : > { %v3175_v21 = vpop.f32.mrf.mxu2 }
 0x518   : > { %v3176_v6 = vadd.f32 %v3175_v21, %v7337_v0 }
 0x519   : > { %2620 = vmatmul.f32.gmra.mxu1 %v1397_v27  ;;  %5979 = vmatmul.msk.f32.gmra.mxu3 %vm3748_vm3, %v3170_v38  ;;  %v1401_v27 = vld [vmem:[%s10568_s3 + $0x530] sm:$0xff]  ;;  %v1344_v38 = vld [vmem:[%s10568_s3 + $0x368] sm:$0xff] }
 0x51b   : > { %5797 = vmatmul.msk.f32.gmra.mxu2 %vm1685_vm2, %v1340_v39 }
 0x51e   : > { %v7881_v8 = vpop.f32.mrf.mxu1 }
 0x51f   : > { %v3178_v53 = vpop.f32.mrf.mxu2 }
 0x520   : > { %v3179_v0 = vadd.f32 %v3178_v53, %v7355_v34 }
 0x521   : > { %2623 = vmatmul.f32.gmra.mxu1 %v1399_v14  ;;  %5980 = vmatmul.msk.f32.gmra.mxu3 %vm3748_vm3, %v3173_v26  ;;  %v7904_v14 = vpop.f32.mrf.mxu3 }
 0x522   : > { %10710 = vst [vmem:[#allocation33_spill] sm:$0xff] %v7904_v14  ;;  %v1348_v14 = vld [vmem:[%s10568_s3 + $0x388] sm:$0xff] }
 0x523   : > { %5798 = vmatmul.msk.f32.gmra.mxu2 %vm1685_vm2, %v1342_v63  ;;  %v1403_v63 = vld [vmem:[%s10568_s3 + $0x540] sm:$0xff] }
 0x526   : > { %v7894_v39 = vpop.f32.mrf.mxu1 }
 0x527   : > { %v3181_v22 = vpop.f32.mrf.mxu2 }
 0x528   : > { %v3182_v34 = vadd.f32 %v3181_v22, %v7373_v13 }
 0x529   : > { %2626 = vmatmul.f32.gmra.mxu1 %v1401_v27  ;;  %5981 = vmatmul.msk.f32.gmra.mxu3 %vm3748_vm3, %v3176_v6  ;;  %v7918_v27 = vpop.f32.mrf.mxu3 }
 0x52a   : > { %10711 = vst [vmem:[#allocation32_spill] sm:$0xff] %v7918_v27  ;;  %v1350_v27 = vld [vmem:[%s10568_s3 + $0x398] sm:$0xff] }
 0x52b   : > { %5799 = vmatmul.msk.f32.gmra.mxu2 %vm1685_vm2, %v1344_v38  ;;  %v1405_v38 = vld [vmem:[%s10568_s3 + $0x550] sm:$0xff] }
 0x52e   : > { %v7907_v26 = vpop.f32.mrf.mxu1 }
 0x52f   : > { %v3184_v21 = vpop.f32.mrf.mxu2 }
 0x530   : > { %v3185_v13 = vadd.f32 %v3184_v21, %v7391_v32  ;;  %v1352_v32 = vld [vmem:[%s10568_s3 + $0x3a8] sm:$0xff] }
 0x531   : > { %2629 = vmatmul.f32.gmra.mxu1 %v1403_v63  ;;  %5982 = vmatmul.msk.f32.gmra.mxu3 %vm3748_vm3, %v3179_v0  ;;  %v1407_v63 = vld [vmem:[%s10568_s3 + $0x560] sm:$0xff]  ;;  %v7936_v0 = vpop.f32.mrf.mxu3 }
 0x532   : > { %10712 = vst [vmem:[#allocation31_spill] sm:$0xff] %v7936_v0 }
 0x533   : > { %5800 = vmatmul.msk.f32.gmra.mxu2 %vm1685_vm2, %v1346_v9 }
 0x536   : > { %v7920_v6 = vpop.f32.mrf.mxu1 }
 0x537   : > { %v3187_v53 = vpop.f32.mrf.mxu2 }
 0x539   : > { %2632 = vmatmul.f32.gmra.mxu1 %v1405_v38  ;;  %5983 = vmatmul.msk.f32.gmra.mxu3 %vm3748_vm3, %v3182_v34  ;;  %v1409_v38 = vld [vmem:[%s10568_s3 + $0x570] sm:$0xff]  ;;  %v3188_v34 = vadd.f32 %v3187_v53, %v7409_v52  ;;  %v7953_v21 = vpop.f32.mrf.mxu3 }
 0x53a   : > { %10713 = vst [vmem:[#allocation30_spill] sm:$0xff] %v7953_v21  ;;  %v1356_v21 = vld [vmem:[%s10568_s3 + $0x3c8] sm:$0xff] }
 0x53b   : > { %5801 = vmatmul.msk.f32.gmra.mxu2 %vm1685_vm2, %v1348_v14 }
 0x53e   : > { %v7931_v9 = vpop.f32.mrf.mxu1 }
 0x53f   : > { %v3190_v22 = vpop.f32.mrf.mxu2 }
 0x540   : > { %v3191_v52 = vadd.f32 %v3190_v22, %v7427_v28 }
 0x541   : > { %2635 = vmatmul.f32.gmra.mxu1 %v1407_v63  ;;  %5984 = vmatmul.msk.f32.gmra.mxu3 %vm3748_vm3, %v3185_v13  ;;  %v1411_v63 = vld [vmem:[%s10568_s3 + $0x580] sm:$0xff]  ;;  %v1354_v13 = vld [vmem:[%s10568_s3 + $0x3b8] sm:$0xff] }
 0x543   : > { %5802 = vmatmul.msk.f32.gmra.mxu2 %vm1685_vm2, %v1350_v27 }
 0x546   : > { %v7944_v14 = vpop.f32.mrf.mxu1 }
 0x547   : > { %v3193_v0 = vpop.f32.mrf.mxu2 }
 0x548   : > { %v3194_v28 = vadd.f32 %v3193_v0, %v7447_v20 }
 0x549   : > { %2638 = vmatmul.f32.gmra.mxu1 %v1409_v38  ;;  %5985 = vmatmul.msk.f32.gmra.mxu3 %vm3748_vm3, %v3188_v34  ;;  %v7967_v38 = vpop.f32.mrf.mxu3 }
 0x54a   : > { %10714 = vst [vmem:[#allocation17_spill] sm:$0xff] %v7967_v38  ;;  %v1358_v38 = vld [vmem:[%s10568_s3 + $0x3d8] sm:$0xff] }
 0x54b   : > { %5803 = vmatmul.msk.f32.gmra.mxu2 %vm1685_vm2, %v1352_v32  ;;  %v1413_v32 = vld [vmem:[%s10568_s3 + $0x590] sm:$0xff] }
 0x54e   : > { %v7957_v27 = vpop.f32.mrf.mxu1 }
 0x54f   : > { %v3196_v53 = vpop.f32.mrf.mxu2 }
 0x550   : > { %v3197_v20 = vadd.f32 %v3196_v53, %v7467_v40 }
 0x551   : > { %2641 = vmatmul.f32.gmra.mxu1 %v1411_v63  ;;  %5986 = vmatmul.msk.f32.gmra.mxu3 %vm3748_vm3, %v3191_v52 }
 0x553   : > { %5804 = vmatmul.msk.f32.gmra.mxu2 %vm1685_vm2, %v1354_v13  ;;  %v1415_v13 = vld [vmem:[%s10568_s3 + $0x5a0] sm:$0xff] }
 0x556   : > { %v7970_v34 = vpop.f32.mrf.mxu1 }
 0x557   : > { %10715 = vst [vmem:[#allocation29_spill] sm:$0xff] %v7970_v34  ;;  %v3199_v22 = vpop.f32.mrf.mxu2 }
 0x558   : > { %v3200_v40 = vadd.f32 %v3199_v22, %v7487_v29 }
 0x559   : > { %2644 = vmatmul.f32.gmra.mxu1 %v1413_v32  ;;  %5987 = vmatmul.msk.f32.gmra.mxu3 %vm3748_vm3, %v3194_v28  ;;  %v1417_v28 = vld [vmem:[%s10568_s3 + $0x5b0] sm:$0xff] }
 0x55b   : > { %5805 = vmatmul.msk.f32.gmra.mxu2 %vm1685_vm2, %v1356_v21 }
 0x55c   : > { %v7981_v63 = vpop.f32.mrf.mxu3 }
 0x55e   : > { %v7983_v52 = vpop.f32.mrf.mxu1 }
 0x55f   : > { %10716 = vst [vmem:[#allocation16_spill] sm:$0xff] %v7983_v52  ;;  %v3202_v0 = vpop.f32.mrf.mxu2  ;;  %v1360_v52 = vld [vmem:[%s10568_s3 + $0x3e8] sm:$0xff] }
 0x560   : > { %v3203_v29 = vadd.f32 %v3202_v0, %v7507_v44 }
 0x561   : > { %2647 = vmatmul.f32.gmra.mxu1 %v1415_v13  ;;  %5988 = vmatmul.msk.f32.gmra.mxu3 %vm3748_vm3, %v3197_v20  ;;  %v1419_v20 = vld [vmem:[%s10568_s3 + $0x5c0] sm:$0xff] }
 0x563   : > { %5806 = vmatmul.msk.f32.gmra.mxu2 %vm1685_vm2, %v1358_v38 }
 0x564   : > { %v7994_v21 = vpop.f32.mrf.mxu3 }
 0x566   : > { %v7996_v32 = vpop.f32.mrf.mxu1 }
 0x567   : > { %10717 = vst [vmem:[#allocation28_spill] sm:$0xff] %v7996_v32  ;;  %v3205_v53 = vpop.f32.mrf.mxu2  ;;  %v1362_v32 = vld [vmem:[%s10568_s3 + $0x3f8] sm:$0xff] }
 0x568   : > { %v3206_v44 = vadd.f32 %v3205_v53, %v7527_v43 }
 0x569   : > { %2650 = vmatmul.f32.gmra.mxu1 %v1417_v28  ;;  %5989 = vmatmul.msk.f32.gmra.mxu3 %vm3748_vm3, %v3200_v40  ;;  %v1421_v40 = vld [vmem:[%s10568_s3 + $0x5d0] sm:$0xff] }
 0x56b   : > { %5807 = vmatmul.msk.f32.gmra.mxu2 %vm1685_vm2, %v1360_v52 }
 0x56c   : > { %v8007_v38 = vpop.f32.mrf.mxu3 }
 0x56e   : > { %v8009_v13 = vpop.f32.mrf.mxu1 }
 0x56f   : > { %10718 = vst [vmem:[#allocation6_spill] sm:$0xff] %v8009_v13  ;;  %v3208_v22 = vpop.f32.mrf.mxu2  ;;  %v1364_v13 = vld [vmem:[%s10568_s3 + $0x408] sm:$0xff] }
 0x570   : > { %v3209_v43 = vadd.f32 %v3208_v22, %v7547_v61  ;;  %v1425_v61 = vld [vmem:[%s10568_s3 + $0x5f0] sm:$0xff] }
 0x571   : > { %2653 = vmatmul.f32.gmra.mxu1 %v1419_v20  ;;  %5990 = vmatmul.msk.f32.gmra.mxu3 %vm3748_vm3, %v3203_v29  ;;  %v1423_v29 = vld [vmem:[%s10568_s3 + $0x5e0] sm:$0xff] }
 0x573   : > { %5808 = vmatmul.msk.f32.gmra.mxu2 %vm1685_vm2, %v1362_v32 }
 0x574   : > { %v8020_v52 = vpop.f32.mrf.mxu3 }
 0x576   : > { %v8022_v28 = vpop.f32.mrf.mxu1 }
 0x577   : > { %10719 = vst [vmem:[#allocation48_spill] sm:$0xff] %v8022_v28  ;;  %v3211_v0 = vpop.f32.mrf.mxu2  ;;  %v1366_v28 = vld [vmem:[%s10568_s3 + $0x418] sm:$0xff] }
 0x578   : > { %v3212_v22 = vadd.f32 %v3211_v0, %v7567_v46 }
 0x579   : > { %2656 = vmatmul.f32.gmra.mxu1 %v1421_v40  ;;  %5991 = vmatmul.msk.f32.gmra.mxu3 %vm3748_vm3, %v3206_v44  ;;  %v3745_v40 = vld [vmem:[%s10569_s4] sm:$0xff] }
 0x57a   : > { %4006 = vmatpush.msra.mxu3 %v3745_v40 }
 0x57b   : > { %5809 = vmatmul.msk.f32.gmra.mxu2 %vm1685_vm2, %v1364_v13 }
 0x57c   : > { %v8033_v32 = vpop.f32.mrf.mxu3 }
 0x57e   : > { %v8035_v20 = vpop.f32.mrf.mxu1 }
 0x57f   : > { %10720 = vst [vmem:[#allocation49_spill] sm:$0xff] %v8035_v20  ;;  %v3214_v53 = vpop.f32.mrf.mxu2 }
 0x580   : > { %v3215_v46 = vadd.f32 %v3214_v53, %v7587_v55  ;;  %v1429_v55 = vld [vmem:[%s10568_s3 + $0x610] sm:$0xff] }
 0x581   : > { %2659 = vmatmul.f32.gmra.mxu1 %v1423_v29  ;;  %5992 = vmatmul.msk.f32.gmra.mxu3 %vm3748_vm3, %v3209_v43  ;;  %v1368_v29 = vld [vmem:[%s10568_s3 + $0x428] sm:$0xff]  ;;  %v3070_v43 = vpop.f32.mrf.mxu0 }
 0x583   : > { %5810 = vmatmul.msk.f32.gmra.mxu2 %vm1685_vm2, %v1366_v28 }
 0x584   : > { %v8049_v13 = vpop.f32.mrf.mxu3 }
 0x586   : > { %v8051_v44 = vpop.f32.mrf.mxu1 }
 0x587   : > { %10721 = vst [vmem:[#allocation50_spill] sm:$0xff] %v8051_v44  ;;  %v3217_v20 = vpop.f32.mrf.mxu2  ;;  %v1427_v44 = vld [vmem:[%s10568_s3 + $0x600] sm:$0xff] }
 0x588   : > { %v3218_v53 = vadd.f32 %v3217_v20, %v7608_v59  ;;  %v3071_v20 = vadd.f32 %v3070_v43, %v7285_v19 }
 0x589   : > { %2662 = vmatmul.f32.gmra.mxu1 %v1425_v61  ;;  %5993 = vmatmul.msk.f32.gmra.mxu3 %vm3748_vm3, %v3212_v22  ;;  %v1370_v61 = vld [vmem:[%s10568_s3 + $0x438] sm:$0xff] }
 0x58b   : > { %5811 = vmatmul.msk.f32.gmra.mxu2 %vm1685_vm2, %v1368_v29  ;;  %v3073_v29 = vpop.f32.mrf.mxu0 }
 0x58c   : > { %v8062_v28 = vpop.f32.mrf.mxu3  ;;  %v3074_v19 = vadd.f32 %v3073_v29, %v7299_v30  ;;  %v1435_v30 = vld [vmem:[%s10568_s3 + $0x640] sm:$0xff] }
 0x58e   : > { %v8064_v40 = vpop.f32.mrf.mxu1 }
 0x58f   : > { %10722 = vst [vmem:[#allocation51_spill] sm:$0xff] %v8064_v40  ;;  %v8070_v0 = vpop.f32.mrf.mxu2 }
 0x591   : > { %2665 = vmatmul.f32.gmra.mxu1 %v1427_v44  ;;  %5994 = vmatmul.msk.f32.gmra.mxu3 %vm3748_vm3, %v3215_v46  ;;  %v1372_v44 = vld [vmem:[%s10568_s3 + $0x448] sm:$0xff] }
 0x593   : > { %5812 = vmatmul.msk.f32.gmra.mxu2 %vm1685_vm2, %v1370_v61  ;;  %v3076_v59 = vpop.f32.mrf.mxu0 }
 0x594   : > { %v8077_v22 = vpop.f32.mrf.mxu3  ;;  %v3077_v29 = vadd.f32 %v3076_v59, %v7317_v31  ;;  %v1437_v31 = vld [vmem:[%s10568_s3 + $0x650] sm:$0xff] }
 0x595   : > { %10723 = vst [vmem:[#allocation52_spill] sm:$0xff] %v8077_v22 }
 0x596   : > { %v8079_v40 = vpop.f32.mrf.mxu1 }
 0x597   : > { %10724 = vst [vmem:[#allocation53_spill] sm:$0xff] %v8079_v40  ;;  %v8085_v34 = vpop.f32.mrf.mxu2  ;;  %v1431_v40 = vld [vmem:[%s10568_s3 + $0x620] sm:$0xff] }
 0x599   : > { %2668 = vmatmul.f32.gmra.mxu1 %v1429_v55  ;;  %5995 = vmatmul.msk.f32.gmra.mxu3 %vm3748_vm3, %v3218_v53  ;;  %v1374_v55 = vld [vmem:[%s10568_s3 + $0x458] sm:$0xff] }
 0x59b   : > { %5813 = vmatmul.msk.f32.gmra.mxu2 %vm1685_vm2, %v1372_v44 }
 0x59c   : > { %v8092_v46 = vpop.f32.mrf.mxu3 }
 0x59d   : > { %10725 = vst [vmem:[#allocation54_spill] sm:$0xff] %v8092_v46  ;;  %v3079_v46 = vpop.f32.mrf.mxu0 }
 0x59e   : > { %v8094_v61 = vpop.f32.mrf.mxu1  ;;  %v3080_v59 = vadd.f32 %v3079_v46, %v7335_v17  ;;  %v1439_v17 = vld [vmem:[%s10568_s3 + $0x660] sm:$0xff] }
 0x59f   : > { %10726 = vst [vmem:[#allocation55_spill] sm:$0xff] %v8094_v61  ;;  %v8100_v22 = vpop.f32.mrf.mxu2  ;;  %v1433_v61 = vld [vmem:[%s10568_s3 + $0x630] sm:$0xff] }
 0x5a1   : > { %2671 = vmatmul.f32.gmra.mxu1 %v1431_v40  ;;  %5996 = vmatmul.msk.f32.vlgmr.msra.gmra.mxu3 %vm3748_vm3, %v3071_v20  ;;  %v1376_v40 = vld [vmem:[%s10568_s3 + $0x468] sm:$0xff] }
 0x5a3   : > { %5814 = vmatmul.msk.f32.gmra.mxu2 %vm1685_vm2, %v1374_v55 }
 0x5a4   : > { %v8107_v53 = vpop.f32.mrf.mxu3 }
 0x5a6   : > { %v8109_v44 = vpop.f32.mrf.mxu1 }
 0x5a7   : > { %10727 = vst [vmem:[#allocation56_spill] sm:$0xff] %v8109_v44  ;;  %v8115_v43 = vpop.f32.mrf.mxu2 }
 0x5a9   : > { %2674 = vmatmul.f32.gmra.mxu1 %v1433_v61  ;;  %5997 = vmatmul.msk.f32.gmra.mxu3 %vm3748_vm3, %v3074_v19  ;;  %v1378_v61 = vld [vmem:[%s10568_s3 + $0x478] sm:$0xff]  ;;  %v3082_v19 = vpop.f32.mrf.mxu0 }
 0x5aa   : > { %v3083_v46 = vadd.f32 %v3082_v19, %v7353_v33 }
 0x5ab   : > { %5815 = vmatmul.msk.f32.gmra.mxu2 %vm1685_vm2, %v1376_v40 }
 0x5ac   : > { %v8122_v20 = vpop.f32.mrf.mxu3 }
 0x5ad   : > { %10728 = vst [vmem:[#allocation57_spill] sm:$0xff] %v8122_v20 }
 0x5ae   : > { %v8124_v55 = vpop.f32.mrf.mxu1 }
 0x5af   : > { %10729 = vst [vmem:[#allocation58_spill] sm:$0xff] %v8124_v55  ;;  %v8130_v44 = vpop.f32.mrf.mxu2 }
 0x5b1   : > { %2677 = vmatmul.f32.gmra.mxu1 %v1435_v30  ;;  %5998 = vmatmul.msk.f32.gmra.mxu3 %vm3748_vm3, %v3077_v29  ;;  %v1380_v30 = vld [vmem:[%s10568_s3 + $0x488] sm:$0xff] }
 0x5b3   : > { %5816 = vmatmul.msk.f32.gmra.mxu2 %vm1685_vm2, %v1378_v61  ;;  %v3085_v61 = vpop.f32.mrf.mxu0 }
 0x5b4   : > { %v8137_v40 = vpop.f32.mrf.mxu3  ;;  %v3086_v19 = vadd.f32 %v3085_v61, %v7371_v42 }
 0x5b5   : > { %10730 = vst [vmem:[#allocation59_spill] sm:$0xff] %v8137_v40 }
 0x5b6   : > { %v8139_v55 = vpop.f32.mrf.mxu1 }
 0x5b7   : > { %10731 = vst [vmem:[#allocation60_spill] sm:$0xff] %v8139_v55  ;;  %v8145_v20 = vpop.f32.mrf.mxu2 }
 0x5b9   : > { %2680 = vmatmul.f32.gmra.mxu1 %v1437_v31  ;;  %5999 = vmatmul.msk.f32.gmra.mxu3 %vm3748_vm3, %v3080_v59  ;;  %v1382_v31 = vld [vmem:[%s10568_s3 + $0x498] sm:$0xff] }
 0x5bb   : > { %5817 = vmatmul.msk.f32.gmra.mxu2 %vm1685_vm2, %v1380_v30  ;;  %v3088_v33 = vpop.f32.mrf.mxu0 }
 0x5bc   : > { %v8152_v29 = vpop.f32.mrf.mxu3  ;;  %v3089_v42 = vadd.f32 %v3088_v33, %v7389_v1  ;;  %v1445_v1 = vld [vmem:[%s10568_s3 + $0x690] sm:$0xff] }
 0x5bd   : > { %10732 = vst [vmem:[#allocation61_spill] sm:$0xff] %v8152_v29 }
 0x5be   : > { %v8154_v55 = vpop.f32.mrf.mxu1 }
 0x5bf   : > { %10733 = vst [vmem:[#allocation62_spill] sm:$0xff] %v8154_v55  ;;  %v8160_v40 = vpop.f32.mrf.mxu2  ;;  %v1441_v55 = vld [vmem:[%s10568_s3 + $0x670] sm:$0xff] }
 0x5c1   : > { %2683 = vmatmul.f32.gmra.mxu1 %v1439_v17  ;;  %6000 = vmatmul.msk.f32.gmra.mxu3 %vm3748_vm3, %v3083_v46  ;;  %v1384_v17 = vld [vmem:[%s10568_s3 + $0x4a8] sm:$0xff] }
 0x5c3   : > { %5818 = vmatmul.msk.f32.gmra.mxu2 %vm1685_vm2, %v1382_v31 }
 0x5c4   : > { %v8167_v59 = vpop.f32.mrf.mxu3 }
 0x5c5   : > { %10734 = vst [vmem:[#allocation63_spill] sm:$0xff] %v8167_v59  ;;  %v3091_v59 = vpop.f32.mrf.mxu0 }
 0x5c6   : > { %v8169_v30 = vpop.f32.mrf.mxu1  ;;  %v3092_v33 = vadd.f32 %v3091_v59, %v7407_v56  ;;  %v1447_v56 = vld [vmem:[%s10568_s3 + $0x6a0] sm:$0xff] }
 0x5c7   : > { %10735 = vst [vmem:[#allocation64_spill] sm:$0xff] %v8169_v30  ;;  %v8175_v29 = vpop.f32.mrf.mxu2  ;;  %v1443_v30 = vld [vmem:[%s10568_s3 + $0x680] sm:$0xff] }
 0x5c9   : > { %2686 = vmatmul.f32.gmra.mxu1 %v1441_v55  ;;  %6001 = vmatmul.msk.f32.gmra.mxu3 %vm3748_vm3, %v3086_v19  ;;  %v1386_v55 = vld [vmem:[%s10568_s3 + $0x4b8] sm:$0xff] }
 0x5cb   : > { %5819 = vmatmul.msk.f32.gmra.mxu2 %vm1685_vm2, %v1384_v17 }
 0x5cc   : > { %v8182_v46 = vpop.f32.mrf.mxu3 }
 0x5cd   : > { %10736 = vst [vmem:[#allocation65_spill] sm:$0xff] %v8182_v46 }
 0x5ce   : > { %v8184_v31 = vpop.f32.mrf.mxu1 }
 0x5cf   : > { %10737 = vst [vmem:[#allocation66_spill] sm:$0xff] %v8184_v31  ;;  %v8190_v61 = vpop.f32.mrf.mxu2 }
 0x5d1   : > { %2689 = vmatmul.f32.gmra.mxu1 %v1443_v30  ;;  %6002 = vmatmul.msk.f32.gmra.mxu3 %vm3748_vm3, %v3089_v42  ;;  %v1388_v30 = vld [vmem:[%s10568_s3 + $0x4c8] sm:$0xff]  ;;  %v3094_v42 = vpop.f32.mrf.mxu0 }
 0x5d2   : > { %v3095_v59 = vadd.f32 %v3094_v42, %v7425_v49  ;;  %v1449_v49 = vld [vmem:[%s10568_s3 + $0x6b0] sm:$0xff] }
 0x5d3   : > { %5820 = vmatmul.msk.f32.gmra.mxu2 %vm1685_vm2, %v1386_v55 }
 0x5d4   : > { %v8197_v19 = vpop.f32.mrf.mxu3 }
 0x5d5   : > { %10738 = vst [vmem:[#allocation67_spill] sm:$0xff] %v8197_v19 }
 0x5d6   : > { %v8199_v17 = vpop.f32.mrf.mxu1 }
 0x5d7   : > { %10739 = vst [vmem:[#allocation68_spill] sm:$0xff] %v8199_v17  ;;  %v8205_v31 = vpop.f32.mrf.mxu2 }
 0x5d9   : > { %2692 = vmatmul.f32.gmra.mxu1 %v1445_v1  ;;  %6003 = vmatmul.msk.f32.gmra.mxu3 %vm3748_vm3, %v3092_v33  ;;  %v1390_v1 = vld [vmem:[%s10568_s3 + $0x4d8] sm:$0xff] }
 0x5db   : > { %5821 = vmatmul.msk.f32.gmra.mxu2 %vm1685_vm2, %v1388_v30  ;;  %v3097_v30 = vpop.f32.mrf.mxu0 }
 0x5dc   : > { %v8212_v55 = vpop.f32.mrf.mxu3  ;;  %v3098_v42 = vadd.f32 %v3097_v30, %v7445_v62  ;;  %v3101_v62 = vadd.f32 %v7435_v18, %v7465_v2  ;;  %v3104_v18 = vadd.f32 %v7455_v35, %v7485_v11  ;;  %v3107_v35 = vadd.f32 %v7475_v7, %v7505_v36 }
 0x5dd   : > { %10740 = vst [vmem:[#allocation69_spill] sm:$0xff] %v8212_v55  ;;  %v3110_v7 = vadd.f32 %v7495_v23, %v7525_v58  ;;  %v3113_v23 = vadd.f32 %v7515_v51, %v7545_v16  ;;  %v3116_v51 = vadd.f32 %v7535_v4, %v7565_v25  ;;  %v3119_v4 = vadd.f32 %v7555_v15, %v7585_v12 }
 0x5de   : > { %v8214_v17 = vpop.f32.mrf.mxu1  ;;  %v3122_v15 = vadd.f32 %v7575_v50, %v7606_v3  ;;  %v3125_v50 = vadd.f32 %v7595_v41, %v7629_v47  ;;  %v3128_v41 = vadd.f32 %v7616_v48, %v7652_v5  ;;  %v3131_v48 = vadd.f32 %v7639_v57, %v7675_v37 }
 0x5df   : > { %10741 = vst [vmem:[#allocation70_spill] sm:$0xff] %v8214_v17  ;;  %v8220_v19 = vpop.f32.mrf.mxu2  ;;  %v3134_v57 = vadd.f32 %v7662_v24, %v7698_v45  ;;  %v1475_v24 = vld [vmem:[%s10568_s3 + $0x780] sm:$0xff] }
 0x5e0   : > { %v10764_v45 = vld [vmem:[#allocation5_spill] sm:$0xff] }
 0x5e1   : > { %2695 = vmatmul.f32.gmra.mxu1 %v1447_v56  ;;  %6004 = vmatmul.msk.f32.gmra.mxu3 %vm3748_vm3, %v3095_v59  ;;  %v1392_v56 = vld [vmem:[%s10568_s3 + $0x4e8] sm:$0xff] }
 0x5e3   : > { %5822 = vmatmul.msk.f32.gmra.mxu2 %vm1685_vm2, %v1390_v1 }
 0x5e4   : > { %v8227_v33 = vpop.f32.mrf.mxu3 }
 0x5e5   : > { %10742 = vst [vmem:[#allocation71_spill] sm:$0xff] %v8227_v33 }
 0x5e6   : > { %v8229_v17 = vpop.f32.mrf.mxu1 }
 0x5e7   : > { %10743 = vst [vmem:[#allocation72_spill] sm:$0xff] %v8229_v17  ;;  %v8235_v55 = vpop.f32.mrf.mxu2  ;;  %v1451_v17 = vld [vmem:[%s10568_s3 + $0x6c0] sm:$0xff] }
 0x5e9   : > { %2698 = vmatmul.f32.gmra.mxu1 %v1449_v49  ;;  %6005 = vmatmul.msk.f32.gmra.mxu3 %vm3748_vm3, %v3098_v42  ;;  %v1394_v49 = vld [vmem:[%s10568_s3 + $0x4f8] sm:$0xff] }
 0x5eb   : > { %5823 = vmatmul.msk.f32.gmra.mxu2 %vm1685_vm2, %v1392_v56 }
 0x5ec   : > { %v8242_v59 = vpop.f32.mrf.mxu3 }
 0x5ed   : > { %10744 = vst [vmem:[#allocation73_spill] sm:$0xff] %v8242_v59 }
 0x5ee   : > { %v8244_v1 = vpop.f32.mrf.mxu1 }
 0x5ef   : > { %10745 = vst [vmem:[#allocation74_spill] sm:$0xff] %v8244_v1  ;;  %v8251_v30 = vpop.f32.mrf.mxu2  ;;  %v1453_v1 = vld [vmem:[%s10568_s3 + $0x6d0] sm:$0xff] }
 0x5f1   : > { %2701 = vmatmul.f32.gmra.mxu1 %v1451_v17  ;;  %6006 = vmatmul.msk.f32.gmra.mxu3 %vm3748_vm3, %v3101_v62  ;;  %v1396_v17 = vld [vmem:[%s10568_s3 + $0x508] sm:$0xff] }
 0x5f3   : > { %5824 = vmatmul.msk.f32.gmra.mxu2 %vm1685_vm2, %v1394_v49 }
 0x5f4   : > { %v8258_v42 = vpop.f32.mrf.mxu3 }
 0x5f5   : > { %10746 = vst [vmem:[#allocation75_spill] sm:$0xff] %v8258_v42 }
 0x5f6   : > { %v8260_v56 = vpop.f32.mrf.mxu1 }
 0x5f7   : > { %10747 = vst [vmem:[#allocation76_spill] sm:$0xff] %v8260_v56  ;;  %v8267_v2 = vpop.f32.mrf.mxu2  ;;  %v1455_v56 = vld [vmem:[%s10568_s3 + $0x6e0] sm:$0xff] }
 0x5f9   : > { %2704 = vmatmul.f32.gmra.mxu1 %v1453_v1  ;;  %6007 = vmatmul.msk.f32.gmra.mxu3 %vm3748_vm3, %v3104_v18  ;;  %v1398_v1 = vld [vmem:[%s10568_s3 + $0x518] sm:$0xff] }
 0x5fb   : > { %5825 = vmatmul.msk.f32.gmra.mxu2 %vm1685_vm2, %v1396_v17 }
 0x5fc   : > { %v8274_v62 = vpop.f32.mrf.mxu3 }
 0x5fd   : > { %10748 = vst [vmem:[#allocation77_spill] sm:$0xff] %v8274_v62 }
 0x5fe   : > { %v8276_v49 = vpop.f32.mrf.mxu1 }
 0x5ff   : > { %10749 = vst [vmem:[#allocation78_spill] sm:$0xff] %v8276_v49  ;;  %v8283_v11 = vpop.f32.mrf.mxu2  ;;  %v1457_v49 = vld [vmem:[%s10568_s3 + $0x6f0] sm:$0xff] }
 0x601   : > { %2707 = vmatmul.f32.gmra.mxu1 %v1455_v56  ;;  %6008 = vmatmul.msk.f32.gmra.mxu3 %vm3748_vm3, %v3107_v35  ;;  %v1400_v56 = vld [vmem:[%s10568_s3 + $0x528] sm:$0xff] }
 0x603   : > { %5826 = vmatmul.msk.f32.gmra.mxu2 %vm1685_vm2, %v1398_v1 }
 0x604   : > { %v8290_v18 = vpop.f32.mrf.mxu3 }
 0x605   : > { %10750 = vst [vmem:[#allocation79_spill] sm:$0xff] %v8290_v18 }
 0x606   : > { %v8292_v17 = vpop.f32.mrf.mxu1 }
 0x607   : > { %10751 = vst [vmem:[#allocation80_spill] sm:$0xff] %v8292_v17  ;;  %v8299_v36 = vpop.f32.mrf.mxu2  ;;  %v1459_v17 = vld [vmem:[%s10568_s3 + $0x700] sm:$0xff] }
 0x609   : > { %2710 = vmatmul.f32.gmra.mxu1 %v1457_v49  ;;  %6009 = vmatmul.msk.f32.gmra.mxu3 %vm3748_vm3, %v3110_v7  ;;  %v1402_v49 = vld [vmem:[%s10568_s3 + $0x538] sm:$0xff] }
 0x60b   : > { %5827 = vmatmul.msk.f32.gmra.mxu2 %vm1685_vm2, %v1400_v56 }
 0x60c   : > { %v8306_v35 = vpop.f32.mrf.mxu3 }
 0x60d   : > { %10752 = vst [vmem:[#allocation81_spill] sm:$0xff] %v8306_v35 }
 0x60e   : > { %v8308_v1 = vpop.f32.mrf.mxu1 }
 0x60f   : > { %10753 = vst [vmem:[#allocation82_spill] sm:$0xff] %v8308_v1  ;;  %v8315_v58 = vpop.f32.mrf.mxu2  ;;  %v1461_v1 = vld [vmem:[%s10568_s3 + $0x710] sm:$0xff] }
 0x611   : > { %2713 = vmatmul.f32.gmra.mxu1 %v1459_v17  ;;  %6010 = vmatmul.msk.f32.gmra.mxu3 %vm3748_vm3, %v3113_v23  ;;  %v1404_v17 = vld [vmem:[%s10568_s3 + $0x548] sm:$0xff] }
 0x613   : > { %5828 = vmatmul.msk.f32.gmra.mxu2 %vm1685_vm2, %v1402_v49 }
 0x614   : > { %v8322_v7 = vpop.f32.mrf.mxu3 }
 0x615   : > { %10754 = vst [vmem:[#allocation83_spill] sm:$0xff] %v8322_v7 }
 0x616   : > { %v8324_v56 = vpop.f32.mrf.mxu1 }
 0x617   : > { %10755 = vst [vmem:[#allocation84_spill] sm:$0xff] %v8324_v56  ;;  %v8331_v16 = vpop.f32.mrf.mxu2  ;;  %v1463_v56 = vld [vmem:[%s10568_s3 + $0x720] sm:$0xff] }
 0x619   : > { %2716 = vmatmul.f32.gmra.mxu1 %v1461_v1  ;;  %6011 = vmatmul.msk.f32.gmra.mxu3 %vm3748_vm3, %v3116_v51  ;;  %v1406_v1 = vld [vmem:[%s10568_s3 + $0x558] sm:$0xff] }
 0x61b   : > { %5829 = vmatmul.msk.f32.gmra.mxu2 %vm1685_vm2, %v1404_v17 }
 0x61c   : > { %v8338_v23 = vpop.f32.mrf.mxu3 }
 0x61d   : > { %10756 = vst [vmem:[#allocation85_spill] sm:$0xff] %v8338_v23  ;;  %v10765_v23 = vld [vmem:[#allocation37_spill] sm:$0xff] }
 0x61e   : > { %v8340_v49 = vpop.f32.mrf.mxu1  ;;  %v3137_v7 = vadd.f32 %v10765_v23, %v10764_v45  ;;  %v10767_v23 = vld [vmem:[#allocation43_spill] sm:$0xff]  ;;  %v10768_v45 = vld [vmem:[#allocation25_spill] sm:$0xff] }
 0x61f   : > { %10757 = vst [vmem:[#allocation86_spill] sm:$0xff] %v8340_v49  ;;  %v8347_v25 = vpop.f32.mrf.mxu2  ;;  %v1465_v49 = vld [vmem:[%s10568_s3 + $0x730] sm:$0xff] }
 0x621   : > { %2719 = vmatmul.f32.gmra.mxu1 %v1463_v56  ;;  %6012 = vmatmul.msk.f32.gmra.mxu3 %vm3748_vm3, %v3119_v4  ;;  %v1408_v56 = vld [vmem:[%s10568_s3 + $0x568] sm:$0xff] }
 0x623   : > { %5830 = vmatmul.msk.f32.gmra.mxu2 %vm1685_vm2, %v1406_v1 }
 0x624   : > { %v8354_v51 = vpop.f32.mrf.mxu3 }
 0x626   : > { %v8356_v17 = vpop.f32.mrf.mxu1 }
 0x627   : > { %10758 = vst [vmem:[#allocation87_spill] sm:$0xff] %v8356_v17  ;;  %v8363_v12 = vpop.f32.mrf.mxu2  ;;  %v1467_v17 = vld [vmem:[%s10568_s3 + $0x740] sm:$0xff] }
 0x629   : > { %2722 = vmatmul.f32.gmra.mxu1 %v1465_v49  ;;  %6013 = vmatmul.msk.f32.gmra.mxu3 %vm3748_vm3, %v3122_v15  ;;  %v1410_v49 = vld [vmem:[%s10568_s3 + $0x578] sm:$0xff] }
 0x62b   : > { %5831 = vmatmul.msk.f32.gmra.mxu2 %vm1685_vm2, %v1408_v56 }
 0x62c   : > { %v8370_v4 = vpop.f32.mrf.mxu3 }
 0x62e   : > { %v8372_v1 = vpop.f32.mrf.mxu1 }
 0x62f   : > { %10759 = vst [vmem:[#allocation88_spill] sm:$0xff] %v8372_v1  ;;  %v8379_v3 = vpop.f32.mrf.mxu2  ;;  %v1469_v1 = vld [vmem:[%s10568_s3 + $0x750] sm:$0xff] }
 0x631   : > { %2725 = vmatmul.f32.gmra.mxu1 %v1467_v17  ;;  %6014 = vmatmul.msk.f32.gmra.mxu3 %vm3748_vm3, %v3125_v50  ;;  %v1412_v17 = vld [vmem:[%s10568_s3 + $0x588] sm:$0xff] }
 0x633   : > { %5832 = vmatmul.msk.f32.gmra.mxu2 %vm1685_vm2, %v1410_v49 }
 0x634   : > { %v8386_v15 = vpop.f32.mrf.mxu3 }
 0x636   : > { %v8388_v56 = vpop.f32.mrf.mxu1 }
 0x637   : > { %10760 = vst [vmem:[#allocation89_spill] sm:$0xff] %v8388_v56  ;;  %v8395_v47 = vpop.f32.mrf.mxu2  ;;  %v1471_v56 = vld [vmem:[%s10568_s3 + $0x760] sm:$0xff] }
 0x639   : > { %2728 = vmatmul.f32.gmra.mxu1 %v1469_v1  ;;  %6015 = vmatmul.msk.f32.gmra.mxu3 %vm3748_vm3, %v3128_v41  ;;  %v1414_v1 = vld [vmem:[%s10568_s3 + $0x598] sm:$0xff] }
 0x63b   : > { %5833 = vmatmul.msk.f32.gmra.mxu2 %vm1685_vm2, %v1412_v17 }
 0x63c   : > { %v8402_v50 = vpop.f32.mrf.mxu3 }
 0x63e   : > { %v8404_v49 = vpop.f32.mrf.mxu1 }
 0x63f   : > { %10761 = vst [vmem:[#allocation90_spill] sm:$0xff] %v8404_v49  ;;  %v8411_v5 = vpop.f32.mrf.mxu2  ;;  %v1473_v49 = vld [vmem:[%s10568_s3 + $0x770] sm:$0xff] }
 0x641   : > { %2731 = vmatmul.f32.gmra.mxu1 %v1471_v56  ;;  %6016 = vmatmul.msk.f32.gmra.mxu3 %vm3748_vm3, %v3131_v48  ;;  %v1416_v56 = vld [vmem:[%s10568_s3 + $0x5a8] sm:$0xff]  ;;  %v6021_v48 = vld [vmem:[%s10569_s4 + $0x10] sm:$0xff] }
 0x642   : > { %4175 = vmatpush.msrb.mxu3 %v6021_v48  ;;  %v1477_v48 = vld [vmem:[%s10568_s3 + $0x790] sm:$0xff] }
 0x643   : > { %5834 = vmatmul.msk.f32.gmra.mxu2 %vm1685_vm2, %v1414_v1 }
 0x644   : > { %v8418_v41 = vpop.f32.mrf.mxu3 }
 0x646   : > { %v8420_v17 = vpop.f32.mrf.mxu1 }
 0x647   : > { %10762 = vst [vmem:[#allocation91_spill] sm:$0xff] %v8420_v17  ;;  %v8427_v37 = vpop.f32.mrf.mxu2 }
 0x649   : > { %2734 = vmatmul.f32.gmra.mxu1 %v1473_v49  ;;  %6017 = vmatmul.msk.f32.gmra.mxu3 %vm3748_vm3, %v3134_v57  ;;  %v1418_v49 = vld [vmem:[%s10568_s3 + $0x5b8] sm:$0xff] }
 0x64b   : > { %5835 = vmatmul.msk.f32.gmra.mxu2 %vm1685_vm2, %v1416_v56 }
 0x64c   : > { %v8437_v1 = vpop.f32.mrf.mxu3 }
 0x64e   : > { %v8439_v17 = vpop.f32.mrf.mxu1 }
 0x64f   : > { %10763 = vst [vmem:[#allocation92_spill] sm:$0xff] %v8439_v17  ;;  %v8446_v35 = vpop.f32.mrf.mxu2  ;;  %v3140_v17 = vadd.f32 %v10768_v45, %v10767_v23  ;;  %v10770_v23 = vld [vmem:[#allocation11_spill] sm:$0xff]  ;;  %v10771_v45 = vld [vmem:[#allocation45_spill] sm:$0xff] }
 0x650   : > { %v3143_v62 = vadd.f32 %v10771_v45, %v10770_v23  ;;  %v10773_v23 = vld [vmem:[#allocation27_spill] sm:$0xff] }
 0x651   : > { %2737 = vmatmul.f32.gmra.mxu1 %v1475_v24  ;;  %6018 = vmatmul.msk.f32.gmra.mxu3 %vm3748_vm3, %v3137_v7  ;;  %v1420_v24 = vld [vmem:[%s10568_s3 + $0x5c8] sm:$0xff]  ;;  %v3221_v45 = vadd.f32 %v8070_v0, %v10773_v23  ;;  %v10775_v0 = vld [vmem:[#allocation47_spill] sm:$0xff] }
 0x652   : > { %v3224_v23 = vadd.f32 %v8085_v34, %v10775_v0  ;;  %v10777_v34 = vld [vmem:[#allocation42_spill] sm:$0xff] }
 0x653   : > { %5836 = vmatmul.msk.f32.gmra.mxu2 %vm1685_vm2, %v1418_v49  ;;  %v3227_v0 = vadd.f32 %v8100_v22, %v10777_v34  ;;  %v10780_v22 = vld [vmem:[#allocation46_spill] sm:$0xff] }
 0x654   : > { %v8453_v57 = vpop.f32.mrf.mxu3  ;;  %v3230_v34 = vadd.f32 %v8115_v43, %v10780_v22  ;;  %v10783_v43 = vld [vmem:[#allocation44_spill] sm:$0xff] }
 0x655   : > { %v3233_v22 = vadd.f32 %v8130_v44, %v10783_v43  ;;  %v10786_v44 = vld [vmem:[#allocation10_spill] sm:$0xff] }
 0x656   : > { %v8455_v56 = vpop.f32.mrf.mxu1  ;;  %v3236_v43 = vadd.f32 %v8145_v20, %v10786_v44  ;;  %v10789_v20 = vld [vmem:[#allocation12_spill] sm:$0xff] }
 0x657   : > { %10766 = vst [vmem:[#allocation5_spill] sm:$0xff] %v8455_v56  ;;  %v8462_v18 = vpop.f32.mrf.mxu2  ;;  %v1479_v56 = vld [vmem:[%s10568_s3 + $0x7a0] sm:$0xff]  ;;  %v3239_v44 = vadd.f32 %v8160_v40, %v10789_v20  ;;  %v10792_v40 = vld [vmem:[#allocation14_spill] sm:$0xff] }
 0x658   : > { %v3242_v20 = vadd.f32 %v8175_v29, %v10792_v40  ;;  %v10795_v29 = vld [vmem:[#allocation8_spill] sm:$0xff] }
 0x659   : > { %2740 = vmatmul.f32.gmra.mxu1 %v1477_v48  ;;  %6019 = vmatmul.msk.f32.gmra.mxu3 %vm3748_vm3, %v3140_v17  ;;  %v1422_v48 = vld [vmem:[%s10568_s3 + $0x5d8] sm:$0xff]  ;;  %v3245_v40 = vadd.f32 %v8190_v61, %v10795_v29  ;;  %v10798_v61 = vld [vmem:[#allocation9_spill] sm:$0xff] }
 0x65a   : > { %v3248_v29 = vadd.f32 %v8205_v31, %v10798_v61  ;;  %v10801_v31 = vld [vmem:[#allocation35_spill] sm:$0xff] }
 0x65b   : > { %5837 = vmatmul.msk.f32.gmra.mxu2 %vm1685_vm2, %v1420_v24  ;;  %v3251_v61 = vadd.f32 %v8220_v19, %v10801_v31  ;;  %v10804_v19 = vld [vmem:[#allocation18_spill] sm:$0xff] }
 0x65c   : > { %v8469_v7 = vpop.f32.mrf.mxu3  ;;  %v3254_v31 = vadd.f32 %v8235_v55, %v10804_v19  ;;  %v10807_v55 = vld [vmem:[#allocation19_spill] sm:$0xff] }
 0x65d   : > { %v3257_v19 = vadd.f32 %v8251_v30, %v10807_v55  ;;  %v3260_v30 = vadd.f32 %v8267_v2, %v7845_v54  ;;  %v3263_v54 = vadd.f32 %v8283_v11, %v7857_v10  ;;  %v3266_v10 = vadd.f32 %v8299_v36, %v7868_v60 }
 0x65e   : > { %v8471_v49 = vpop.f32.mrf.mxu1  ;;  %v3269_v60 = vadd.f32 %v8315_v58, %v7881_v8  ;;  %v1515_v8 = vld [vmem:[%s10568_s3 + $0x8c0] sm:$0xff]  ;;  %v3272_v58 = vadd.f32 %v8331_v16, %v7894_v39  ;;  %v1517_v39 = vld [vmem:[%s10568_s3 + $0x8d0] sm:$0xff]  ;;  %v3275_v16 = vadd.f32 %v8347_v25, %v7907_v26  ;;  %v3278_v25 = vadd.f32 %v8363_v12, %v7920_v6 }
 0x65f   : > { %10769 = vst [vmem:[#allocation37_spill] sm:$0xff] %v8471_v49  ;;  %v8478_v42 = vpop.f32.mrf.mxu2  ;;  %v1481_v49 = vld [vmem:[%s10568_s3 + $0x7b0] sm:$0xff]  ;;  %v1519_v26 = vld [vmem:[%s10568_s3 + $0x8e0] sm:$0xff]  ;;  %v3281_v12 = vadd.f32 %v8379_v3, %v7931_v9  ;;  %v3284_v3 = vadd.f32 %v8395_v47, %v7944_v14 }
 0x660   : > { %v1521_v6 = vld [vmem:[%s10568_s3 + $0x8f0] sm:$0xff]  ;;  %v1523_v9 = vld [vmem:[%s10568_s3 + $0x900] sm:$0xff] }
 0x661   : > { %2743 = vmatmul.f32.gmra.mxu1 %v1479_v56  ;;  %6020 = vmatmul.msk.f32.gmra.mxu3 %vm3748_vm3, %v3143_v62  ;;  %v1424_v56 = vld [vmem:[%s10568_s3 + $0x5e8] sm:$0xff] }
 0x663   : > { %5838 = vmatmul.msk.f32.gmra.mxu2 %vm1685_vm2, %v1422_v48 }
 0x664   : > { %v8485_v17 = vpop.f32.mrf.mxu3 }
 0x666   : > { %v8487_v24 = vpop.f32.mrf.mxu1 }
 0x667   : > { %10772 = vst [vmem:[#allocation43_spill] sm:$0xff] %v8487_v24  ;;  %v8494_v59 = vpop.f32.mrf.mxu2  ;;  %v1483_v24 = vld [vmem:[%s10568_s3 + $0x7c0] sm:$0xff] }
 0x669   : > { %2746 = vmatmul.f32.gmra.mxu1 %v1481_v49  ;;  %6022 = vmatmul.msk.f32.vlgmr.msrb.gmra.mxu3 %vm3748_vm3, %v3221_v45  ;;  %v1426_v49 = vld [vmem:[%s10568_s3 + $0x5f8] sm:$0xff] }
 0x66b   : > { %5839 = vmatmul.msk.f32.gmra.mxu2 %vm1685_vm2, %v1424_v56 }
 0x66c   : > { %v8501_v62 = vpop.f32.mrf.mxu3 }
 0x66e   : > { %v8503_v48 = vpop.f32.mrf.mxu1 }
 0x66f   : > { %10774 = vst [vmem:[#allocation25_spill] sm:$0xff] %v8503_v48  ;;  %v8510_v33 = vpop.f32.mrf.mxu2  ;;  %v1485_v48 = vld [vmem:[%s10568_s3 + $0x7d0] sm:$0xff] }
 0x671   : > { %2749 = vmatmul.f32.gmra.mxu1 %v1483_v24  ;;  %6023 = vmatmul.msk.f32.gmra.mxu3 %vm3748_vm3, %v3224_v23  ;;  %v1428_v24 = vld [vmem:[%s10568_s3 + $0x608] sm:$0xff] }
 0x673   : > { %5840 = vmatmul.msk.f32.gmra.mxu2 %vm1685_vm2, %v1426_v49 }
 0x674   : > { %v8517_v45 = vpop.f32.mrf.mxu3 }
 0x676   : > { %v8519_v56 = vpop.f32.mrf.mxu1 }
 0x677   : > { %10776 = vst [vmem:[#allocation11_spill] sm:$0xff] %v8519_v56  ;;  %v8526_v46 = vpop.f32.mrf.mxu2  ;;  %v1487_v56 = vld [vmem:[%s10568_s3 + $0x7e0] sm:$0xff] }
 0x678   : > { %10778 = vst [vmem:[#allocation45_spill] sm:$0xff] %v8526_v46 }
 0x679   : > { %2752 = vmatmul.f32.gmra.mxu1 %v1485_v48  ;;  %6024 = vmatmul.msk.f32.gmra.mxu3 %vm3748_vm3, %v3227_v0  ;;  %v1430_v48 = vld [vmem:[%s10568_s3 + $0x618] sm:$0xff] }
 0x67b   : > { %5841 = vmatmul.msk.f32.gmra.mxu2 %vm1685_vm2, %v1428_v24 }
 0x67c   : > { %v8533_v23 = vpop.f32.mrf.mxu3 }
 0x67e   : > { %v8535_v49 = vpop.f32.mrf.mxu1 }
 0x67f   : > { %10779 = vst [vmem:[#allocation27_spill] sm:$0xff] %v8535_v49  ;;  %v8542_v46 = vpop.f32.mrf.mxu2  ;;  %v1489_v49 = vld [vmem:[%s10568_s3 + $0x7f0] sm:$0xff] }
 0x680   : > { %10781 = vst [vmem:[#allocation47_spill] sm:$0xff] %v8542_v46 }
 0x681   : > { %2755 = vmatmul.f32.gmra.mxu1 %v1487_v56  ;;  %6025 = vmatmul.msk.f32.gmra.mxu3 %vm3748_vm3, %v3230_v34  ;;  %v1432_v56 = vld [vmem:[%s10568_s3 + $0x628] sm:$0xff] }
 0x683   : > { %5842 = vmatmul.msk.f32.gmra.mxu2 %vm1685_vm2, %v1430_v48 }
 0x684   : > { %v8549_v0 = vpop.f32.mrf.mxu3 }
 0x686   : > { %v8551_v24 = vpop.f32.mrf.mxu1 }
 0x687   : > { %10782 = vst [vmem:[#allocation42_spill] sm:$0xff] %v8551_v24  ;;  %v8558_v46 = vpop.f32.mrf.mxu2  ;;  %v1491_v24 = vld [vmem:[%s10568_s3 + $0x800] sm:$0xff] }
 0x688   : > { %10784 = vst [vmem:[#allocation46_spill] sm:$0xff] %v8558_v46 }
 0x689   : > { %2758 = vmatmul.f32.gmra.mxu1 %v1489_v49  ;;  %6026 = vmatmul.msk.f32.gmra.mxu3 %vm3748_vm3, %v3233_v22  ;;  %v1434_v49 = vld [vmem:[%s10568_s3 + $0x638] sm:$0xff] }
 0x68b   : > { %5843 = vmatmul.msk.f32.gmra.mxu2 %vm1685_vm2, %v1432_v56 }
 0x68c   : > { %v8565_v34 = vpop.f32.mrf.mxu3 }
 0x68e   : > { %v8567_v48 = vpop.f32.mrf.mxu1 }
 0x68f   : > { %10785 = vst [vmem:[#allocation44_spill] sm:$0xff] %v8567_v48  ;;  %v8574_v46 = vpop.f32.mrf.mxu2  ;;  %v1493_v48 = vld [vmem:[%s10568_s3 + $0x810] sm:$0xff] }
 0x690   : > { %10787 = vst [vmem:[#allocation10_spill] sm:$0xff] %v8574_v46 }
 0x691   : > { %2761 = vmatmul.f32.gmra.mxu1 %v1491_v24  ;;  %6027 = vmatmul.msk.f32.gmra.mxu3 %vm3748_vm3, %v3236_v43  ;;  %v1436_v24 = vld [vmem:[%s10568_s3 + $0x648] sm:$0xff] }
 0x693   : > { %5844 = vmatmul.msk.f32.gmra.mxu2 %vm1685_vm2, %v1434_v49 }
 0x694   : > { %v8581_v22 = vpop.f32.mrf.mxu3 }
 0x696   : > { %v8583_v56 = vpop.f32.mrf.mxu1 }
 0x697   : > { %10788 = vst [vmem:[#allocation93_spill] sm:$0xff] %v8583_v56  ;;  %v8590_v46 = vpop.f32.mrf.mxu2  ;;  %v1495_v56 = vld [vmem:[%s10568_s3 + $0x820] sm:$0xff] }
 0x698   : > { %10790 = vst [vmem:[#allocation12_spill] sm:$0xff] %v8590_v46 }
 0x699   : > { %2764 = vmatmul.f32.gmra.mxu1 %v1493_v48  ;;  %6028 = vmatmul.msk.f32.gmra.mxu3 %vm3748_vm3, %v3239_v44  ;;  %v1438_v48 = vld [vmem:[%s10568_s3 + $0x658] sm:$0xff] }
 0x69b   : > { %5845 = vmatmul.msk.f32.gmra.mxu2 %vm1685_vm2, %v1436_v24 }
 0x69c   : > { %v8597_v43 = vpop.f32.mrf.mxu3 }
 0x69e   : > { %v8599_v49 = vpop.f32.mrf.mxu1 }
 0x69f   : > { %10791 = vst [vmem:[#allocation94_spill] sm:$0xff] %v8599_v49  ;;  %v8606_v46 = vpop.f32.mrf.mxu2  ;;  %v1497_v49 = vld [vmem:[%s10568_s3 + $0x830] sm:$0xff] }
 0x6a0   : > { %10793 = vst [vmem:[#allocation14_spill] sm:$0xff] %v8606_v46 }
 0x6a1   : > { %2767 = vmatmul.f32.gmra.mxu1 %v1495_v56  ;;  %6029 = vmatmul.msk.f32.gmra.mxu3 %vm3748_vm3, %v3242_v20  ;;  %v1440_v56 = vld [vmem:[%s10568_s3 + $0x668] sm:$0xff] }
 0x6a3   : > { %5846 = vmatmul.msk.f32.gmra.mxu2 %vm1685_vm2, %v1438_v48 }
 0x6a4   : > { %v8613_v44 = vpop.f32.mrf.mxu3 }
 0x6a6   : > { %v8615_v24 = vpop.f32.mrf.mxu1 }
 0x6a7   : > { %10794 = vst [vmem:[#allocation95_spill] sm:$0xff] %v8615_v24  ;;  %v8622_v46 = vpop.f32.mrf.mxu2  ;;  %v1499_v24 = vld [vmem:[%s10568_s3 + $0x840] sm:$0xff] }
 0x6a8   : > { %10796 = vst [vmem:[#allocation8_spill] sm:$0xff] %v8622_v46 }
 0x6a9   : > { %2770 = vmatmul.f32.gmra.mxu1 %v1497_v49  ;;  %6030 = vmatmul.msk.f32.gmra.mxu3 %vm3748_vm3, %v3245_v40  ;;  %v1442_v49 = vld [vmem:[%s10568_s3 + $0x678] sm:$0xff] }
 0x6ab   : > { %5847 = vmatmul.msk.f32.gmra.mxu2 %vm1685_vm2, %v1440_v56 }
 0x6ac   : > { %v8629_v20 = vpop.f32.mrf.mxu3 }
 0x6ae   : > { %v8631_v48 = vpop.f32.mrf.mxu1 }
 0x6af   : > { %10797 = vst [vmem:[#allocation96_spill] sm:$0xff] %v8631_v48  ;;  %v8638_v46 = vpop.f32.mrf.mxu2  ;;  %v1501_v48 = vld [vmem:[%s10568_s3 + $0x850] sm:$0xff] }
 0x6b0   : > { %10799 = vst [vmem:[#allocation9_spill] sm:$0xff] %v8638_v46 }
 0x6b1   : > { %2773 = vmatmul.f32.gmra.mxu1 %v1499_v24  ;;  %6031 = vmatmul.msk.f32.gmra.mxu3 %vm3748_vm3, %v3248_v29  ;;  %v1444_v24 = vld [vmem:[%s10568_s3 + $0x688] sm:$0xff] }
 0x6b3   : > { %5848 = vmatmul.msk.f32.gmra.mxu2 %vm1685_vm2, %v1442_v49 }
 0x6b4   : > { %v8645_v40 = vpop.f32.mrf.mxu3 }
 0x6b6   : > { %v8647_v56 = vpop.f32.mrf.mxu1 }
 0x6b7   : > { %10800 = vst [vmem:[#allocation97_spill] sm:$0xff] %v8647_v56  ;;  %v8654_v46 = vpop.f32.mrf.mxu2  ;;  %v1503_v56 = vld [vmem:[%s10568_s3 + $0x860] sm:$0xff] }
 0x6b8   : > { %10802 = vst [vmem:[#allocation35_spill] sm:$0xff] %v8654_v46 }
 0x6b9   : > { %2776 = vmatmul.f32.gmra.mxu1 %v1501_v48  ;;  %6032 = vmatmul.msk.f32.gmra.mxu3 %vm3748_vm3, %v3251_v61  ;;  %v1446_v48 = vld [vmem:[%s10568_s3 + $0x698] sm:$0xff] }
 0x6bb   : > { %5849 = vmatmul.msk.f32.gmra.mxu2 %vm1685_vm2, %v1444_v24 }
 0x6bc   : > { %v8661_v29 = vpop.f32.mrf.mxu3 }
 0x6be   : > { %v8663_v49 = vpop.f32.mrf.mxu1 }
 0x6bf   : > { %10803 = vst [vmem:[#allocation98_spill] sm:$0xff] %v8663_v49  ;;  %v8670_v46 = vpop.f32.mrf.mxu2  ;;  %v1505_v49 = vld [vmem:[%s10568_s3 + $0x870] sm:$0xff] }
 0x6c0   : > { %10805 = vst [vmem:[#allocation18_spill] sm:$0xff] %v8670_v46 }
 0x6c1   : > { %2779 = vmatmul.f32.gmra.mxu1 %v1503_v56  ;;  %6033 = vmatmul.msk.f32.gmra.mxu3 %vm3748_vm3, %v3254_v31  ;;  %v1448_v56 = vld [vmem:[%s10568_s3 + $0x6a8] sm:$0xff] }
 0x6c3   : > { %5850 = vmatmul.msk.f32.gmra.mxu2 %vm1685_vm2, %v1446_v48 }
 0x6c4   : > { %v8677_v61 = vpop.f32.mrf.mxu3 }
 0x6c6   : > { %v8679_v24 = vpop.f32.mrf.mxu1 }
 0x6c7   : > { %10806 = vst [vmem:[#allocation99_spill] sm:$0xff] %v8679_v24  ;;  %v8686_v46 = vpop.f32.mrf.mxu2  ;;  %v1507_v24 = vld [vmem:[%s10568_s3 + $0x880] sm:$0xff] }
 0x6c9   : > { %2782 = vmatmul.f32.gmra.mxu1 %v1505_v49  ;;  %6034 = vmatmul.msk.f32.gmra.mxu3 %vm3748_vm3, %v3257_v19  ;;  %v1450_v49 = vld [vmem:[%s10568_s3 + $0x6b8] sm:$0xff] }
 0x6cb   : > { %5851 = vmatmul.msk.f32.gmra.mxu2 %vm1685_vm2, %v1448_v56 }
 0x6cc   : > { %v8693_v31 = vpop.f32.mrf.mxu3 }
 0x6ce   : > { %v8695_v48 = vpop.f32.mrf.mxu1 }
 0x6cf   : > { %10808 = vst [vmem:[#allocation19_spill] sm:$0xff] %v8695_v48  ;;  %v8702_v55 = vpop.f32.mrf.mxu2  ;;  %v1509_v48 = vld [vmem:[%s10568_s3 + $0x890] sm:$0xff] }
 0x6d1   : > { %2785 = vmatmul.f32.gmra.mxu1 %v1507_v24  ;;  %6035 = vmatmul.msk.f32.gmra.mxu3 %vm3748_vm3, %v3260_v30  ;;  %v1452_v24 = vld [vmem:[%s10568_s3 + $0x6c8] sm:$0xff] }
 0x6d3   : > { %5852 = vmatmul.msk.f32.gmra.mxu2 %vm1685_vm2, %v1450_v49 }
 0x6d4   : > { %v8709_v19 = vpop.f32.mrf.mxu3 }
 0x6d6   : > { %v8711_v56 = vpop.f32.mrf.mxu1 }
 0x6d7   : > { %10809 = vst [vmem:[#allocation100_spill] sm:$0xff] %v8711_v56  ;;  %v8718_v2 = vpop.f32.mrf.mxu2  ;;  %v1511_v56 = vld [vmem:[%s10568_s3 + $0x8a0] sm:$0xff] }
 0x6d9   : > { %2788 = vmatmul.f32.gmra.mxu1 %v1509_v48  ;;  %6036 = vmatmul.msk.f32.gmra.mxu3 %vm3748_vm3, %v3263_v54  ;;  %v1454_v48 = vld [vmem:[%s10568_s3 + $0x6d8] sm:$0xff] }
 0x6db   : > { %5853 = vmatmul.msk.f32.gmra.mxu2 %vm1685_vm2, %v1452_v24 }
 0x6dc   : > { %v8725_v30 = vpop.f32.mrf.mxu3 }
 0x6de   : > { %v8727_v49 = vpop.f32.mrf.mxu1 }
 0x6df   : > { %10810 = vst [vmem:[#allocation101_spill] sm:$0xff] %v8727_v49  ;;  %v8734_v11 = vpop.f32.mrf.mxu2  ;;  %v1513_v49 = vld [vmem:[%s10568_s3 + $0x8b0] sm:$0xff] }
 0x6e0   : > { %10811 = vst [vmem:[#allocation102_spill] sm:$0xff] %v8734_v11 }
 0x6e1   : > { %2791 = vmatmul.f32.gmra.mxu1 %v1511_v56  ;;  %6037 = vmatmul.msk.f32.gmra.mxu3 %vm3748_vm3, %v3266_v10  ;;  %v1456_v56 = vld [vmem:[%s10568_s3 + $0x6e8] sm:$0xff]  ;;  %v4009_v10 = vadd.f32 %v8354_v51, %v7981_v63  ;;  %v1458_v63 = vld [vmem:[%s10568_s3 + $0x6f8] sm:$0xff]  ;;  %v4012_v51 = vadd.f32 %v8370_v4, %v7994_v21  ;;  %v4015_v4 = vadd.f32 %v8386_v15, %v8007_v38 }
 0x6e2   : > { %v1460_v21 = vld [vmem:[%s10568_s3 + $0x708] sm:$0xff]  ;;  %v1462_v38 = vld [vmem:[%s10568_s3 + $0x718] sm:$0xff]  ;;  %v4018_v15 = vadd.f32 %v8402_v50, %v8020_v52  ;;  %v4021_v50 = vadd.f32 %v8418_v41, %v8033_v32 }
 0x6e3   : > { %5854 = vmatmul.msk.f32.gmra.mxu2 %vm1685_vm2, %v1454_v48  ;;  %v1464_v52 = vld [vmem:[%s10568_s3 + $0x728] sm:$0xff]  ;;  %v1466_v32 = vld [vmem:[%s10568_s3 + $0x738] sm:$0xff] }
 0x6e4   : > { %v8741_v54 = vpop.f32.mrf.mxu3  ;;  %v6047_v41 = vld [vmem:[%s10569_s4 + $0x18] sm:$0xff] }
 0x6e5   : > { %4369 = vmatpush.msra.mxu3 %v6047_v41 }
 0x6e6   : > { %v8743_v24 = vpop.f32.mrf.mxu1 }
 0x6e7   : > { %10812 = vst [vmem:[#allocation103_spill] sm:$0xff] %v8743_v24  ;;  %v8750_v36 = vpop.f32.mrf.mxu2 }
 0x6e9   : > { %2794 = vmatmul.f32.gmra.mxu1 %v1513_v49  ;;  %6038 = vmatmul.msk.f32.gmra.mxu3 %vm3748_vm3, %v3269_v60 }
 0x6eb   : > { %5855 = vmatmul.msk.f32.gmra.mxu2 %vm1685_vm2, %v1456_v56 }
 0x6ec   : > { %v4177_v48 = vpop.f32.mrf.mxu3 }
 0x6ed   : > { %v8759_v24 = vadd.f32 %v4177_v48, %v4009_v10 }
 0x6ee   : > { %v8761_v11 = vpop.f32.mrf.mxu1 }
 0x6ef   : > { %10813 = vst [vmem:[#allocation104_spill] sm:$0xff] %v8761_v11  ;;  %v8768_v49 = vpop.f32.mrf.mxu2 }
 0x6f1   : > { %2797 = vmatmul.f32.gmra.mxu1 %v1515_v8  ;;  %6039 = vmatmul.msk.f32.gmra.mxu3 %vm3748_vm3, %v3272_v58 }
 0x6f3   : > { %5856 = vmatmul.msk.f32.gmra.mxu2 %vm1685_vm2, %v1458_v63 }
 0x6f4   : > { %v4180_v60 = vpop.f32.mrf.mxu3 }
 0x6f5   : > { %v8777_v56 = vadd.f32 %v4180_v60, %v4012_v51 }
 0x6f6   : > { %v8779_v10 = vpop.f32.mrf.mxu1 }
 0x6f7   : > { %v8786_v48 = vpop.f32.mrf.mxu2 }
 0x6f9   : > { %2800 = vmatmul.f32.gmra.mxu1 %v1517_v39  ;;  %6040 = vmatmul.msk.f32.gmra.mxu3 %vm3748_vm3, %v3275_v16 }
 0x6fb   : > { %5857 = vmatmul.msk.f32.gmra.mxu2 %vm1685_vm2, %v1460_v21 }
 0x6fc   : > { %v4183_v8 = vpop.f32.mrf.mxu3 }
 0x6fd   : > { %v8795_v58 = vadd.f32 %v4183_v8, %v4015_v4 }
 0x6fe   : > { %v8797_v63 = vpop.f32.mrf.mxu1 }
 0x6ff   : > { %v8804_v51 = vpop.f32.mrf.mxu2 }
 0x701   : > { %2803 = vmatmul.f32.gmra.mxu1 %v1519_v26  ;;  %6041 = vmatmul.msk.f32.gmra.mxu3 %vm3748_vm3, %v3278_v25 }
 0x703   : > { %5858 = vmatmul.msk.f32.gmra.mxu2 %vm1685_vm2, %v1462_v38  ;;  %v4024_v38 = vadd.f32 %v8437_v1, %v8049_v13  ;;  %v1468_v13 = vld [vmem:[%s10568_s3 + $0x748] sm:$0xff]  ;;  %v4027_v1 = vadd.f32 %v8453_v57, %v8062_v28  ;;  %v1470_v28 = vld [vmem:[%s10568_s3 + $0x758] sm:$0xff] }
 0x704   : > { %v4186_v60 = vpop.f32.mrf.mxu3  ;;  %v10815_v57 = vld [vmem:[#allocation52_spill] sm:$0xff] }
 0x705   : > { %v8813_v39 = vadd.f32 %v4186_v60, %v4018_v15  ;;  %v1525_v60 = vld [vmem:[%s10568_s3 + $0x910] sm:$0xff] }
 0x706   : > { %v8815_v16 = vpop.f32.mrf.mxu1 }
 0x707   : > { %v8822_v21 = vpop.f32.mrf.mxu2 }
 0x709   : > { %2806 = vmatmul.f32.gmra.mxu1 %v1521_v6  ;;  %6042 = vmatmul.msk.f32.gmra.mxu3 %vm3748_vm3, %v3281_v12  ;;  %v3287_v6 = vadd.f32 %v8411_v5, %v7957_v27  ;;  %v1527_v27 = vld [vmem:[%s10568_s3 + $0x920] sm:$0xff] }
 0x70a   : > { %v10814_v5 = vld [vmem:[#allocation29_spill] sm:$0xff] }
 0x70b   : > { %5859 = vmatmul.msk.f32.gmra.mxu2 %vm1685_vm2, %v1464_v52 }
 0x70c   : > { %v4189_v4 = vpop.f32.mrf.mxu3 }
 0x70d   : > { %v8831_v8 = vadd.f32 %v4189_v4, %v4021_v50 }
 0x70e   : > { %v8833_v26 = vpop.f32.mrf.mxu1 }
 0x70f   : > { %v8840_v25 = vpop.f32.mrf.mxu2 }
 0x711   : > { %2809 = vmatmul.f32.gmra.mxu1 %v1523_v9  ;;  %6043 = vmatmul.msk.f32.gmra.mxu3 %vm3748_vm3, %v3284_v3  ;;  %v3290_v9 = vadd.f32 %v8427_v37, %v10814_v5  ;;  %v1529_v37 = vld [vmem:[%s10568_s3 + $0x930] sm:$0xff] }
 0x713   : > { %5860 = vmatmul.msk.f32.gmra.mxu2 %vm1685_vm2, %v1466_v32  ;;  %v4030_v32 = vadd.f32 %v8469_v7, %v10815_v57  ;;  %v1472_v7 = vld [vmem:[%s10568_s3 + $0x768] sm:$0xff] }
 0x714   : > { %v4192_v14 = vpop.f32.mrf.mxu3 }
 0x715   : > { %v8852_v47 = vadd.f32 %v4192_v14, %v4024_v38 }
 0x716   : > { %v8854_v15 = vpop.f32.mrf.mxu1 }
 0x717   : > { %v8861_v12 = vpop.f32.mrf.mxu2 }
 0x719   : > { %2812 = vmatmul.f32.gmra.mxu1 %v1525_v60  ;;  %6044 = vmatmul.msk.f32.gmra.mxu3 %vm3748_vm3, %v3287_v6  ;;  %v10816_v60 = vld [vmem:[#allocation16_spill] sm:$0xff] }
 0x71a   : > { %v3293_v6 = vadd.f32 %v8446_v35, %v10816_v60  ;;  %v1531_v35 = vld [vmem:[%s10568_s3 + $0x940] sm:$0xff] }
 0x71b   : > { %5861 = vmatmul.msk.f32.gmra.mxu2 %vm1685_vm2, %v1468_v13 }
 0x71c   : > { %v4195_v52 = vpop.f32.mrf.mxu3 }
 0x71d   : > { %v8870_v50 = vadd.f32 %v4195_v52, %v4027_v1  ;;  %v10817_v1 = vld [vmem:[#allocation54_spill] sm:$0xff] }
 0x71e   : > { %v8872_v4 = vpop.f32.mrf.mxu1  ;;  %v4033_v52 = vadd.f32 %v8485_v17, %v10817_v1  ;;  %v1474_v17 = vld [vmem:[%s10568_s3 + $0x778] sm:$0xff] }
 0x71f   : > { %v8879_v3 = vpop.f32.mrf.mxu2 }
 0x721   : > { %2815 = vmatmul.f32.gmra.mxu1 %v1527_v27  ;;  %6045 = vmatmul.msk.f32.gmra.mxu3 %vm3748_vm3, %v3290_v9 }
 0x723   : > { %5862 = vmatmul.msk.f32.gmra.mxu2 %vm1685_vm2, %v1470_v28  ;;  %v10818_v28 = vld [vmem:[#allocation28_spill] sm:$0xff] }
 0x724   : > { %v4198_v41 = vpop.f32.mrf.mxu3  ;;  %v3296_v57 = vadd.f32 %v8462_v18, %v10818_v28  ;;  %v1533_v18 = vld [vmem:[%s10568_s3 + $0x950] sm:$0xff] }
 0x725   : > { %v8888_v38 = vadd.f32 %v4198_v41, %v4030_v32  ;;  %v4036_v41 = vadd.f32 %v8501_v62, %v8107_v53  ;;  %v1476_v53 = vld [vmem:[%s10568_s3 + $0x788] sm:$0xff] }
 0x726   : > { %v8890_v14 = vpop.f32.mrf.mxu1  ;;  %v10820_v62 = vld [vmem:[#allocation57_spill] sm:$0xff] }
 0x727   : > { %v8897_v13 = vpop.f32.mrf.mxu2 }
 0x729   : > { %2818 = vmatmul.f32.gmra.mxu1 %v1529_v37  ;;  %6046 = vmatmul.msk.f32.gmra.mxu3 %vm3748_vm3, %v3293_v6 }
 0x72b   : > { %5863 = vmatmul.msk.f32.gmra.mxu2 %vm1685_vm2, %v1472_v7  ;;  %v10819_v7 = vld [vmem:[#allocation6_spill] sm:$0xff] }
 0x72c   : > { %v4201_v27 = vpop.f32.mrf.mxu3  ;;  %v3299_v1 = vadd.f32 %v8478_v42, %v10819_v7  ;;  %v1535_v42 = vld [vmem:[%s10568_s3 + $0x960] sm:$0xff] }
 0x72d   : > { %v8906_v5 = vadd.f32 %v4201_v27, %v4033_v52  ;;  %v4039_v27 = vadd.f32 %v8517_v45, %v10820_v62  ;;  %v1478_v45 = vld [vmem:[%s10568_s3 + $0x798] sm:$0xff] }
 0x72e   : > { %v8908_v9 = vpop.f32.mrf.mxu1 }
 0x72f   : > { %v8915_v32 = vpop.f32.mrf.mxu2 }
 0x731   : > { %2821 = vmatmul.f32.gmra.mxu1 %v1531_v35  ;;  %6048 = vmatmul.msk.f32.vlgmr.msra.gmra.mxu3 %vm3748_vm3, %v3296_v57 }
 0x733   : > { %5864 = vmatmul.msk.f32.gmra.mxu2 %vm1685_vm2, %v1474_v17  ;;  %v10822_v17 = vld [vmem:[#allocation48_spill] sm:$0xff] }
 0x734   : > { %v4204_v37 = vpop.f32.mrf.mxu3 }
 0x735   : > { %v8924_v60 = vadd.f32 %v4204_v37, %v4036_v41  ;;  %v3302_v41 = vadd.f32 %v8494_v59, %v10822_v17  ;;  %v1537_v59 = vld [vmem:[%s10568_s3 + $0x970] sm:$0xff]  ;;  %v10826_v17 = vld [vmem:[#allocation61_spill] sm:$0xff] }
 0x736   : > { %v8926_v6 = vpop.f32.mrf.mxu1 }
 0x737   : > { %v8933_v52 = vpop.f32.mrf.mxu2 }
 0x739   : > { %2824 = vmatmul.f32.gmra.mxu1 %v1533_v18  ;;  %6049 = vmatmul.msk.f32.gmra.mxu3 %vm3748_vm3, %v3299_v1  ;;  %v10823_v18 = vld [vmem:[#allocation59_spill] sm:$0xff] }
 0x73a   : > { %v4042_v7 = vadd.f32 %v8533_v23, %v10823_v18  ;;  %v1480_v23 = vld [vmem:[%s10568_s3 + $0x7a8] sm:$0xff] }
 0x73b   : > { %5865 = vmatmul.msk.f32.gmra.mxu2 %vm1685_vm2, %v1476_v53 }
 0x73c   : > { %v4207_v35 = vpop.f32.mrf.mxu3 }
 0x73d   : > { %v8942_v28 = vadd.f32 %v4207_v35, %v4039_v27  ;;  %v10825_v27 = vld [vmem:[#allocation49_spill] sm:$0xff] }
 0x73e   : > { %v8944_v57 = vpop.f32.mrf.mxu1  ;;  %v3305_v35 = vadd.f32 %v8510_v33, %v10825_v27  ;;  %v1539_v33 = vld [vmem:[%s10568_s3 + $0x980] sm:$0xff] }
 0x73f   : > { %10821 = vst [vmem:[#allocation29_spill] sm:$0xff] %v8944_v57  ;;  %v8951_v37 = vpop.f32.mrf.mxu2  ;;  %v10829_v27 = vld [vmem:[#allocation45_spill] sm:$0xff] }
 0x741   : > { %2827 = vmatmul.f32.gmra.mxu1 %v1535_v42  ;;  %6050 = vmatmul.msk.f32.gmra.mxu3 %vm3748_vm3, %v3302_v41  ;;  %v4045_v41 = vadd.f32 %v8549_v0, %v10826_v17  ;;  %v1482_v0 = vld [vmem:[%s10568_s3 + $0x7b8] sm:$0xff] }
 0x743   : > { %5866 = vmatmul.msk.f32.gmra.mxu2 %vm1685_vm2, %v1478_v45 }
 0x744   : > { %v4210_v1 = vpop.f32.mrf.mxu3 }
 0x745   : > { %v8960_v53 = vadd.f32 %v4210_v1, %v4042_v7  ;;  %v10828_v1 = vld [vmem:[#allocation50_spill] sm:$0xff] }
 0x746   : > { %v8962_v62 = vpop.f32.mrf.mxu1  ;;  %v3308_v11 = vadd.f32 %v10829_v27, %v10828_v1  ;;  %v1541_v1 = vld [vmem:[%s10568_s3 + $0x990] sm:$0xff] }
 0x747   : > { %10824 = vst [vmem:[#allocation52_spill] sm:$0xff] %v8962_v62  ;;  %v8969_v42 = vpop.f32.mrf.mxu2  ;;  %v10832_v27 = vld [vmem:[#allocation51_spill] sm:$0xff] }
 0x749   : > { %2830 = vmatmul.f32.gmra.mxu1 %v1537_v59  ;;  %6051 = vmatmul.msk.f32.gmra.mxu3 %vm3748_vm3, %v3305_v35  ;;  %v10830_v35 = vld [vmem:[#allocation63_spill] sm:$0xff] }
 0x74b   : > { %5867 = vmatmul.msk.f32.gmra.mxu2 %vm1685_vm2, %v1480_v23  ;;  %v4048_v23 = vadd.f32 %v8565_v34, %v10830_v35  ;;  %v1484_v34 = vld [vmem:[%s10568_s3 + $0x7c8] sm:$0xff] }
 0x74c   : > { %v4213_v45 = vpop.f32.mrf.mxu3 }
 0x74d   : > { %v8978_v18 = vadd.f32 %v4213_v45, %v4045_v41 }
 0x74e   : > { %v8980_v7 = vpop.f32.mrf.mxu1 }
 0x74f   : > { %10827 = vst [vmem:[#allocation16_spill] sm:$0xff] %v8980_v7  ;;  %v8987_v59 = vpop.f32.mrf.mxu2  ;;  %v10833_v7 = vld [vmem:[#allocation47_spill] sm:$0xff] }
 0x750   : > { %v3311_v62 = vadd.f32 %v10833_v7, %v10832_v27  ;;  %v1543_v7 = vld [vmem:[%s10568_s3 + $0x9a0] sm:$0xff] }
 0x751   : > { %2833 = vmatmul.f32.gmra.mxu1 %v1539_v33  ;;  %6052 = vmatmul.msk.f32.gmra.mxu3 %vm3748_vm3, %v3308_v11  ;;  %v10834_v11 = vld [vmem:[#allocation65_spill] sm:$0xff] }
 0x752   : > { %v10836_v27 = vld [vmem:[#allocation53_spill] sm:$0xff] }
 0x753   : > { %5868 = vmatmul.msk.f32.gmra.mxu2 %vm1685_vm2, %v1482_v0  ;;  %v4051_v0 = vadd.f32 %v8581_v22, %v10834_v11  ;;  %v1486_v22 = vld [vmem:[%s10568_s3 + $0x7d8] sm:$0xff] }
 0x754   : > { %v4216_v17 = vpop.f32.mrf.mxu3 }
 0x755   : > { %v8996_v41 = vadd.f32 %v4216_v17, %v4048_v23 }
 0x756   : > { %v8998_v45 = vpop.f32.mrf.mxu1 }
 0x757   : > { %10831 = vst [vmem:[#allocation54_spill] sm:$0xff] %v8998_v45  ;;  %v9005_v33 = vpop.f32.mrf.mxu2  ;;  %v10837_v45 = vld [vmem:[#allocation46_spill] sm:$0xff] }
 0x758   : > { %v3314_v57 = vadd.f32 %v10837_v45, %v10836_v27  ;;  %v1545_v45 = vld [vmem:[%s10568_s3 + $0x9b0] sm:$0xff] }
 0x759   : > { %2836 = vmatmul.f32.gmra.mxu1 %v1541_v1  ;;  %6053 = vmatmul.msk.f32.gmra.mxu3 %vm3748_vm3, %v3311_v62  ;;  %v10839_v62 = vld [vmem:[#allocation67_spill] sm:$0xff] }
 0x75a   : > { %v10841_v27 = vld [vmem:[#allocation55_spill] sm:$0xff] }
 0x75b   : > { %5869 = vmatmul.msk.f32.gmra.mxu2 %vm1685_vm2, %v1484_v34  ;;  %v4054_v34 = vadd.f32 %v8597_v43, %v10839_v62  ;;  %v1488_v43 = vld [vmem:[%s10568_s3 + $0x7e8] sm:$0xff] }
 0x75c   : > { %v4219_v35 = vpop.f32.mrf.mxu3 }
 0x75d   : > { %v9014_v23 = vadd.f32 %v4219_v35, %v4051_v0 }
 0x75e   : > { %v9016_v17 = vpop.f32.mrf.mxu1 }
 0x75f   : > { %10835 = vst [vmem:[#allocation28_spill] sm:$0xff] %v9016_v17  ;;  %v9023_v1 = vpop.f32.mrf.mxu2  ;;  %v10842_v17 = vld [vmem:[#allocation10_spill] sm:$0xff] }
 0x760   : > { %10838 = vst [vmem:[#allocation6_spill] sm:$0xff] %v9023_v1  ;;  %v3317_v1 = vadd.f32 %v10842_v17, %v10841_v27  ;;  %v1547_v17 = vld [vmem:[%s10568_s3 + $0x9c0] sm:$0xff] }
 0x761   : > { %2839 = vmatmul.f32.gmra.mxu1 %v1543_v7  ;;  %6054 = vmatmul.msk.f32.gmra.mxu3 %vm3748_vm3, %v3314_v57  ;;  %v10844_v57 = vld [vmem:[#allocation69_spill] sm:$0xff]  ;;  %v10846_v27 = vld [vmem:[#allocation56_spill] sm:$0xff] }
 0x763   : > { %5870 = vmatmul.msk.f32.gmra.mxu2 %vm1685_vm2, %v1486_v22  ;;  %v4057_v22 = vadd.f32 %v8613_v44, %v10844_v57  ;;  %v1490_v44 = vld [vmem:[%s10568_s3 + $0x7f8] sm:$0xff] }
 0x764   : > { %v4222_v11 = vpop.f32.mrf.mxu3 }
 0x765   : > { %v9032_v0 = vadd.f32 %v4222_v11, %v4054_v34 }
 0x766   : > { %v9034_v35 = vpop.f32.mrf.mxu1 }
 0x767   : > { %10840 = vst [vmem:[#allocation57_spill] sm:$0xff] %v9034_v35  ;;  %v9041_v7 = vpop.f32.mrf.mxu2  ;;  %v10847_v35 = vld [vmem:[#allocation12_spill] sm:$0xff] }
 0x768   : > { %10843 = vst [vmem:[#allocation48_spill] sm:$0xff] %v9041_v7  ;;  %v3320_v7 = vadd.f32 %v10847_v35, %v10846_v27  ;;  %v1549_v35 = vld [vmem:[%s10568_s3 + $0x9d0] sm:$0xff] }
 0x769   : > { %2842 = vmatmul.f32.gmra.mxu1 %v1545_v45  ;;  %6055 = vmatmul.msk.f32.gmra.mxu3 %vm3748_vm3, %v3317_v1  ;;  %v10849_v1 = vld [vmem:[#allocation71_spill] sm:$0xff]  ;;  %v10851_v27 = vld [vmem:[#allocation58_spill] sm:$0xff] }
 0x76b   : > { %5871 = vmatmul.msk.f32.gmra.mxu2 %vm1685_vm2, %v1488_v43  ;;  %v4060_v43 = vadd.f32 %v8629_v20, %v10849_v1  ;;  %v1492_v20 = vld [vmem:[%s10568_s3 + $0x808] sm:$0xff] }
 0x76c   : > { %v4225_v62 = vpop.f32.mrf.mxu3 }
 0x76d   : > { %v9050_v34 = vadd.f32 %v4225_v62, %v4057_v22 }
 0x76e   : > { %v9052_v11 = vpop.f32.mrf.mxu1 }
 0x76f   : > { %10845 = vst [vmem:[#allocation59_spill] sm:$0xff] %v9052_v11  ;;  %v9059_v45 = vpop.f32.mrf.mxu2  ;;  %v10852_v11 = vld [vmem:[#allocation14_spill] sm:$0xff] }
 0x770   : > { %10848 = vst [vmem:[#allocation49_spill] sm:$0xff] %v9059_v45  ;;  %v3323_v45 = vadd.f32 %v10852_v11, %v10851_v27  ;;  %v1551_v11 = vld [vmem:[%s10568_s3 + $0x9e0] sm:$0xff] }
 0x771   : > { %2845 = vmatmul.f32.gmra.mxu1 %v1547_v17  ;;  %6056 = vmatmul.msk.f32.gmra.mxu3 %vm3748_vm3, %v3320_v7  ;;  %v10854_v7 = vld [vmem:[#allocation73_spill] sm:$0xff]  ;;  %v10856_v27 = vld [vmem:[#allocation60_spill] sm:$0xff] }
 0x773   : > { %5872 = vmatmul.msk.f32.gmra.mxu2 %vm1685_vm2, %v1490_v44  ;;  %v4063_v44 = vadd.f32 %v8645_v40, %v10854_v7  ;;  %v1494_v40 = vld [vmem:[%s10568_s3 + $0x818] sm:$0xff] }
 0x774   : > { %v4228_v57 = vpop.f32.mrf.mxu3 }
 0x775   : > { %v9068_v22 = vadd.f32 %v4228_v57, %v4060_v43 }
 0x776   : > { %v9070_v62 = vpop.f32.mrf.mxu1 }
 0x777   : > { %10850 = vst [vmem:[#allocation61_spill] sm:$0xff] %v9070_v62  ;;  %v9077_v17 = vpop.f32.mrf.mxu2  ;;  %v10857_v62 = vld [vmem:[#allocation8_spill] sm:$0xff] }
 0x778   : > { %10853 = vst [vmem:[#allocation50_spill] sm:$0xff] %v9077_v17  ;;  %v3326_v17 = vadd.f32 %v10857_v62, %v10856_v27  ;;  %v1553_v62 = vld [vmem:[%s10568_s3 + $0x9f0] sm:$0xff] }
 0x779   : > { %2848 = vmatmul.f32.gmra.mxu1 %v1549_v35  ;;  %6057 = vmatmul.msk.f32.gmra.mxu3 %vm3748_vm3, %v3323_v45  ;;  %v10859_v45 = vld [vmem:[#allocation75_spill] sm:$0xff]  ;;  %v10861_v27 = vld [vmem:[#allocation62_spill] sm:$0xff] }
 0x77b   : > { %5873 = vmatmul.msk.f32.gmra.mxu2 %vm1685_vm2, %v1492_v20  ;;  %v4066_v20 = vadd.f32 %v8661_v29, %v10859_v45  ;;  %v1496_v29 = vld [vmem:[%s10568_s3 + $0x828] sm:$0xff] }
 0x77c   : > { %v4231_v1 = vpop.f32.mrf.mxu3 }
 0x77d   : > { %v9086_v43 = vadd.f32 %v4231_v1, %v4063_v44 }
 0x77e   : > { %v9088_v57 = vpop.f32.mrf.mxu1 }
 0x77f   : > { %10855 = vst [vmem:[#allocation45_spill] sm:$0xff] %v9088_v57  ;;  %v9095_v35 = vpop.f32.mrf.mxu2  ;;  %v10862_v57 = vld [vmem:[#allocation9_spill] sm:$0xff] }
 0x780   : > { %10858 = vst [vmem:[#allocation63_spill] sm:$0xff] %v9095_v35  ;;  %v3329_v35 = vadd.f32 %v10862_v57, %v10861_v27  ;;  %v1555_v57 = vld [vmem:[%s10568_s3 + $0xa00] sm:$0xff] }
 0x781   : > { %2851 = vmatmul.f32.gmra.mxu1 %v1551_v11  ;;  %6058 = vmatmul.msk.f32.gmra.mxu3 %vm3748_vm3, %v3326_v17  ;;  %v10864_v17 = vld [vmem:[#allocation77_spill] sm:$0xff]  ;;  %v10866_v27 = vld [vmem:[#allocation64_spill] sm:$0xff] }
 0x783   : > { %5874 = vmatmul.msk.f32.gmra.mxu2 %vm1685_vm2, %v1494_v40  ;;  %v4069_v40 = vadd.f32 %v8677_v61, %v10864_v17  ;;  %v1498_v61 = vld [vmem:[%s10568_s3 + $0x838] sm:$0xff] }
 0x784   : > { %v4234_v7 = vpop.f32.mrf.mxu3 }
 0x785   : > { %v9104_v44 = vadd.f32 %v4234_v7, %v4066_v20 }
 0x786   : > { %v9106_v1 = vpop.f32.mrf.mxu1 }
 0x787   : > { %10860 = vst [vmem:[#allocation51_spill] sm:$0xff] %v9106_v1  ;;  %v9113_v11 = vpop.f32.mrf.mxu2  ;;  %v10867_v1 = vld [vmem:[#allocation35_spill] sm:$0xff] }
 0x788   : > { %10863 = vst [vmem:[#allocation47_spill] sm:$0xff] %v9113_v11  ;;  %v3332_v11 = vadd.f32 %v10867_v1, %v10866_v27  ;;  %v1557_v1 = vld [vmem:[%s10568_s3 + $0xa10] sm:$0xff] }
 0x789   : > { %2854 = vmatmul.f32.gmra.mxu1 %v1553_v62  ;;  %6059 = vmatmul.msk.f32.gmra.mxu3 %vm3748_vm3, %v3329_v35  ;;  %v10869_v35 = vld [vmem:[#allocation79_spill] sm:$0xff]  ;;  %v10871_v27 = vld [vmem:[#allocation66_spill] sm:$0xff] }
 0x78b   : > { %5875 = vmatmul.msk.f32.gmra.mxu2 %vm1685_vm2, %v1496_v29  ;;  %v4072_v29 = vadd.f32 %v8693_v31, %v10869_v35  ;;  %v1500_v31 = vld [vmem:[%s10568_s3 + $0x848] sm:$0xff] }
 0x78c   : > { %v4237_v45 = vpop.f32.mrf.mxu3 }
 0x78d   : > { %v9122_v20 = vadd.f32 %v4237_v45, %v4069_v40 }
 0x78e   : > { %v9124_v7 = vpop.f32.mrf.mxu1 }
 0x78f   : > { %10865 = vst [vmem:[#allocation65_spill] sm:$0xff] %v9124_v7  ;;  %v9131_v62 = vpop.f32.mrf.mxu2  ;;  %v10872_v7 = vld [vmem:[#allocation18_spill] sm:$0xff] }
 0x790   : > { %10868 = vst [vmem:[#allocation53_spill] sm:$0xff] %v9131_v62  ;;  %v3335_v62 = vadd.f32 %v10872_v7, %v10871_v27  ;;  %v1559_v7 = vld [vmem:[%s10568_s3 + $0xa20] sm:$0xff] }
 0x791   : > { %2857 = vmatmul.f32.gmra.mxu1 %v1555_v57  ;;  %6060 = vmatmul.msk.f32.gmra.mxu3 %vm3748_vm3, %v3332_v11  ;;  %v10873_v11 = vld [vmem:[#allocation81_spill] sm:$0xff]  ;;  %v10875_v27 = vld [vmem:[#allocation68_spill] sm:$0xff] }
 0x793   : > { %5876 = vmatmul.msk.f32.gmra.mxu2 %vm1685_vm2, %v1498_v61  ;;  %v4075_v61 = vadd.f32 %v8709_v19, %v10873_v11  ;;  %v1502_v19 = vld [vmem:[%s10568_s3 + $0x858] sm:$0xff] }
 0x794   : > { %v4240_v17 = vpop.f32.mrf.mxu3 }
 0x795   : > { %v9140_v40 = vadd.f32 %v4240_v17, %v4072_v29 }
 0x796   : > { %v9142_v45 = vpop.f32.mrf.mxu1 }
 0x797   : > { %10870 = vst [vmem:[#allocation46_spill] sm:$0xff] %v9142_v45  ;;  %v9149_v57 = vpop.f32.mrf.mxu2  ;;  %v3338_v45 = vadd.f32 %v8686_v46, %v10875_v27  ;;  %v1561_v46 = vld [vmem:[%s10568_s3 + $0xa30] sm:$0xff] }
 0x798   : > { %v10878_v27 = vld [vmem:[#allocation70_spill] sm:$0xff] }
 0x799   : > { %2860 = vmatmul.f32.gmra.mxu1 %v1557_v1  ;;  %6061 = vmatmul.msk.f32.gmra.mxu3 %vm3748_vm3, %v3335_v62  ;;  %v10876_v62 = vld [vmem:[#allocation83_spill] sm:$0xff] }
 0x79b   : > { %5877 = vmatmul.msk.f32.gmra.mxu2 %vm1685_vm2, %v1500_v31  ;;  %v4078_v31 = vadd.f32 %v8725_v30, %v10876_v62  ;;  %v1504_v30 = vld [vmem:[%s10568_s3 + $0x868] sm:$0xff] }
 0x79c   : > { %v4243_v35 = vpop.f32.mrf.mxu3 }
 0x79d   : > { %v9158_v29 = vadd.f32 %v4243_v35, %v4075_v61 }
 0x79e   : > { %v9160_v17 = vpop.f32.mrf.mxu1 }
 0x79f   : > { %10874 = vst [vmem:[#allocation67_spill] sm:$0xff] %v9160_v17  ;;  %v9167_v1 = vpop.f32.mrf.mxu2  ;;  %v3341_v17 = vadd.f32 %v8702_v55, %v10878_v27  ;;  %v1563_v55 = vld [vmem:[%s10568_s3 + $0xa40] sm:$0xff] }
 0x7a0   : > { %v10881_v27 = vld [vmem:[#allocation72_spill] sm:$0xff] }
 0x7a1   : > { %2863 = vmatmul.f32.gmra.mxu1 %v1559_v7  ;;  %6062 = vmatmul.msk.f32.gmra.mxu3 %vm3748_vm3, %v3338_v45  ;;  %v10879_v45 = vld [vmem:[#allocation85_spill] sm:$0xff] }
 0x7a3   : > { %5878 = vmatmul.msk.f32.gmra.mxu2 %vm1685_vm2, %v1502_v19  ;;  %v4081_v19 = vadd.f32 %v8741_v54, %v10879_v45  ;;  %v1506_v54 = vld [vmem:[%s10568_s3 + $0x878] sm:$0xff] }
 0x7a4   : > { %v4246_v11 = vpop.f32.mrf.mxu3 }
 0x7a5   : > { %v9176_v61 = vadd.f32 %v4246_v11, %v4078_v31 }
 0x7a6   : > { %v9178_v35 = vpop.f32.mrf.mxu1 }
 0x7a7   : > { %10877 = vst [vmem:[#allocation55_spill] sm:$0xff] %v9178_v35  ;;  %v9185_v7 = vpop.f32.mrf.mxu2  ;;  %v3344_v35 = vadd.f32 %v8718_v2, %v10881_v27  ;;  %v1565_v2 = vld [vmem:[%s10568_s3 + $0xa50] sm:$0xff] }
 0x7a9   : > { %2866 = vmatmul.f32.gmra.mxu1 %v1561_v46  ;;  %6063 = vmatmul.msk.f32.gmra.mxu3 %vm3748_vm3, %v3341_v17 }
 0x7ab   : > { %5879 = vmatmul.msk.f32.gmra.mxu2 %vm1685_vm2, %v1504_v30 }
 0x7ac   : > { %v4249_v62 = vpop.f32.mrf.mxu3 }
 0x7ad   : > { %v9194_v31 = vadd.f32 %v4249_v62, %v4081_v19  ;;  %v10883_v19 = vld [vmem:[#allocation74_spill] sm:$0xff] }
 0x7ae   : > { %v9196_v11 = vpop.f32.mrf.mxu1  ;;  %v10884_v62 = vld [vmem:[#allocation102_spill] sm:$0xff] }
 0x7af   : > { %10880 = vst [vmem:[#allocation10_spill] sm:$0xff] %v9196_v11  ;;  %v9203_v46 = vpop.f32.mrf.mxu2  ;;  %v3347_v27 = vadd.f32 %v10884_v62, %v10883_v19  ;;  %v10886_v19 = vld [vmem:[#allocation76_spill] sm:$0xff] }
 0x7b0   : > { %v3350_v62 = vadd.f32 %v8750_v36, %v10886_v19  ;;  %v1569_v36 = vld [vmem:[%s10568_s3 + $0xa70] sm:$0xff] }
 0x7b1   : > { %2869 = vmatmul.f32.gmra.mxu1 %v1563_v55  ;;  %6064 = vmatmul.msk.f32.gmra.mxu3 %vm3748_vm3, %v3344_v35  ;;  %v1508_v35 = vld [vmem:[%s10568_s3 + $0x888] sm:$0xff] }
 0x7b3   : > { %5880 = vmatmul.msk.f32.gmra.mxu2 %vm1685_vm2, %v1506_v54 }
 0x7b4   : > { %v4371_v17 = vpop.f32.mrf.mxu3 }
 0x7b5   : > { %v9211_v30 = vadd.f32 %v4371_v17, %v8759_v24  ;;  %v1567_v17 = vld [vmem:[%s10568_s3 + $0xa60] sm:$0xff] }
 0x7b6   : > { %v9213_v45 = vpop.f32.mrf.mxu1 }
 0x7b7   : > { %10882 = vst [vmem:[#allocation69_spill] sm:$0xff] %v9213_v45  ;;  %v9220_v11 = vpop.f32.mrf.mxu2 }
 0x7b9   : > { %2872 = vmatmul.f32.gmra.mxu1 %v1565_v2  ;;  %6065 = vmatmul.msk.f32.gmra.mxu3 %vm3748_vm3, %v3347_v27  ;;  %v1510_v2 = vld [vmem:[%s10568_s3 + $0x898] sm:$0xff] }
 0x7bb   : > { %5881 = vmatmul.msk.f32.gmra.mxu2 %vm1685_vm2, %v1508_v35 }
 0x7bc   : > { %v4374_v24 = vpop.f32.mrf.mxu3 }
 0x7bd   : > { %v9228_v55 = vadd.f32 %v4374_v24, %v8777_v56  ;;  %v10888_v24 = vld [vmem:[#allocation78_spill] sm:$0xff] }
 0x7be   : > { %v9230_v54 = vpop.f32.mrf.mxu1  ;;  %v3353_v19 = vadd.f32 %v8768_v49, %v10888_v24  ;;  %v10891_v24 = vld [vmem:[#allocation80_spill] sm:$0xff] }
 0x7bf   : > { %10885 = vst [vmem:[#allocation56_spill] sm:$0xff] %v9230_v54  ;;  %v9237_v45 = vpop.f32.mrf.mxu2 }
 0x7c1   : > { %2875 = vmatmul.f32.gmra.mxu1 %v1567_v17  ;;  %6066 = vmatmul.msk.f32.gmra.mxu3 %vm3748_vm3, %v3350_v62  ;;  %v1512_v17 = vld [vmem:[%s10568_s3 + $0x8a8] sm:$0xff] }
 0x7c3   : > { %5882 = vmatmul.msk.f32.gmra.mxu2 %vm1685_vm2, %v1510_v2 }
 0x7c4   : > { %v4377_v56 = vpop.f32.mrf.mxu3 }
 0x7c5   : > { %v9245_v27 = vadd.f32 %v4377_v56, %v8795_v58  ;;  %v6099_v58 = vld [vmem:[%s10569_s4 + $0x28] sm:$0xff]  ;;  %v1571_v56 = vld [vmem:[%s10568_s3 + $0xa80] sm:$0xff] }
 0x7c6   : > { %v9247_v35 = vpop.f32.mrf.mxu1  ;;  %4757 = vmatpush.msrb.mxu0 %v6099_v58  ;;  %v10893_v58 = vld [vmem:[#allocation82_spill] sm:$0xff] }
 0x7c7   : > { %10887 = vst [vmem:[#allocation12_spill] sm:$0xff] %v9247_v35  ;;  %v9254_v54 = vpop.f32.mrf.mxu2  ;;  %v3356_v35 = vadd.f32 %v8786_v48, %v10891_v24  ;;  %v1573_v48 = vld [vmem:[%s10568_s3 + $0xa90] sm:$0xff] }
 0x7c8   : > { %10889 = vst [vmem:[#allocation71_spill] sm:$0xff] %v9254_v54 }
 0x7c9   : > { %2878 = vmatmul.f32.gmra.mxu1 %v1569_v36  ;;  %6067 = vmatmul.msk.f32.gmra.mxu3 %vm3748_vm3, %v3353_v19  ;;  %v1514_v36 = vld [vmem:[%s10568_s3 + $0x8b8] sm:$0xff] }
 0x7cb   : > { %5883 = vmatmul.msk.f32.gmra.mxu2 %vm1685_vm2, %v1512_v17 }
 0x7cc   : > { %v4380_v62 = vpop.f32.mrf.mxu3 }
 0x7cd   : > { %v9265_v2 = vadd.f32 %v4380_v62, %v8813_v39  ;;  %v3359_v62 = vadd.f32 %v8804_v51, %v10893_v58  ;;  %v10894_v58 = vld [vmem:[#allocation84_spill] sm:$0xff] }
 0x7ce   : > { %v9267_v49 = vpop.f32.mrf.mxu1 }
 0x7cf   : > { %10890 = vst [vmem:[#allocation58_spill] sm:$0xff] %v9267_v49  ;;  %v9274_v54 = vpop.f32.mrf.mxu2 }
 0x7d1   : > { %2881 = vmatmul.f32.gmra.mxu1 %v1571_v56  ;;  %6068 = vmatmul.msk.f32.gmra.mxu3 %vm3748_vm3, %v3356_v35  ;;  %v1516_v35 = vld [vmem:[%s10568_s3 + $0x8c8] sm:$0xff] }
 0x7d3   : > { %5884 = vmatmul.msk.f32.gmra.mxu2 %vm1685_vm2, %v1514_v36 }
 0x7d4   : > { %v4383_v39 = vpop.f32.mrf.mxu3 }
 0x7d5   : > { %v9282_v19 = vadd.f32 %v4383_v39, %v8831_v8  ;;  %v6073_v8 = vld [vmem:[%s10569_s4 + $0x20] sm:$0xff] }
 0x7d6   : > { %v9284_v17 = vpop.f32.mrf.mxu1  ;;  %4563 = vmatpush.msrb.mxu3 %v6073_v8  ;;  %v1575_v39 = vld [vmem:[%s10568_s3 + $0xaa0] sm:$0xff]  ;;  %v10895_v8 = vld [vmem:[#allocation86_spill] sm:$0xff] }
 0x7d7   : > { %10892 = vst [vmem:[#allocation14_spill] sm:$0xff] %v9284_v17  ;;  %v9291_v24 = vpop.f32.mrf.mxu2  ;;  %v3362_v17 = vadd.f32 %v8822_v21, %v10894_v58  ;;  %v1577_v21 = vld [vmem:[%s10568_s3 + $0xab0] sm:$0xff] }
 0x7d9   : > { %2884 = vmatmul.f32.gmra.mxu1 %v1573_v48  ;;  %6069 = vmatmul.msk.f32.gmra.mxu3 %vm3748_vm3, %v3359_v62  ;;  %v1518_v48 = vld [vmem:[%s10568_s3 + $0x8d8] sm:$0xff] }
 0x7db   : > { %5885 = vmatmul.msk.f32.gmra.mxu2 %vm1685_vm2, %v1516_v35 }
 0x7dc   : > { %v4386_v56 = vpop.f32.mrf.mxu3 }
 0x7dd   : > { %v9302_v36 = vadd.f32 %v4386_v56, %v8852_v47  ;;  %v3365_v56 = vadd.f32 %v8840_v25, %v10895_v8  ;;  %v10896_v25 = vld [vmem:[#allocation87_spill] sm:$0xff] }
 0x7de   : > { %v9304_v51 = vpop.f32.mrf.mxu1  ;;  %v3368_v8 = vadd.f32 %v8861_v12, %v10896_v25  ;;  %v10897_v12 = vld [vmem:[#allocation88_spill] sm:$0xff] }
 0x7df   : > { %v9311_v49 = vpop.f32.mrf.mxu2 }
 0x7e1   : > { %2887 = vmatmul.f32.gmra.mxu1 %v1575_v39  ;;  %6070 = vmatmul.msk.f32.gmra.mxu3 %vm3748_vm3, %v3362_v17  ;;  %v1520_v17 = vld [vmem:[%s10568_s3 + $0x8e8] sm:$0xff] }
 0x7e3   : > { %5886 = vmatmul.msk.f32.gmra.mxu2 %vm1685_vm2, %v1518_v48 }
 0x7e4   : > { %v4389_v47 = vpop.f32.mrf.mxu3 }
 0x7e5   : > { %v9319_v62 = vadd.f32 %v4389_v47, %v8870_v50 }
 0x7e6   : > { %v9321_v35 = vpop.f32.mrf.mxu1 }
 0x7e7   : > { %v3445_v58 = vpop.f32.mrf.mxu2 }
 0x7e8   : > { %v3446_v39 = vadd.f32 %v3445_v58, %v8779_v10  ;;  %v1579_v10 = vld [vmem:[%s10568_s3 + $0xac0] sm:$0xff]  ;;  %v1522_v58 = vld [vmem:[%s10568_s3 + $0x8f8] sm:$0xff] }
 0x7e9   : > { %2890 = vmatmul.f32.gmra.mxu1 %v1577_v21  ;;  %6071 = vmatmul.msk.f32.gmra.mxu3 %vm3748_vm3, %v3365_v56 }
 0x7ea   : > { %6100 = vmatmul.msk.f32.vlgmr.msrb.gmra.mxu0 %vm3748_vm3, %v3446_v39 }
 0x7eb   : > { %5887 = vmatmul.msk.f32.gmra.mxu2 %vm1685_vm2, %v1520_v17 }
 0x7ec   : > { %v4392_v50 = vpop.f32.mrf.mxu3 }
 0x7ed   : > { %v9336_v48 = vadd.f32 %v4392_v50, %v8888_v38  ;;  %v3371_v50 = vadd.f32 %v8879_v3, %v10897_v12  ;;  %v10898_v3 = vld [vmem:[#allocation89_spill] sm:$0xff]  ;;  %v1526_v12 = vld [vmem:[%s10568_s3 + $0x918] sm:$0xff] }
 0x7ee   : > { %v9338_v47 = vpop.f32.mrf.mxu1 }
 0x7ef   : > { %v3448_v21 = vpop.f32.mrf.mxu2 }
 0x7f0   : > { %v3449_v56 = vadd.f32 %v3448_v21, %v8797_v63  ;;  %v1581_v63 = vld [vmem:[%s10568_s3 + $0xad0] sm:$0xff] }
 0x7f1   : > { %2893 = vmatmul.f32.gmra.mxu1 %v1579_v10  ;;  %6072 = vmatmul.msk.f32.gmra.mxu3 %vm3748_vm3, %v3368_v8  ;;  %v1524_v8 = vld [vmem:[%s10568_s3 + $0x908] sm:$0xff] }
 0x7f2   : > { %6101 = vmatmul.msk.f32.gmra.mxu0 %vm3748_vm3, %v3449_v56 }
 0x7f3   : > { %5888 = vmatmul.msk.f32.gmra.mxu2 %vm1685_vm2, %v1522_v58  ;;  %v3374_v58 = vadd.f32 %v8897_v13, %v10898_v3  ;;  %v10899_v13 = vld [vmem:[#allocation90_spill] sm:$0xff] }
 0x7f4   : > { %v4395_v38 = vpop.f32.mrf.mxu3 }
 0x7f5   : > { %v9353_v39 = vadd.f32 %v4395_v38, %v8906_v5 }
 0x7f6   : > { %v9355_v17 = vpop.f32.mrf.mxu1 }
 0x7f7   : > { %v3451_v10 = vpop.f32.mrf.mxu2 }
 0x7f8   : > { %v3452_v25 = vadd.f32 %v3451_v10, %v8815_v16  ;;  %v1583_v16 = vld [vmem:[%s10568_s3 + $0xae0] sm:$0xff] }
 0x7f9   : > { %2896 = vmatmul.f32.gmra.mxu1 %v1581_v63  ;;  %6074 = vmatmul.msk.f32.vlgmr.msrb.gmra.mxu3 %vm3748_vm3, %v3371_v50 }
 0x7fa   : > { %6102 = vmatmul.msk.f32.gmra.mxu0 %vm3748_vm3, %v3452_v25  ;;  %v3377_v25 = vadd.f32 %v8915_v32, %v10899_v13  ;;  %v10900_v32 = vld [vmem:[#allocation91_spill] sm:$0xff] }
 0x7fb   : > { %5889 = vmatmul.msk.f32.gmra.mxu2 %vm1685_vm2, %v1524_v8 }
 0x7fc   : > { %v4398_v5 = vpop.f32.mrf.mxu3 }
 0x7fd   : > { %v9370_v21 = vadd.f32 %v4398_v5, %v8924_v60 }
 0x7fe   : > { %v9372_v56 = vpop.f32.mrf.mxu1 }
 0x7ff   : > { %v3454_v38 = vpop.f32.mrf.mxu2 }
 0x800   : > { %v3455_v63 = vadd.f32 %v3454_v38, %v8833_v26  ;;  %v1585_v26 = vld [vmem:[%s10568_s3 + $0xaf0] sm:$0xff]  ;;  %v3380_v38 = vadd.f32 %v8933_v52, %v10900_v32  ;;  %v10901_v52 = vld [vmem:[#allocation92_spill] sm:$0xff] }
 0x801   : > { %2899 = vmatmul.f32.gmra.mxu1 %v1583_v16  ;;  %6075 = vmatmul.msk.f32.gmra.mxu3 %vm3748_vm3, %v3374_v58  ;;  %v1528_v16 = vld [vmem:[%s10568_s3 + $0x928] sm:$0xff] }
 0x802   : > { %6103 = vmatmul.msk.f32.gmra.mxu0 %vm3748_vm3, %v3455_v63 }
 0x803   : > { %5890 = vmatmul.msk.f32.gmra.mxu2 %vm1685_vm2, %v1526_v12 }
 0x804   : > { %v4401_v60 = vpop.f32.mrf.mxu3 }
 0x805   : > { %v9387_v50 = vadd.f32 %v4401_v60, %v8942_v28  ;;  %v1530_v60 = vld [vmem:[%s10568_s3 + $0x938] sm:$0xff] }
 0x806   : > { %v9389_v10 = vpop.f32.mrf.mxu1 }
 0x807   : > { %v3457_v8 = vpop.f32.mrf.mxu2 }
 0x808   : > { %v3458_v5 = vadd.f32 %v3457_v8, %v8854_v15  ;;  %v1587_v15 = vld [vmem:[%s10568_s3 + $0xb00] sm:$0xff] }
 0x809   : > { %2902 = vmatmul.f32.gmra.mxu1 %v1585_v26  ;;  %6076 = vmatmul.msk.f32.gmra.mxu3 %vm3748_vm3, %v3377_v25  ;;  %v3383_v25 = vadd.f32 %v8951_v37, %v10901_v52  ;;  %v10902_v37 = vld [vmem:[#allocation5_spill] sm:$0xff] }
 0x80a   : > { %6104 = vmatmul.msk.f32.gmra.mxu0 %vm3748_vm3, %v3458_v5  ;;  %v3386_v32 = vadd.f32 %v8969_v42, %v10902_v37  ;;  %v10903_v42 = vld [vmem:[#allocation37_spill] sm:$0xff] }
 0x80b   : > { %5891 = vmatmul.msk.f32.gmra.mxu2 %vm1685_vm2, %v1528_v16  ;;  %v1532_v16 = vld [vmem:[%s10568_s3 + $0x948] sm:$0xff] }
 0x80c   : > { %v4404_v28 = vpop.f32.mrf.mxu3  ;;  %v10905_v37 = vld [vmem:[#allocation29_spill] sm:$0xff] }
 0x80d   : > { %v9404_v3 = vadd.f32 %v4404_v28, %v8960_v53 }
 0x80e   : > { %v9406_v58 = vpop.f32.mrf.mxu1 }
 0x80f   : > { %v3460_v63 = vpop.f32.mrf.mxu2 }
 0x810   : > { %v3461_v12 = vadd.f32 %v3460_v63, %v8872_v4  ;;  %v1589_v4 = vld [vmem:[%s10568_s3 + $0xb10] sm:$0xff] }
 0x811   : > { %2905 = vmatmul.f32.gmra.mxu1 %v1587_v15  ;;  %6077 = vmatmul.msk.f32.gmra.mxu3 %vm3748_vm3, %v3380_v38 }
 0x812   : > { %6105 = vmatmul.msk.f32.gmra.mxu0 %vm3748_vm3, %v3461_v12  ;;  %v1534_v12 = vld [vmem:[%s10568_s3 + $0x958] sm:$0xff] }
 0x813   : > { %5892 = vmatmul.msk.f32.gmra.mxu2 %vm1685_vm2, %v1530_v60 }
 0x814   : > { %v4407_v53 = vpop.f32.mrf.mxu3 }
 0x815   : > { %v9421_v26 = vadd.f32 %v4407_v53, %v8978_v18 }
 0x816   : > { %v9423_v13 = vpop.f32.mrf.mxu1 }
 0x817   : > { %v3463_v8 = vpop.f32.mrf.mxu2 }
 0x818   : > { %v3464_v5 = vadd.f32 %v3463_v8, %v8890_v14  ;;  %v1591_v14 = vld [vmem:[%s10568_s3 + $0xb20] sm:$0xff]  ;;  %v1536_v8 = vld [vmem:[%s10568_s3 + $0x968] sm:$0xff] }
 0x819   : > { %2908 = vmatmul.f32.gmra.mxu1 %v1589_v4  ;;  %6078 = vmatmul.msk.f32.gmra.mxu3 %vm3748_vm3, %v3383_v25  ;;  %v3389_v4 = vadd.f32 %v8987_v59, %v10903_v42  ;;  %v10904_v59 = vld [vmem:[#allocation43_spill] sm:$0xff] }
 0x81a   : > { %6106 = vmatmul.msk.f32.gmra.mxu0 %vm3748_vm3, %v3464_v5 }
 0x81b   : > { %5893 = vmatmul.msk.f32.gmra.mxu2 %vm1685_vm2, %v1532_v16 }
 0x81c   : > { %v4410_v18 = vpop.f32.mrf.mxu3 }
 0x81d   : > { %v9438_v28 = vadd.f32 %v4410_v18, %v8996_v41  ;;  %v3392_v18 = vadd.f32 %v9005_v33, %v10904_v59  ;;  %v1597_v33 = vld [vmem:[%s10568_s3 + $0xb50] sm:$0xff]  ;;  %v1599_v59 = vld [vmem:[%s10568_s3 + $0xb60] sm:$0xff] }
 0x81e   : > { %v9440_v15 = vpop.f32.mrf.mxu1 }
 0x81f   : > { %v3466_v38 = vpop.f32.mrf.mxu2 }
 0x820   : > { %v3467_v63 = vadd.f32 %v3466_v38, %v8908_v9  ;;  %v1593_v9 = vld [vmem:[%s10568_s3 + $0xb30] sm:$0xff]  ;;  %v1538_v38 = vld [vmem:[%s10568_s3 + $0x978] sm:$0xff] }
 0x821   : > { %2911 = vmatmul.f32.gmra.mxu1 %v1591_v14  ;;  %6079 = vmatmul.msk.f32.gmra.mxu3 %vm3748_vm3, %v3386_v32 }
 0x822   : > { %6107 = vmatmul.msk.f32.gmra.mxu0 %vm3748_vm3, %v3467_v63 }
 0x823   : > { %5894 = vmatmul.msk.f32.gmra.mxu2 %vm1685_vm2, %v1534_v12 }
 0x824   : > { %v4413_v41 = vpop.f32.mrf.mxu3 }
 0x825   : > { %v9455_v60 = vadd.f32 %v4413_v41, %v9014_v23  ;;  %v10906_v41 = vld [vmem:[#allocation25_spill] sm:$0xff] }
 0x826   : > { %v9457_v53 = vpop.f32.mrf.mxu1 }
 0x827   : > { %v3469_v52 = vpop.f32.mrf.mxu2 }
 0x828   : > { %v3470_v25 = vadd.f32 %v3469_v52, %v8926_v6  ;;  %v1595_v6 = vld [vmem:[%s10568_s3 + $0xb40] sm:$0xff] }
 0x829   : > { %2914 = vmatmul.f32.gmra.mxu1 %v1593_v9  ;;  %6080 = vmatmul.msk.f32.gmra.mxu3 %vm3748_vm3, %v3389_v4  ;;  %v10907_v9 = vld [vmem:[#allocation6_spill] sm:$0xff]  ;;  %v10908_v52 = vld [vmem:[#allocation52_spill] sm:$0xff] }
 0x82a   : > { %6108 = vmatmul.msk.f32.gmra.mxu0 %vm3748_vm3, %v3470_v25  ;;  %v3395_v42 = vadd.f32 %v10907_v9, %v10906_v41  ;;  %v1601_v9 = vld [vmem:[%s10568_s3 + $0xb70] sm:$0xff] }
 0x82b   : > { %5895 = vmatmul.msk.f32.gmra.mxu2 %vm1685_vm2, %v1536_v8  ;;  %v1540_v8 = vld [vmem:[%s10568_s3 + $0x988] sm:$0xff] }
 0x82c   : > { %v4416_v23 = vpop.f32.mrf.mxu3 }
 0x82d   : > { %v9472_v5 = vadd.f32 %v4416_v23, %v9032_v0 }
 0x82e   : > { %v9474_v16 = vpop.f32.mrf.mxu1 }
 0x82f   : > { %v3472_v14 = vpop.f32.mrf.mxu2 }
 0x830   : > { %v3473_v32 = vadd.f32 %v3472_v14, %v10905_v37  ;;  %v10910_v14 = vld [vmem:[#allocation48_spill] sm:$0xff] }
 0x831   : > { %2917 = vmatmul.f32.gmra.mxu1 %v1595_v6  ;;  %6081 = vmatmul.msk.f32.gmra.mxu3 %vm3748_vm3, %v3392_v18  ;;  %v10909_v18 = vld [vmem:[#allocation11_spill] sm:$0xff] }
 0x832   : > { %6109 = vmatmul.msk.f32.gmra.mxu0 %vm3748_vm3, %v3473_v32  ;;  %v3398_v37 = vadd.f32 %v10910_v14, %v10909_v18  ;;  %v1544_v18 = vld [vmem:[%s10568_s3 + $0x9a8] sm:$0xff] }
 0x833   : > { %5896 = vmatmul.msk.f32.gmra.mxu2 %vm1685_vm2, %v1538_v38  ;;  %v10911_v38 = vld [vmem:[#allocation16_spill] sm:$0xff] }
 0x834   : > { %v4419_v0 = vpop.f32.mrf.mxu3 }
 0x835   : > { %v9489_v63 = vadd.f32 %v4419_v0, %v9050_v34 }
 0x836   : > { %v9491_v12 = vpop.f32.mrf.mxu1 }
 0x837   : > { %v3475_v4 = vpop.f32.mrf.mxu2 }
 0x838   : > { %v3476_v25 = vadd.f32 %v3475_v4, %v10908_v52  ;;  %v10913_v4 = vld [vmem:[#allocation49_spill] sm:$0xff] }
 0x839   : > { %2920 = vmatmul.f32.gmra.mxu1 %v1597_v33  ;;  %6082 = vmatmul.msk.f32.gmra.mxu3 %vm3748_vm3, %v3395_v42  ;;  %v1542_v33 = vld [vmem:[%s10568_s3 + $0x998] sm:$0xff] }
 0x83a   : > { %6110 = vmatmul.msk.f32.gmra.mxu0 %vm3748_vm3, %v3476_v25  ;;  %v10912_v42 = vld [vmem:[#allocation27_spill] sm:$0xff] }
 0x83b   : > { %5897 = vmatmul.msk.f32.gmra.mxu2 %vm1685_vm2, %v1540_v8  ;;  %v3401_v52 = vadd.f32 %v10913_v4, %v10912_v42  ;;  %v1546_v42 = vld [vmem:[%s10568_s3 + $0x9b8] sm:$0xff] }
 0x83c   : > { %v4422_v34 = vpop.f32.mrf.mxu3 }
 0x83d   : > { %v9506_v23 = vadd.f32 %v4422_v34, %v9068_v22  ;;  %v10914_v34 = vld [vmem:[#allocation54_spill] sm:$0xff] }
 0x83e   : > { %v9508_v6 = vpop.f32.mrf.mxu1 }
 0x83f   : > { %v3478_v32 = vpop.f32.mrf.mxu2 }
 0x840   : > { %v3479_v0 = vadd.f32 %v3478_v32, %v10911_v38  ;;  %v10915_v32 = vld [vmem:[#allocation42_spill] sm:$0xff] }
 0x841   : > { %2923 = vmatmul.f32.gmra.mxu1 %v1599_v59  ;;  %6083 = vmatmul.msk.f32.gmra.mxu3 %vm3748_vm3, %v3398_v37  ;;  %v1603_v37 = vld [vmem:[%s10568_s3 + $0xb80] sm:$0xff]  ;;  %v10916_v38 = vld [vmem:[#allocation50_spill] sm:$0xff] }
 0x842   : > { %6111 = vmatmul.msk.f32.gmra.mxu0 %vm3748_vm3, %v3479_v0  ;;  %v3404_v0 = vadd.f32 %v10916_v38, %v10915_v32  ;;  %v10920_v32 = vld [vmem:[#allocation57_spill] sm:$0xff] }
 0x843   : > { %5898 = vmatmul.msk.f32.gmra.mxu2 %vm1685_vm2, %v1542_v33  ;;  %v1548_v38 = vld [vmem:[%s10568_s3 + $0x9c8] sm:$0xff] }
 0x844   : > { %v4425_v22 = vpop.f32.mrf.mxu3 }
 0x845   : > { %v9523_v41 = vadd.f32 %v4425_v22, %v9086_v43  ;;  %v10917_v22 = vld [vmem:[#allocation28_spill] sm:$0xff] }
 0x846   : > { %v9530_v25 = vpop.f32.mrf.mxu1 }
 0x847   : > { %v3481_v8 = vpop.f32.mrf.mxu2 }
 0x848   : > { %v3482_v59 = vadd.f32 %v3481_v8, %v10914_v34  ;;  %v1605_v8 = vld [vmem:[%s10568_s3 + $0xb90] sm:$0xff]  ;;  %v10918_v34 = vld [vmem:[#allocation44_spill] sm:$0xff] }
 0x849   : > { %2926 = vmatmul.f32.gmra.mxu1 %v1601_v9  ;;  %6084 = vmatmul.msk.f32.gmra.mxu3 %vm3748_vm3, %v3401_v52 }
 0x84a   : > { %6112 = vmatmul.msk.f32.gmra.mxu0 %vm3748_vm3, %v3482_v59  ;;  %v10919_v59 = vld [vmem:[#allocation63_spill] sm:$0xff] }
 0x84b   : > { %5899 = vmatmul.msk.f32.gmra.mxu2 %vm1685_vm2, %v1544_v18  ;;  %v3407_v18 = vadd.f32 %v10919_v59, %v10918_v34  ;;  %v10923_v34 = vld [vmem:[#allocation59_spill] sm:$0xff] }
 0x84c   : > { %v4428_v43 = vpop.f32.mrf.mxu3 }
 0x84d   : > { %v9540_v14 = vadd.f32 %v4428_v43, %v9104_v44 }
 0x84e   : > { %v9551_v4 = vpop.f32.mrf.mxu1 }
 0x84f   : > { %v3484_v33 = vpop.f32.mrf.mxu2 }
 0x850   : > { %v3485_v9 = vadd.f32 %v3484_v33, %v10917_v22  ;;  %v1607_v22 = vld [vmem:[%s10568_s3 + $0xba0] sm:$0xff] }
 0x851   : > { %2929 = vmatmul.f32.gmra.mxu1 %v1603_v37  ;;  %6085 = vmatmul.msk.f32.gmra.mxu3 %vm3748_vm3, %v3404_v0 }
 0x852   : > { %6113 = vmatmul.msk.f32.gmra.mxu0 %vm3748_vm3, %v3485_v9  ;;  %v10921_v9 = vld [vmem:[#allocation93_spill] sm:$0xff] }
 0x853   : > { %5900 = vmatmul.msk.f32.gmra.mxu2 %vm1685_vm2, %v1546_v42  ;;  %v10922_v42 = vld [vmem:[#allocation47_spill] sm:$0xff] }
 0x854   : > { %v4431_v44 = vpop.f32.mrf.mxu3 }
 0x855   : > { %v9557_v52 = vadd.f32 %v4431_v44, %v9122_v20  ;;  %v3410_v44 = vadd.f32 %v10922_v42, %v10921_v9  ;;  %v10926_v42 = vld [vmem:[#allocation61_spill] sm:$0xff] }
 0x856   : > { %v9570_v20 = vpop.f32.mrf.mxu1 }
 0x857   : > { %v3487_v43 = vpop.f32.mrf.mxu2 }
 0x858   : > { %v3488_v37 = vadd.f32 %v3487_v43, %v10920_v32 }
 0x859   : > { %2932 = vmatmul.f32.gmra.mxu1 %v1605_v8  ;;  %6086 = vmatmul.msk.f32.gmra.mxu3 %vm3748_vm3, %v3407_v18  ;;  %v1550_v18 = vld [vmem:[%s10568_s3 + $0x9d8] sm:$0xff] }
 0x85a   : > { %6114 = vmatmul.msk.f32.gmra.mxu0 %vm3748_vm3, %v3488_v37  ;;  %v1609_v37 = vld [vmem:[%s10568_s3 + $0xbb0] sm:$0xff] }
 0x85b   : > { %5901 = vmatmul.msk.f32.gmra.mxu2 %vm1685_vm2, %v1548_v38  ;;  %v10924_v38 = vld [vmem:[#allocation94_spill] sm:$0xff] }
 0x85c   : > { %v4434_v0 = vpop.f32.mrf.mxu3 }
 0x85d   : > { %v9574_v33 = vadd.f32 %v4434_v0, %v9140_v40  ;;  %v10925_v0 = vld [vmem:[#allocation53_spill] sm:$0xff] }
 0x85e   : > { %v9588_v43 = vpop.f32.mrf.mxu1  ;;  %v3413_v9 = vadd.f32 %v10925_v0, %v10924_v38  ;;  %v10928_v0 = vld [vmem:[#allocation45_spill] sm:$0xff] }
 0x85f   : > { %v3490_v8 = vpop.f32.mrf.mxu2 }
 0x860   : > { %v3491_v59 = vadd.f32 %v3490_v8, %v10923_v34  ;;  %v1552_v8 = vld [vmem:[%s10568_s3 + $0x9e8] sm:$0xff] }
 0x861   : > { %2935 = vmatmul.f32.gmra.mxu1 %v1607_v22  ;;  %6087 = vmatmul.msk.f32.gmra.mxu3 %vm3748_vm3, %v3410_v44 }
 0x862   : > { %6115 = vmatmul.msk.f32.gmra.mxu0 %vm3748_vm3, %v3491_v59  ;;  %v1611_v59 = vld [vmem:[%s10568_s3 + $0xbc0] sm:$0xff] }
 0x863   : > { %5902 = vmatmul.msk.f32.gmra.mxu2 %vm1685_vm2, %v1550_v18  ;;  %v10927_v18 = vld [vmem:[#allocation95_spill] sm:$0xff] }
 0x864   : > { %v4437_v40 = vpop.f32.mrf.mxu3 }
 0x865   : > { %v9591_v32 = vadd.f32 %v4437_v40, %v9158_v29  ;;  %v3416_v40 = vadd.f32 %v9149_v57, %v10927_v18  ;;  %v1613_v57 = vld [vmem:[%s10568_s3 + $0xbd0] sm:$0xff] }
 0x866   : > { %v9613_v38 = vpop.f32.mrf.mxu1  ;;  %v10930_v18 = vld [vmem:[#allocation51_spill] sm:$0xff] }
 0x867   : > { %v3493_v22 = vpop.f32.mrf.mxu2 }
 0x868   : > { %v3494_v44 = vadd.f32 %v3493_v22, %v10926_v42  ;;  %v1554_v22 = vld [vmem:[%s10568_s3 + $0x9f8] sm:$0xff] }
 0x869   : > { %2938 = vmatmul.f32.gmra.mxu1 %v1609_v37  ;;  %6088 = vmatmul.msk.f32.gmra.mxu3 %vm3748_vm3, %v3413_v9 }
 0x86a   : > { %6116 = vmatmul.msk.f32.gmra.mxu0 %vm3748_vm3, %v3494_v44  ;;  %v10929_v44 = vld [vmem:[#allocation96_spill] sm:$0xff] }
 0x86b   : > { %5903 = vmatmul.msk.f32.gmra.mxu2 %vm1685_vm2, %v1552_v8  ;;  %v3419_v8 = vadd.f32 %v9167_v1, %v10929_v44  ;;  %v4759_v1 = vpop.f32.mrf.mxu0 }
 0x86c   : > { %v4440_v29 = vpop.f32.mrf.mxu3 }
 0x86d   : > { %v9606_v34 = vadd.f32 %v4440_v29, %v9176_v61 }
 0x86f   : > { %v3496_v37 = vpop.f32.mrf.mxu2 }
 0x870   : > { %v3497_v9 = vadd.f32 %v3496_v37, %v10928_v0  ;;  %v9634_v37 = vpop.f32.mrf.mxu1 }
 0x871   : > { %2941 = vmatmul.f32.gmra.mxu1 %v1611_v59  ;;  %6089 = vmatmul.msk.f32.gmra.mxu3 %vm3748_vm3, %v3416_v40  ;;  %v1556_v40 = vld [vmem:[%s10568_s3 + $0xa08] sm:$0xff] }
 0x872   : > { %6117 = vmatmul.msk.f32.gmra.mxu0 %vm3748_vm3, %v3497_v9  ;;  %v1615_v9 = vld [vmem:[%s10568_s3 + $0xbe0] sm:$0xff] }
 0x873   : > { %5904 = vmatmul.msk.f32.gmra.mxu2 %vm1685_vm2, %v1554_v22  ;;  %v10931_v22 = vld [vmem:[#allocation97_spill] sm:$0xff] }
 0x874   : > { %v4443_v61 = vpop.f32.mrf.mxu3 }
 0x875   : > { %v9623_v42 = vadd.f32 %v4443_v61, %v9194_v31  ;;  %v3422_v61 = vadd.f32 %v9185_v7, %v10931_v22 }
 0x877   : > { %v3499_v29 = vpop.f32.mrf.mxu2 }
 0x878   : > { %v3500_v59 = vadd.f32 %v3499_v29, %v10930_v18  ;;  %v1558_v18 = vld [vmem:[%s10568_s3 + $0xa18] sm:$0xff] }
 0x879   : > { %2944 = vmatmul.f32.gmra.mxu1 %v1613_v57  ;;  %6090 = vmatmul.msk.f32.gmra.mxu3 %vm3748_vm3, %v3419_v8  ;;  %v10932_v57 = vld [vmem:[#allocation65_spill] sm:$0xff] }
 0x87a   : > { %6118 = vmatmul.msk.f32.gmra.mxu0 %vm3748_vm3, %v3500_v59 }
 0x87b   : > { %5905 = vmatmul.msk.f32.gmra.mxu2 %vm1685_vm2, %v1556_v40  ;;  %v1617_v40 = vld [vmem:[%s10568_s3 + $0xbf0] sm:$0xff] }
 0x87c   : > { %v4565_v31 = vpop.f32.mrf.mxu3 }
 0x87d   : > { %v4640_v0 = vadd.f32 %v4565_v31, %v9211_v30  ;;  %v9653_v30 = vpop.f32.mrf.mxu1  ;;  %v10933_v31 = vld [vmem:[#allocation98_spill] sm:$0xff] }
 0x87f   : > { %v3502_v44 = vpop.f32.mrf.mxu2  ;;  %v9645_v29 = vadd.f32 %v4759_v1, %v4640_v0  ;;  %v3425_v0 = vadd.f32 %v9203_v46, %v10933_v31  ;;  %v1619_v46 = vld [vmem:[%s10568_s3 + $0xc00] sm:$0xff] }
 0x880   : > { %v3503_v8 = vadd.f32 %v3502_v44, %v10932_v57 }
 0x881   : > { %2947 = vmatmul.f32.gmra.mxu1 %v1615_v9  ;;  %6091 = vmatmul.msk.f32.gmra.mxu3 %vm3748_vm3, %v3422_v61  ;;  %v10934_v9 = vld [vmem:[#allocation46_spill] sm:$0xff] }
 0x882   : > { %6119 = vmatmul.msk.f32.gmra.mxu0 %vm3748_vm3, %v3503_v8  ;;  %v1560_v61 = vld [vmem:[%s10568_s3 + $0xa28] sm:$0xff]  ;;  %v10935_v8 = vld [vmem:[#allocation99_spill] sm:$0xff] }
 0x883   : > { %5906 = vmatmul.msk.f32.gmra.mxu2 %vm1685_vm2, %v1558_v18  ;;  %v3428_v18 = vadd.f32 %v9220_v11, %v10935_v8  ;;  %v1621_v11 = vld [vmem:[%s10568_s3 + $0xc10] sm:$0xff] }
 0x884   : > { %v4568_v59 = vpop.f32.mrf.mxu3 }
 0x885   : > { %v9657_v7 = vadd.f32 %v4568_v59, %v9228_v55  ;;  %v9671_v44 = vpop.f32.mrf.mxu1 }
 0x887   : > { %v3505_v1 = vpop.f32.mrf.mxu2 }
 0x888   : > { %v3506_v22 = vadd.f32 %v3505_v1, %v10934_v9  ;;  %v10937_v9 = vld [vmem:[#allocation19_spill] sm:$0xff] }
 0x889   : > { %2950 = vmatmul.f32.gmra.mxu1 %v1617_v40  ;;  %6092 = vmatmul.msk.f32.gmra.mxu3 %vm3748_vm3, %v3425_v0  ;;  %v10936_v40 = vld [vmem:[#allocation67_spill] sm:$0xff] }
 0x88a   : > { %6120 = vmatmul.msk.f32.gmra.mxu0 %vm3748_vm3, %v3506_v22  ;;  %v1562_v0 = vld [vmem:[%s10568_s3 + $0xa38] sm:$0xff]  ;;  %v3431_v22 = vadd.f32 %v9237_v45, %v10937_v9  ;;  %v1623_v45 = vld [vmem:[%s10568_s3 + $0xc20] sm:$0xff]  ;;  %v10941_v9 = vld [vmem:[#allocation10_spill] sm:$0xff] }
 0x88b   : > { %5907 = vmatmul.msk.f32.gmra.mxu2 %vm1685_vm2, %v1560_v61 }
 0x88c   : > { %v4571_v55 = vpop.f32.mrf.mxu3 }
 0x88d   : > { %v9674_v57 = vadd.f32 %v4571_v55, %v9245_v27  ;;  %v9696_v61 = vpop.f32.mrf.mxu1 }
 0x88f   : > { %v3508_v59 = vpop.f32.mrf.mxu2 }
 0x890   : > { %v3509_v31 = vadd.f32 %v3508_v59, %v10936_v40  ;;  %v10939_v40 = vld [vmem:[#allocation100_spill] sm:$0xff] }
 0x891   : > { %2953 = vmatmul.f32.gmra.mxu1 %v1619_v46  ;;  %6093 = vmatmul.msk.f32.gmra.mxu3 %vm3748_vm3, %v3428_v18  ;;  %v10938_v46 = vld [vmem:[#allocation55_spill] sm:$0xff]  ;;  %v1564_v18 = vld [vmem:[%s10568_s3 + $0xa48] sm:$0xff] }
 0x892   : > { %6121 = vmatmul.msk.f32.gmra.mxu0 %vm3748_vm3, %v3509_v31  ;;  %v10940_v31 = vld [vmem:[#allocation71_spill] sm:$0xff] }
 0x893   : > { %5908 = vmatmul.msk.f32.gmra.mxu2 %vm1685_vm2, %v1562_v0  ;;  %v3434_v0 = vadd.f32 %v10940_v31, %v10939_v40 }
 0x894   : > { %v4574_v27 = vpop.f32.mrf.mxu3 }
 0x895   : > { %v9689_v1 = vadd.f32 %v4574_v27, %v9265_v2 }
 0x897   : > { %v3511_v55 = vpop.f32.mrf.mxu2 }
 0x898   : > { %v3512_v8 = vadd.f32 %v3511_v55, %v10938_v46  ;;  %v6125_v55 = vld [vmem:[%s10569_s4 + $0x30] sm:$0xff] }
 0x899   : > { %2956 = vmatmul.f32.gmra.mxu1 %v1621_v11  ;;  %6094 = vmatmul.msk.f32.gmra.mxu3 %vm3748_vm3, %v3431_v22  ;;  %v1566_v22 = vld [vmem:[%s10568_s3 + $0xa58] sm:$0xff] }
 0x89a   : > { %6122 = vmatmul.msk.f32.gmra.mxu0 %vm3748_vm3, %v3512_v8  ;;  %4951 = vmatpush.msra.mxu3 %v6125_v55 }
 0x89b   : > { %5909 = vmatmul.msk.f32.gmra.mxu2 %vm1685_vm2, %v1564_v18  ;;  %v1625_v18 = vld [vmem:[%s10568_s3 + $0xc30] sm:$0xff] }
 0x89c   : > { %v4577_v2 = vpop.f32.mrf.mxu3 }
 0x89d   : > { %v9706_v59 = vadd.f32 %v4577_v2, %v9282_v19  ;;  %v9720_v19 = vpop.f32.mrf.mxu1  ;;  %v10942_v2 = vld [vmem:[#allocation101_spill] sm:$0xff] }
 0x89e   : > { %v3437_v40 = vadd.f32 %v9274_v54, %v10942_v2  ;;  %v1627_v54 = vld [vmem:[%s10568_s3 + $0xc40] sm:$0xff] }
 0x89f   : > { %v3514_v27 = vpop.f32.mrf.mxu2 }
 0x8a0   : > { %v3515_v11 = vadd.f32 %v3514_v27, %v10941_v9 }
 0x8a1   : > { %2959 = vmatmul.f32.gmra.mxu1 %v1623_v45  ;;  %6095 = vmatmul.msk.f32.gmra.mxu3 %vm3748_vm3, %v3434_v0  ;;  %v10943_v45 = vld [vmem:[#allocation69_spill] sm:$0xff] }
 0x8a2   : > { %6123 = vmatmul.msk.f32.gmra.mxu0 %vm3748_vm3, %v3515_v11  ;;  %v1568_v0 = vld [vmem:[%s10568_s3 + $0xa68] sm:$0xff] }
 0x8a3   : > { %5910 = vmatmul.msk.f32.gmra.mxu2 %vm1685_vm2, %v1566_v22  ;;  %v10944_v22 = vld [vmem:[#allocation103_spill] sm:$0xff] }
 0x8a4   : > { %v4580_v46 = vpop.f32.mrf.mxu3  ;;  %v3440_v55 = vadd.f32 %v9291_v24, %v10944_v22  ;;  %v1629_v24 = vld [vmem:[%s10568_s3 + $0xc50] sm:$0xff] }
 0x8a5   : > { %v9726_v8 = vadd.f32 %v4580_v46, %v9302_v36  ;;  %v9739_v36 = vpop.f32.mrf.mxu1 }
 0x8a7   : > { %v3517_v31 = vpop.f32.mrf.mxu2 }
 0x8a8   : > { %v3518_v27 = vadd.f32 %v3517_v31, %v10943_v45  ;;  %v10945_v31 = vld [vmem:[#allocation104_spill] sm:$0xff] }
 0x8a9   : > { %2962 = vmatmul.f32.gmra.mxu1 %v1625_v18  ;;  %6096 = vmatmul.msk.f32.gmra.mxu3 %vm3748_vm3, %v3437_v40  ;;  %v1570_v18 = vld [vmem:[%s10568_s3 + $0xa78] sm:$0xff]  ;;  %v3443_v45 = vadd.f32 %v9311_v49, %v10945_v31  ;;  %v1633_v31 = vld [vmem:[%s10568_s3 + $0xc70] sm:$0xff] }
 0x8aa   : > { %6124 = vmatmul.msk.f32.gmra.mxu0 %vm3748_vm3, %v3518_v27  ;;  %v10946_v49 = vld [vmem:[#allocation56_spill] sm:$0xff] }
 0x8ab   : > { %5911 = vmatmul.msk.f32.gmra.mxu2 %vm1685_vm2, %v1568_v0  ;;  %v1572_v0 = vld [vmem:[%s10568_s3 + $0xa88] sm:$0xff] }
 0x8ac   : > { %v4583_v9 = vpop.f32.mrf.mxu3 }
 0x8ad   : > { %v9743_v11 = vadd.f32 %v4583_v9, %v9319_v62  ;;  %v9755_v62 = vpop.f32.mrf.mxu1 }
 0x8af   : > { %v3520_v46 = vpop.f32.mrf.mxu2 }
 0x8b1   : > { %2965 = vmatmul.f32.gmra.mxu1 %v1627_v54  ;;  %6097 = vmatmul.msk.f32.gmra.mxu3 %vm3748_vm3, %v3440_v55  ;;  %v1631_v54 = vld [vmem:[%s10568_s3 + $0xc60] sm:$0xff]  ;;  %v3521_v55 = vadd.f32 %v3520_v46, %v10946_v49 }
 0x8b3   : > { %5912 = vmatmul.msk.f32.gmra.mxu2 %vm1685_vm2, %v1570_v18 }
 0x8b4   : > { %v4586_v2 = vpop.f32.mrf.mxu3 }
 0x8b5   : > { %v9758_v40 = vadd.f32 %v4586_v2, %v9336_v48  ;;  %v9776_v22 = vpop.f32.mrf.mxu1  ;;  %v1574_v2 = vld [vmem:[%s10568_s3 + $0xa98] sm:$0xff] }
 0x8b7   : > { %v3523_v27 = vpop.f32.mrf.mxu2 }
 0x8b9   : > { %2968 = vmatmul.f32.gmra.mxu1 %v1629_v24  ;;  %6098 = vmatmul.msk.f32.gmra.mxu3 %vm3748_vm3, %v3443_v45  ;;  %v10947_v45 = vld [vmem:[#allocation12_spill] sm:$0xff] }
 0x8ba   : > { %v3524_v46 = vadd.f32 %v3523_v27, %v10947_v45  ;;  %v1635_v27 = vld [vmem:[%s10568_s3 + $0xc80] sm:$0xff]  ;;  %v1578_v45 = vld [vmem:[%s10568_s3 + $0xab8] sm:$0xff] }
 0x8bb   : > { %5913 = vmatmul.msk.f32.gmra.mxu2 %vm1685_vm2, %v1572_v0 }
 0x8bc   : > { %v4589_v9 = vpop.f32.mrf.mxu3 }
 0x8bd   : > { %v9771_v48 = vadd.f32 %v4589_v9, %v9353_v39  ;;  %v1576_v9 = vld [vmem:[%s10568_s3 + $0xaa8] sm:$0xff] }
 0x8bf   : > { %v3526_v18 = vpop.f32.mrf.mxu2 }
 0x8c1   : > { %2971 = vmatmul.f32.gmra.mxu1 %v1631_v54  ;;  %6126 = vmatmul.msk.f32.vlgmr.msra.gmra.mxu3 %vm3748_vm3, %v3521_v55  ;;  %v9794_v54 = vpop.f32.mrf.mxu1  ;;  %v10948_v55 = vld [vmem:[#allocation58_spill] sm:$0xff] }
 0x8c3   : > { %5914 = vmatmul.msk.f32.gmra.mxu2 %vm1685_vm2, %v1574_v2  ;;  %v3527_v2 = vadd.f32 %v3526_v18, %v10948_v55  ;;  %v1637_v18 = vld [vmem:[%s10568_s3 + $0xc90] sm:$0xff] }
 0x8c4   : > { %v4592_v39 = vpop.f32.mrf.mxu3 }
 0x8c5   : > { %v9785_v24 = vadd.f32 %v4592_v39, %v9370_v21 }
 0x8c7   : > { %v3529_v0 = vpop.f32.mrf.mxu2 }
 0x8c9   : > { %2974 = vmatmul.f32.gmra.mxu1 %v1633_v31  ;;  %6127 = vmatmul.msk.f32.gmra.mxu3 %vm3748_vm3, %v3524_v46  ;;  %v9809_v31 = vpop.f32.mrf.mxu1 }
 0x8cb   : > { %5915 = vmatmul.msk.f32.gmra.mxu2 %vm1685_vm2, %v1576_v9  ;;  %v10949_v9 = vld [vmem:[#allocation14_spill] sm:$0xff] }
 0x8cc   : > { %v4595_v21 = vpop.f32.mrf.mxu3 }
 0x8cd   : > { %v9799_v49 = vadd.f32 %v4595_v21, %v9387_v50  ;;  %v3530_v21 = vadd.f32 %v3529_v0, %v10949_v9  ;;  %v1639_v0 = vld [vmem:[%s10568_s3 + $0xca0] sm:$0xff] }
 0x8cf   : > { %v3532_v39 = vpop.f32.mrf.mxu2 }
 0x8d1   : > { %2977 = vmatmul.f32.gmra.mxu1 %v1635_v27  ;;  %6128 = vmatmul.msk.f32.gmra.mxu3 %vm3748_vm3, %v3527_v2  ;;  %v1580_v27 = vld [vmem:[%s10568_s3 + $0xac8] sm:$0xff] }
 0x8d3   : > { %5916 = vmatmul.msk.f32.gmra.mxu2 %vm1685_vm2, %v1578_v45  ;;  %v9824_v45 = vpop.f32.mrf.mxu1 }
 0x8d4   : > { %v4598_v50 = vpop.f32.mrf.mxu3 }
 0x8d5   : > { %v9813_v46 = vadd.f32 %v4598_v50, %v9404_v3  ;;  %v3533_v50 = vadd.f32 %v3532_v39, %v9304_v51 }
 0x8d7   : > { %v3535_v55 = vpop.f32.mrf.mxu2 }
 0x8d8   : > { %v3536_v51 = vadd.f32 %v3535_v55, %v9321_v35 }
 0x8d9   : > { %2980 = vmatmul.f32.gmra.mxu1 %v1637_v18  ;;  %6129 = vmatmul.msk.f32.gmra.mxu3 %vm3748_vm3, %v3530_v21  ;;  %v1582_v18 = vld [vmem:[%s10568_s3 + $0xad8] sm:$0xff] }
 0x8db   : > { %5917 = vmatmul.msk.f32.gmra.mxu2 %vm1685_vm2, %v1580_v27  ;;  %v1641_v27 = vld [vmem:[%s10568_s3 + $0xcb0] sm:$0xff] }
 0x8dc   : > { %v4601_v2 = vpop.f32.mrf.mxu3 }
 0x8dd   : > { %v9827_v3 = vadd.f32 %v4601_v2, %v9421_v26  ;;  %v9844_v2 = vpop.f32.mrf.mxu1 }
 0x8df   : > { %v3538_v9 = vpop.f32.mrf.mxu2 }
 0x8e0   : > { %v3539_v35 = vadd.f32 %v3538_v9, %v9338_v47  ;;  %v1645_v47 = vld [vmem:[%s10568_s3 + $0xcd0] sm:$0xff] }
 0x8e1   : > { %2983 = vmatmul.f32.gmra.mxu1 %v1639_v0  ;;  %6130 = vmatmul.msk.f32.gmra.mxu3 %vm3748_vm3, %v3533_v50  ;;  %v1584_v0 = vld [vmem:[%s10568_s3 + $0xae8] sm:$0xff] }
 0x8e3   : > { %5918 = vmatmul.msk.f32.gmra.mxu2 %vm1685_vm2, %v1582_v18  ;;  %v1643_v18 = vld [vmem:[%s10568_s3 + $0xcc0] sm:$0xff] }
 0x8e4   : > { %v4604_v21 = vpop.f32.mrf.mxu3 }
 0x8e5   : > { %v9839_v26 = vadd.f32 %v4604_v21, %v9438_v28  ;;  %v1586_v21 = vld [vmem:[%s10568_s3 + $0xaf8] sm:$0xff] }
 0x8e7   : > { %v3541_v39 = vpop.f32.mrf.mxu2 }
 0x8e8   : > { %v3542_v9 = vadd.f32 %v3541_v39, %v9355_v17  ;;  %v1647_v17 = vld [vmem:[%s10568_s3 + $0xce0] sm:$0xff] }
 0x8e9   : > { %2986 = vmatmul.f32.gmra.mxu1 %v1641_v27  ;;  %6131 = vmatmul.msk.f32.gmra.mxu3 %vm3748_vm3, %v3536_v51  ;;  %v9862_v27 = vpop.f32.mrf.mxu1 }
 0x8eb   : > { %5919 = vmatmul.msk.f32.gmra.mxu2 %vm1685_vm2, %v1584_v0 }
 0x8ec   : > { %v4607_v28 = vpop.f32.mrf.mxu3 }
 0x8ed   : > { %v9853_v50 = vadd.f32 %v4607_v28, %v9455_v60  ;;  %v1588_v28 = vld [vmem:[%s10568_s3 + $0xb08] sm:$0xff] }
 0x8ef   : > { %v3544_v55 = vpop.f32.mrf.mxu2 }
 0x8f0   : > { %v3545_v39 = vadd.f32 %v3544_v55, %v9372_v56  ;;  %v1649_v56 = vld [vmem:[%s10568_s3 + $0xcf0] sm:$0xff] }
 0x8f1   : > { %2989 = vmatmul.f32.gmra.mxu1 %v1643_v18  ;;  %6132 = vmatmul.msk.f32.gmra.mxu3 %vm3748_vm3, %v3539_v35  ;;  %v9877_v18 = vpop.f32.mrf.mxu1 }
 0x8f3   : > { %5920 = vmatmul.msk.f32.gmra.mxu2 %vm1685_vm2, %v1586_v21 }
 0x8f4   : > { %v4610_v60 = vpop.f32.mrf.mxu3 }
 0x8f5   : > { %v9867_v51 = vadd.f32 %v4610_v60, %v9472_v5  ;;  %v1590_v60 = vld [vmem:[%s10568_s3 + $0xb18] sm:$0xff] }
 0x8f7   : > { %v3547_v0 = vpop.f32.mrf.mxu2 }
 0x8f8   : > { %v3548_v55 = vadd.f32 %v3547_v0, %v9389_v10  ;;  %v1651_v10 = vld [vmem:[%s10568_s3 + $0xd00] sm:$0xff] }
 0x8f9   : > { %2992 = vmatmul.f32.gmra.mxu1 %v1645_v47  ;;  %6133 = vmatmul.msk.f32.gmra.mxu3 %vm3748_vm3, %v3542_v9  ;;  %v9892_v9 = vpop.f32.mrf.mxu1 }
 0x8fb   : > { %5921 = vmatmul.msk.f32.gmra.mxu2 %vm1685_vm2, %v1588_v28 }
 0x8fc   : > { %v4613_v5 = vpop.f32.mrf.mxu3 }
 0x8fd   : > { %v9881_v35 = vadd.f32 %v4613_v5, %v9489_v63  ;;  %v1592_v5 = vld [vmem:[%s10568_s3 + $0xb28] sm:$0xff] }
 0x8ff   : > { %v3550_v21 = vpop.f32.mrf.mxu2 }
 0x901   : > { %2995 = vmatmul.f32.gmra.mxu1 %v1647_v17  ;;  %6134 = vmatmul.msk.f32.gmra.mxu3 %vm3748_vm3, %v3545_v39  ;;  %v9904_v17 = vpop.f32.mrf.mxu0  ;;  %v9914_v0 = vpop.f32.mrf.mxu1 }
 0x903   : > { %5922 = vmatmul.msk.f32.gmra.mxu2 %vm1685_vm2, %v1590_v60  ;;  %v3551_v60 = vadd.f32 %v3550_v21, %v9406_v58  ;;  %v1653_v58 = vld [vmem:[%s10568_s3 + $0xd10] sm:$0xff] }
 0x904   : > { %v4616_v47 = vpop.f32.mrf.mxu3 }
 0x905   : > { %v9895_v63 = vadd.f32 %v4616_v47, %v9506_v23 }
 0x907   : > { %v3553_v28 = vpop.f32.mrf.mxu2 }
 0x908   : > { %v3554_v21 = vadd.f32 %v3553_v28, %v9423_v13  ;;  %v1655_v13 = vld [vmem:[%s10568_s3 + $0xd20] sm:$0xff] }
 0x909   : > { %2998 = vmatmul.f32.gmra.mxu1 %v1649_v56  ;;  %6135 = vmatmul.msk.f32.gmra.mxu3 %vm3748_vm3, %v3548_v55  ;;  %v1594_v56 = vld [vmem:[%s10568_s3 + $0xb38] sm:$0xff]  ;;  %v9921_v55 = vpop.f32.mrf.mxu0 }
 0x90b   : > { %5923 = vmatmul.msk.f32.gmra.mxu2 %vm1685_vm2, %v1592_v5 }
 0x90c   : > { %v4619_v23 = vpop.f32.mrf.mxu3 }
 0x90d   : > { %v9909_v39 = vadd.f32 %v4619_v23, %v9523_v41 }
 0x90f   : > { %10950 = vst [vmem:[#allocation73_spill] sm:$0xff] %v9909_v39  ;;  %v3556_v47 = vpop.f32.mrf.mxu2 }
 0x910   : > { %v3557_v28 = vadd.f32 %v3556_v47, %v9440_v15  ;;  %v1657_v15 = vld [vmem:[%s10568_s3 + $0xd30] sm:$0xff] }
 0x911   : > { %3001 = vmatmul.f32.gmra.mxu1 %v1651_v10  ;;  %6136 = vmatmul.msk.f32.gmra.mxu3 %vm3748_vm3, %v3551_v60  ;;  %v1596_v10 = vld [vmem:[%s10568_s3 + $0xb48] sm:$0xff]  ;;  %v9934_v60 = vpop.f32.mrf.mxu1 }
 0x913   : > { %5924 = vmatmul.msk.f32.gmra.mxu2 %vm1685_vm2, %v1594_v56  ;;  %v9938_v56 = vpop.f32.mrf.mxu0 }
 0x914   : > { %v4622_v41 = vpop.f32.mrf.mxu3 }
 0x915   : > { %v9925_v5 = vadd.f32 %v4622_v41, %v9540_v14 }
 0x917   : > { %10951 = vst [vmem:[#allocation60_spill] sm:$0xff] %v9925_v5  ;;  %v3559_v23 = vpop.f32.mrf.mxu2 }
 0x919   : > { %3004 = vmatmul.f32.gmra.mxu1 %v1653_v58  ;;  %6137 = vmatmul.msk.f32.gmra.mxu3 %vm3748_vm3, %v3554_v21  ;;  %v1598_v58 = vld [vmem:[%s10568_s3 + $0xb58] sm:$0xff]  ;;  %v9951_v21 = vpop.f32.mrf.mxu1 }
 0x91b   : > { %5925 = vmatmul.msk.f32.gmra.mxu2 %vm1685_vm2, %v1596_v10  ;;  %v9960_v47 = vpop.f32.mrf.mxu0 }
 0x91c   : > { %v4625_v14 = vpop.f32.mrf.mxu3 }
 0x91d   : > { %v9941_v41 = vadd.f32 %v4625_v14, %v9557_v52  ;;  %v3560_v14 = vadd.f32 %v3559_v23, %v9457_v53  ;;  %v1659_v53 = vld [vmem:[%s10568_s3 + $0xd40] sm:$0xff] }
 0x91f   : > { %10952 = vst [vmem:[#allocation8_spill] sm:$0xff] %v9941_v41  ;;  %v3562_v39 = vpop.f32.mrf.mxu2 }
 0x920   : > { %v3563_v23 = vadd.f32 %v3562_v39, %v9474_v16  ;;  %v1661_v16 = vld [vmem:[%s10568_s3 + $0xd50] sm:$0xff] }
 0x921   : > { %3007 = vmatmul.f32.gmra.mxu1 %v1655_v13  ;;  %6138 = vmatmul.msk.f32.gmra.mxu3 %vm3748_vm3, %v3557_v28  ;;  %v1600_v13 = vld [vmem:[%s10568_s3 + $0xb68] sm:$0xff]  ;;  %v9968_v28 = vpop.f32.mrf.mxu1 }
 0x923   : > { %5926 = vmatmul.msk.f32.gmra.mxu2 %vm1685_vm2, %v1598_v58 }
 0x924   : > { %v4628_v52 = vpop.f32.mrf.mxu3 }
 0x925   : > { %v9955_v10 = vadd.f32 %v4628_v52, %v9574_v33 }
 0x927   : > { %10953 = vst [vmem:[#allocation75_spill] sm:$0xff] %v9955_v10  ;;  %v3565_v5 = vpop.f32.mrf.mxu2 }
 0x929   : > { %3010 = vmatmul.f32.gmra.mxu1 %v1657_v15  ;;  %6139 = vmatmul.msk.f32.gmra.mxu3 %vm3748_vm3, %v3560_v14  ;;  %v1602_v15 = vld [vmem:[%s10568_s3 + $0xb78] sm:$0xff]  ;;  %v9980_v14 = vpop.f32.mrf.mxu0  ;;  %v9990_v39 = vpop.f32.mrf.mxu1 }
 0x92b   : > { %5927 = vmatmul.msk.f32.gmra.mxu2 %vm1685_vm2, %v1600_v13 }
 0x92c   : > { %v4631_v33 = vpop.f32.mrf.mxu3 }
 0x92d   : > { %v9971_v58 = vadd.f32 %v4631_v33, %v9591_v32  ;;  %v3566_v33 = vadd.f32 %v3565_v5, %v9491_v12  ;;  %v1663_v12 = vld [vmem:[%s10568_s3 + $0xd60] sm:$0xff] }
 0x92f   : > { %10954 = vst [vmem:[#allocation62_spill] sm:$0xff] %v9971_v58  ;;  %v3568_v52 = vpop.f32.mrf.mxu2  ;;  %v1614_v58 = vld [vmem:[%s10568_s3 + $0xbd8] sm:$0xff] }
 0x930   : > { %v3569_v5 = vadd.f32 %v3568_v52, %v9508_v6  ;;  %v1665_v6 = vld [vmem:[%s10568_s3 + $0xd70] sm:$0xff] }
 0x931   : > { %3013 = vmatmul.f32.gmra.mxu1 %v1659_v53  ;;  %6140 = vmatmul.msk.f32.gmra.mxu3 %vm3748_vm3, %v3563_v23  ;;  %v1604_v53 = vld [vmem:[%s10568_s3 + $0xb88] sm:$0xff]  ;;  %v9997_v23 = vpop.f32.mrf.mxu0 }
 0x933   : > { %5928 = vmatmul.msk.f32.gmra.mxu2 %vm1685_vm2, %v1602_v15 }
 0x934   : > { %v4634_v32 = vpop.f32.mrf.mxu3 }
 0x935   : > { %v9985_v13 = vadd.f32 %v4634_v32, %v9606_v34 }
 0x937   : > { %10955 = vst [vmem:[#allocation9_spill] sm:$0xff] %v9985_v13  ;;  %v3571_v41 = vpop.f32.mrf.mxu2 }
 0x938   : > { %v3572_v52 = vadd.f32 %v3571_v41, %v9530_v25 }
 0x939   : > { %3016 = vmatmul.f32.gmra.mxu1 %v1661_v16  ;;  %6141 = vmatmul.msk.f32.gmra.mxu3 %vm3748_vm3, %v3566_v33  ;;  %v1606_v16 = vld [vmem:[%s10568_s3 + $0xb98] sm:$0xff]  ;;  %v10010_v33 = vpop.f32.mrf.mxu1 }
 0x93b   : > { %5929 = vmatmul.msk.f32.gmra.mxu2 %vm1685_vm2, %v1604_v53  ;;  %v10014_v53 = vpop.f32.mrf.mxu0 }
 0x93c   : > { %v4637_v34 = vpop.f32.mrf.mxu3 }
 0x93d   : > { %v10001_v15 = vadd.f32 %v4637_v34, %v9623_v42 }
 0x93f   : > { %10956 = vst [vmem:[#allocation77_spill] sm:$0xff] %v10001_v15  ;;  %v3574_v32 = vpop.f32.mrf.mxu2 }
 0x940   : > { %v3575_v25 = vadd.f32 %v3574_v32, %v9551_v4  ;;  %v1612_v4 = vld [vmem:[%s10568_s3 + $0xbc8] sm:$0xff]  ;;  %v6151_v32 = vld [vmem:[%s10569_s4 + $0x38] sm:$0xff] }
 0x941   : > { %3019 = vmatmul.f32.gmra.mxu1 %v1663_v12  ;;  %6142 = vmatmul.msk.f32.gmra.mxu3 %vm3748_vm3, %v3569_v5  ;;  %v1608_v12 = vld [vmem:[%s10568_s3 + $0xba8] sm:$0xff]  ;;  %v10027_v5 = vpop.f32.mrf.mxu1 }
 0x942   : > { %5145 = vmatpush.msra.mxu0 %v6151_v32 }
 0x943   : > { %5930 = vmatmul.msk.f32.gmra.mxu2 %vm1685_vm2, %v1606_v16  ;;  %v10033_v16 = vpop.f32.mrf.mxu0 }
 0x944   : > { %v4953_v42 = vpop.f32.mrf.mxu3 }
 0x945   : > { %v10017_v34 = vadd.f32 %v4953_v42, %v9645_v29  ;;  %v1667_v29 = vld [vmem:[%s10568_s3 + $0xd80] sm:$0xff]  ;;  %v1610_v42 = vld [vmem:[%s10568_s3 + $0xbb8] sm:$0xff] }
 0x947   : > { %v3577_v10 = vpop.f32.mrf.mxu2 }
 0x949   : > { %3022 = vmatmul.f32.gmra.mxu1 %v1665_v6  ;;  %6143 = vmatmul.msk.f32.gmra.mxu3 %vm3748_vm3, %v3572_v52  ;;  %v10041_v6 = vpop.f32.mrf.mxu1  ;;  %v1669_v52 = vld [vmem:[%s10568_s3 + $0xd90] sm:$0xff] }
 0x94b   : > { %5931 = vmatmul.msk.f32.gmra.mxu2 %vm1685_vm2, %v1608_v12  ;;  %v3578_v12 = vadd.f32 %v3577_v10, %v9570_v20  ;;  %v1671_v20 = vld [vmem:[%s10568_s3 + $0xda0] sm:$0xff] }
 0x94f   : > { %v3580_v41 = vpop.f32.mrf.mxu2 }
 0x951   : > { %3025 = vmatmul.f32.gmra.mxu1 %v1667_v29  ;;  %6144 = vmatmul.msk.f32.gmra.mxu3 %vm3748_vm3, %v3575_v25  ;;  %v10053_v29 = vpop.f32.mrf.mxu0  ;;  %v10060_v10 = vpop.f32.mrf.mxu1  ;;  %v3581_v25 = vadd.f32 %v3580_v41, %v9588_v43  ;;  %v1616_v43 = vld [vmem:[%s10568_s3 + $0xbe8] sm:$0xff] }
 0x952   : > { %10957 = vst [vmem:[#allocation64_spill] sm:$0xff] %v10053_v29 }
 0x953   : > { %5932 = vmatmul.msk.f32.gmra.mxu2 %vm1685_vm2, %v1610_v42 }
 0x957   : > { %v3583_v15 = vpop.f32.mrf.mxu2 }
 0x959   : > { %3028 = vmatmul.f32.gmra.mxu1 %v1669_v52  ;;  %6145 = vmatmul.msk.f32.gmra.mxu3 %vm3748_vm3, %v3578_v12  ;;  %v10067_v52 = vpop.f32.mrf.mxu0  ;;  %v1673_v12 = vld [vmem:[%s10568_s3 + $0xdb0] sm:$0xff]  ;;  %v10077_v41 = vpop.f32.mrf.mxu1 }
 0x95b   : > { %5933 = vmatmul.msk.f32.gmra.mxu2 %vm1685_vm2, %v1612_v4  ;;  %v3584_v4 = vadd.f32 %v3583_v15, %v9613_v38 }
 0x95f   : > { %v3586_v42 = vpop.f32.mrf.mxu2 }
 0x960   : > { %v3587_v38 = vadd.f32 %v3586_v42, %v9634_v37 }
 0x961   : > { %3031 = vmatmul.f32.gmra.mxu1 %v1671_v20  ;;  %6146 = vmatmul.msk.f32.gmra.mxu3 %vm3748_vm3, %v3581_v25  ;;  %v10081_v20 = vpop.f32.mrf.mxu0  ;;  %v1618_v25 = vld [vmem:[%s10568_s3 + $0xbf8] sm:$0xff] }
 0x963   : > { %5934 = vmatmul.msk.f32.gmra.mxu2 %vm1685_vm2, %v1614_v58  ;;  %v1675_v58 = vld [vmem:[%s10568_s3 + $0xdc0] sm:$0xff] }
 0x967   : > { %v3589_v32 = vpop.f32.mrf.mxu2 }
 0x968   : > { %v3590_v37 = vadd.f32 %v3589_v32, %v9653_v30  ;;  %v1679_v30 = vld [vmem:[%s10568_s3 + $0xde0] sm:$0xff] }
 0x969   : > { %3034 = vmatmul.f32.gmra.mxu1 %v1673_v12  ;;  %6147 = vmatmul.msk.f32.gmra.mxu3 %vm3748_vm3, %v3584_v4  ;;  %v10091_v12 = vpop.f32.mrf.mxu1  ;;  %v1677_v4 = vld [vmem:[%s10568_s3 + $0xdd0] sm:$0xff] }
 0x96b   : > { %5935 = vmatmul.msk.f32.gmra.mxu2 %vm1685_vm2, %v1616_v43  ;;  %v10097_v43 = vpop.f32.mrf.mxu0 }
 0x96f   : > { %v3592_v15 = vpop.f32.mrf.mxu2 }
 0x970   : > { %v3593_v32 = vadd.f32 %v3592_v15, %v9671_v44  ;;  %v1681_v44 = vld [vmem:[%s10568_s3 + $0xdf0] sm:$0xff] }
 0x971   : > { %3037 = vmatmul.f32.gmra.mxu1 %v1675_v58  ;;  %6148 = vmatmul.msk.f32.gmra.mxu3 %vm3748_vm3, %v3587_v38  ;;  %v1620_v58 = vld [vmem:[%s10568_s3 + $0xc08] sm:$0xff]  ;;  %v10107_v38 = vpop.f32.mrf.mxu1 }
 0x973   : > { %5936 = vmatmul.msk.f32.gmra.mxu2 %vm1685_vm2, %v1618_v25 }
 0x977   : > { %v3595_v42 = vpop.f32.mrf.mxu2 }
 0x978   : > { %v3596_v13 = vadd.f32 %v3595_v42, %v9696_v61  ;;  %v1624_v42 = vld [vmem:[%s10568_s3 + $0xc28] sm:$0xff] }
 0x979   : > { %3040 = vmatmul.f32.gmra.mxu1 %v1677_v4  ;;  %6149 = vmatmul.msk.f32.gmra.mxu3 %vm3748_vm3, %v3590_v37  ;;  %v1622_v4 = vld [vmem:[%s10568_s3 + $0xc18] sm:$0xff]  ;;  %v10117_v37 = vpop.f32.mrf.mxu0 }
 0x97a   : > { %6152 = vmatmul.msk.f32.vlgmr.msra.gmra.mxu0 %vm3748_vm3, %v3596_v13  ;;  %v10125_v13 = vpop.f32.mrf.mxu1 }
 0x97b   : > { %5937 = vmatmul.msk.f32.gmra.mxu2 %vm1685_vm2, %v1620_v58 }
 0x97f   : > { %v3598_v61 = vpop.f32.mrf.mxu2 }
 0x980   : > { %v3599_v25 = vadd.f32 %v3598_v61, %v9720_v19 }
 0x981   : > { %3043 = vmatmul.f32.gmra.mxu1 %v1679_v30  ;;  %6150 = vmatmul.msk.f32.gmra.mxu3 %vm3748_vm3, %v3593_v32  ;;  %v10132_v58 = vpop.f32.mrf.mxu0  ;;  %v1683_v30 = vld [vmem:[%s10568_s3 + $0xe00] sm:$0xff] }
 0x982   : > { %6153 = vmatmul.msk.f32.gmra.mxu0 %vm3748_vm3, %v3599_v25  ;;  %v10142_v25 = vpop.f32.mrf.mxu1 }
 0x983   : > { %5938 = vmatmul.msk.f32.gmra.mxu2 %vm1685_vm2, %v1622_v4 }
 0x987   : > { %v3601_v19 = vpop.f32.mrf.mxu2 }
 0x988   : > { %v3602_v15 = vadd.f32 %v3601_v19, %v9739_v36  ;;  %v1626_v36 = vld [vmem:[%s10568_s3 + $0xc38] sm:$0xff] }
 0x989   : > { %3046 = vmatmul.f32.gmra.mxu1 %v1681_v44  ;;  %v10146_v4 = vpop.f32.mrf.mxu0 }
 0x98a   : > { %6154 = vmatmul.msk.f32.gmra.mxu0 %vm3748_vm3, %v3602_v15 }
 0x98b   : > { %5939 = vmatmul.msk.f32.gmra.mxu2 %vm1685_vm2, %v1624_v42 }
 0x98f   : > { %v3604_v32 = vpop.f32.mrf.mxu2 }
 0x990   : > { %v3605_v61 = vadd.f32 %v3604_v32, %v9755_v62  ;;  %v1628_v62 = vld [vmem:[%s10568_s3 + $0xc48] sm:$0xff]  ;;  %v1630_v32 = vld [vmem:[%s10568_s3 + $0xc58] sm:$0xff] }
 0x991   : > { %3049 = vmatmul.f32.gmra.mxu1 %v1683_v30  ;;  %v10154_v15 = vpop.f32.mrf.mxu0 }
 0x992   : > { %6155 = vmatmul.msk.f32.gmra.mxu0 %vm3748_vm3, %v3605_v61 }
 0x993   : > { %5940 = vmatmul.msk.f32.gmra.mxu2 %vm1685_vm2, %v1626_v36  ;;  %v1632_v36 = vld [vmem:[%s10568_s3 + $0xc68] sm:$0xff] }
 0x997   : > { %v3607_v44 = vpop.f32.mrf.mxu2 }
 0x998   : > { %v3608_v19 = vadd.f32 %v3607_v44, %v9776_v22 }
 0x999   : > { %v10166_v44 = vpop.f32.mrf.mxu0 }
 0x99a   : > { %6156 = vmatmul.msk.f32.gmra.mxu0 %vm3748_vm3, %v3608_v19 }
 0x99b   : > { %5941 = vmatmul.msk.f32.gmra.mxu2 %vm1685_vm2, %v1628_v62  ;;  %v1634_v62 = vld [vmem:[%s10568_s3 + $0xc78] sm:$0xff] }
 0x99f   : > { %v3610_v42 = vpop.f32.mrf.mxu2 }
 0x9a0   : > { %v3611_v30 = vadd.f32 %v3610_v42, %v9794_v54 }
 0x9a2   : > { %6157 = vmatmul.msk.f32.gmra.mxu0 %vm3748_vm3, %v3611_v30 }
 0x9a3   : > { %5942 = vmatmul.msk.f32.gmra.mxu2 %vm1685_vm2, %v1630_v32  ;;  %v1636_v32 = vld [vmem:[%s10568_s3 + $0xc88] sm:$0xff] }
 0x9a7   : > { %v3613_v22 = vpop.f32.mrf.mxu2 }
 0x9a8   : > { %v3614_v61 = vadd.f32 %v3613_v22, %v9809_v31  ;;  %v10175_v31 = vpop.f32.mrf.mxu0 }
 0x9a9   : > { %10958 = vst [vmem:[#allocation35_spill] sm:$0xff] %v10175_v31 }
 0x9aa   : > { %6158 = vmatmul.msk.f32.gmra.mxu0 %vm3748_vm3, %v3614_v61 }
 0x9ab   : > { %5943 = vmatmul.msk.f32.gmra.mxu2 %vm1685_vm2, %v1632_v36  ;;  %v1638_v36 = vld [vmem:[%s10568_s3 + $0xc98] sm:$0xff] }
 0x9af   : > { %v3616_v54 = vpop.f32.mrf.mxu2 }
 0x9b0   : > { %v3617_v19 = vadd.f32 %v3616_v54, %v9824_v45  ;;  %v10184_v45 = vpop.f32.mrf.mxu0 }
 0x9b1   : > { %10959 = vst [vmem:[#allocation79_spill] sm:$0xff] %v10184_v45 }
 0x9b2   : > { %6159 = vmatmul.msk.f32.gmra.mxu0 %vm3748_vm3, %v3617_v19 }
 0x9b3   : > { %5944 = vmatmul.msk.f32.gmra.mxu2 %vm1685_vm2, %v1634_v62  ;;  %v1640_v62 = vld [vmem:[%s10568_s3 + $0xca8] sm:$0xff] }
 0x9b7   : > { %v3619_v42 = vpop.f32.mrf.mxu2 }
 0x9b8   : > { %v3620_v30 = vadd.f32 %v3619_v42, %v9844_v2  ;;  %v10192_v2 = vpop.f32.mrf.mxu0 }
 0x9b9   : > { %10960 = vst [vmem:[#allocation66_spill] sm:$0xff] %v10192_v2 }
 0x9ba   : > { %6160 = vmatmul.msk.f32.gmra.mxu0 %vm3748_vm3, %v3620_v30  ;;  %v1642_v30 = vld [vmem:[%s10568_s3 + $0xcb8] sm:$0xff] }
 0x9bb   : > { %5945 = vmatmul.msk.f32.gmra.mxu2 %vm1685_vm2, %v1636_v32 }
 0x9bf   : > { %v3622_v22 = vpop.f32.mrf.mxu2 }
 0x9c0   : > { %v3623_v61 = vadd.f32 %v3622_v22, %v9862_v27  ;;  %v10204_v32 = vpop.f32.mrf.mxu0 }
 0x9c1   : > { %10961 = vst [vmem:[#allocation18_spill] sm:$0xff] %v10204_v32 }
 0x9c2   : > { %6161 = vmatmul.msk.f32.gmra.mxu0 %vm3748_vm3, %v3623_v61 }
 0x9c3   : > { %5946 = vmatmul.msk.f32.gmra.mxu2 %vm1685_vm2, %v1638_v36  ;;  %v1644_v36 = vld [vmem:[%s10568_s3 + $0xcc8] sm:$0xff] }
 0x9c7   : > { %v3625_v54 = vpop.f32.mrf.mxu2 }
 0x9c8   : > { %v3626_v19 = vadd.f32 %v3625_v54, %v9877_v18  ;;  %v10208_v18 = vpop.f32.mrf.mxu3 }
 0x9ca   : > { %6162 = vmatmul.msk.f32.gmra.mxu0 %vm3748_vm3, %v3626_v19 }
 0x9cb   : > { %5947 = vmatmul.msk.f32.gmra.mxu2 %vm1685_vm2, %v1640_v62 }
 0x9cf   : > { %v3628_v27 = vpop.f32.mrf.mxu2 }
 0x9d0   : > { %v3629_v42 = vadd.f32 %v3628_v27, %v9892_v9  ;;  %v10215_v9 = vpop.f32.mrf.mxu0  ;;  %v10218_v19 = vpop.f32.mrf.mxu3 }
 0x9d1   : > { %10962 = vst [vmem:[#allocation81_spill] sm:$0xff] %v10215_v9 }
 0x9d2   : > { %6163 = vmatmul.msk.f32.gmra.mxu0 %vm3748_vm3, %v3629_v42 }
 0x9d3   : > { %5948 = vmatmul.msk.f32.gmra.mxu2 %vm1685_vm2, %v1642_v30 }
 0x9d7   : > { %v3631_v22 = vpop.f32.mrf.mxu2 }
 0x9d8   : > { %v3632_v61 = vadd.f32 %v3631_v22, %v9914_v0  ;;  %v10222_v27 = vpop.f32.mrf.mxu0  ;;  %v10225_v30 = vpop.f32.mrf.mxu3 }
 0x9d9   : > { %10963 = vst [vmem:[#allocation68_spill] sm:$0xff] %v10222_v27 }
 0x9da   : > { %6164 = vmatmul.msk.f32.gmra.mxu0 %vm3748_vm3, %v3632_v61 }
 0x9db   : > { %5949 = vmatmul.msk.f32.gmra.mxu2 %vm1685_vm2, %v1644_v36 }
 0x9df   : > { %v3634_v54 = vpop.f32.mrf.mxu2 }
 0x9e0   : > { %v3635_v62 = vadd.f32 %v3634_v54, %v9934_v60  ;;  %v10228_v22 = vpop.f32.mrf.mxu0  ;;  %v4965_v31 = vpop.f32.mrf.mxu3 }
 0x9e1   : > { %10964 = vst [vmem:[#allocation83_spill] sm:$0xff] %v10228_v22 }
 0x9e2   : > { %6165 = vmatmul.msk.f32.gmra.mxu0 %vm3748_vm3, %v3635_v62 }
 0x9e7   : > { %v3637_v0 = vpop.f32.mrf.mxu2 }
 0x9e8   : > { %v3638_v42 = vadd.f32 %v3637_v0, %v9951_v21  ;;  %v4968_v21 = vpop.f32.mrf.mxu3 }
 0x9ea   : > { %6166 = vmatmul.msk.f32.gmra.mxu0 %vm3748_vm3, %v3638_v42 }
 0x9ef   : > { %v3640_v61 = vpop.f32.mrf.mxu2 }
 0x9f0   : > { %v3641_v36 = vadd.f32 %v3640_v61, %v9968_v28  ;;  %v4971_v61 = vpop.f32.mrf.mxu3 }
 0x9f2   : > { %6167 = vmatmul.msk.f32.gmra.mxu0 %vm3748_vm3, %v3641_v36 }
 0x9f7   : > { %v3643_v60 = vpop.f32.mrf.mxu2  ;;  %v10232_v54 = vpop.f32.mrf.mxu0 }
 0x9f8   : > { %v3644_v62 = vadd.f32 %v3643_v60, %v9990_v39 }
 0x9fa   : > { %6168 = vmatmul.msk.f32.gmra.mxu0 %vm3748_vm3, %v3644_v62  ;;  %v4974_v62 = vpop.f32.mrf.mxu3 }
 0x9ff   : > { %v3646_v0 = vpop.f32.mrf.mxu2  ;;  %v10236_v45 = vpop.f32.mrf.mxu0 }
 0xa00   : > { %v3647_v42 = vadd.f32 %v3646_v0, %v10010_v33  ;;  %v4838_v33 = vadd.f32 %v9960_v47, %v9706_v59  ;;  %v2981_v0 = vpop.f32.mrf.mxu1 }
 0xa02   : > { %6169 = vmatmul.msk.f32.gmra.mxu0 %vm3748_vm3, %v3647_v42  ;;  %v5032_v42 = vadd.f32 %v4965_v31, %v4838_v33  ;;  %v4840_v31 = vadd.f32 %v9997_v23, %v9743_v11  ;;  %v4841_v33 = vadd.f32 %v10014_v53, %v9758_v40 }
 0xa07   : > { %v3649_v2 = vpop.f32.mrf.mxu2  ;;  %v10240_v28 = vpop.f32.mrf.mxu0 }
 0xa08   : > { %v3650_v36 = vadd.f32 %v3649_v2, %v10027_v5  ;;  %v4839_v2 = vadd.f32 %v9980_v14, %v9726_v8  ;;  %v2984_v29 = vpop.f32.mrf.mxu1  ;;  %v5034_v8 = vadd.f32 %v4971_v61, %v4840_v31 }
 0xa0a   : > { %6170 = vmatmul.msk.f32.gmra.mxu0 %vm3748_vm3, %v3650_v36 }
 0xa0f   : > { %v3652_v32 = vpop.f32.mrf.mxu2  ;;  %v10244_v39 = vpop.f32.mrf.mxu0 }
 0xa10   : > { %v3653_v60 = vadd.f32 %v3652_v32, %v10041_v6  ;;  %v4977_v6 = vpop.f32.mrf.mxu3  ;;  %v5033_v32 = vadd.f32 %v4968_v21, %v4839_v2  ;;  %v2987_v21 = vpop.f32.mrf.mxu1 }
 0xa12   : > { %6171 = vmatmul.msk.f32.gmra.mxu0 %vm3748_vm3, %v3653_v60 }
 0xa17   : > { %v3655_v22 = vpop.f32.mrf.mxu2  ;;  %v5159_v9 = vpop.f32.mrf.mxu0 }
 0xa18   : > { %v3656_v27 = vadd.f32 %v3655_v22, %v10060_v10  ;;  %v10251_v5 = vadd.f32 %v5159_v9, %v5032_v42  ;;  %v6177_v10 = vld [vmem:[%s10569_s4 + $0x40] sm:$0xff]  ;;  %v10265_v14 = vpop.f32.mrf.mxu3  ;;  %v5035_v42 = vadd.f32 %v4974_v62, %v4841_v33  ;;  %v2990_v61 = vpop.f32.mrf.mxu1 }
 0xa19   : > { %5339 = vmatpush.msrb.mxu3 %v6177_v10  ;;  %10965 = vst [vmem:[#allocation70_spill] sm:$0xff] %v10265_v14 }
 0xa1a   : > { %6172 = vmatmul.msk.f32.gmra.mxu0 %vm3748_vm3, %v3656_v27 }
 0xa1f   : > { %v3658_v36 = vpop.f32.mrf.mxu2  ;;  %v5162_v60 = vpop.f32.mrf.mxu0 }
 0xa20   : > { %v3659_v59 = vadd.f32 %v3658_v36, %v10077_v41  ;;  %v10257_v47 = vadd.f32 %v5162_v60, %v5033_v32  ;;  %v10273_v36 = vpop.f32.mrf.mxu3 }
 0xa21   : > { %10966 = vst [vmem:[#allocation85_spill] sm:$0xff] %v10273_v36 }
 0xa22   : > { %6173 = vmatmul.msk.f32.gmra.mxu0 %vm3748_vm3, %v3659_v59 }
 0xa27   : > { %v3661_v9 = vpop.f32.mrf.mxu2  ;;  %v5165_v27 = vpop.f32.mrf.mxu0 }
 0xa28   : > { %v3662_v22 = vadd.f32 %v3661_v9, %v10091_v12  ;;  %v10268_v41 = vadd.f32 %v5165_v27, %v5034_v8  ;;  %v4842_v12 = vadd.f32 %v10033_v16, %v9771_v48  ;;  %v10284_v62 = vpop.f32.mrf.mxu3 }
 0xa2a   : > { %6174 = vmatmul.msk.f32.gmra.mxu0 %vm3748_vm3, %v3662_v22  ;;  %v5036_v60 = vadd.f32 %v4977_v6, %v4842_v12 }
 0xa2f   : > { %v3664_v2 = vpop.f32.mrf.mxu2  ;;  %v5168_v32 = vpop.f32.mrf.mxu0 }
 0xa30   : > { %v3665_v11 = vadd.f32 %v3664_v2, %v10107_v38  ;;  %v10276_v23 = vadd.f32 %v5168_v32, %v5035_v42  ;;  %v2993_v38 = vpop.f32.mrf.mxu1  ;;  %v10291_v48 = vpop.f32.mrf.mxu3 }
 0xa32   : > { %6175 = vmatmul.msk.f32.gmra.mxu0 %vm3748_vm3, %v3665_v11 }
 0xa37   : > { %v3667_v59 = vpop.f32.mrf.mxu2  ;;  %v5171_v10 = vpop.f32.mrf.mxu0 }
 0xa38   : > { %v3668_v40 = vadd.f32 %v3667_v59, %v10125_v13  ;;  %v10282_v53 = vadd.f32 %v5171_v10, %v5036_v60  ;;  %v2996_v27 = vpop.f32.mrf.mxu1  ;;  %v10296_v22 = vpop.f32.mrf.mxu3 }
 0xa3a   : > { %6176 = vmatmul.msk.f32.gmra.mxu0 %vm3748_vm3, %v3668_v40 }
 0xa3f   : > { %v3670_v31 = vpop.f32.mrf.mxu2  ;;  %v10287_v8 = vpop.f32.mrf.mxu0 }
 0xa40   : > { %10967 = vst [vmem:[#allocation72_spill] sm:$0xff] %v10287_v8  ;;  %v3671_v9 = vadd.f32 %v3670_v31, %v10142_v25  ;;  %v2999_v25 = vpop.f32.mrf.mxu1  ;;  %v10303_v60 = vpop.f32.mrf.mxu3 }
 0xa42   : > { %6178 = vmatmul.msk.f32.vlgmr.msrb.gmra.mxu3 %vm3748_vm3, %v3671_v9 }
 0xa47   : > { %v3673_v16 = vpop.f32.mrf.mxu2  ;;  %v10293_v6 = vpop.f32.mrf.mxu0 }
 0xa48   : > { %10968 = vst [vmem:[#allocation74_spill] sm:$0xff] %v10293_v6  ;;  %v3674_v13 = vadd.f32 %v3673_v16, %v2981_v0  ;;  %v3002_v0 = vpop.f32.mrf.mxu1  ;;  %v10309_v31 = vpop.f32.mrf.mxu3  ;;  %v10970_v16 = vld [vmem:[#allocation39_spill] sm:$0xff]  ;;  %v10972_v6 = vld [vmem:[#allocation26_spill] sm:$0xff] }
 0xa49   : > { %v3692_v14 = vadd.f32 %v10972_v6, %v2999_v25  ;;  %v10974_v6 = vld [vmem:[#allocation41_spill] sm:$0xff] }
 0xa4a   : > { %6179 = vmatmul.msk.f32.gmra.mxu3 %vm3748_vm3, %v3674_v13  ;;  %v3686_v13 = vadd.f32 %v10970_v16, %v2993_v38  ;;  %v4851_v16 = vadd.f32 %v10166_v44, %v9895_v63 }
 0xa4f   : > { %v3676_v33 = vpop.f32.mrf.mxu2  ;;  %v10298_v42 = vpop.f32.mrf.mxu0 }
 0xa50   : > { %10969 = vst [vmem:[#allocation102_spill] sm:$0xff] %v10298_v42  ;;  %v3677_v2 = vadd.f32 %v3676_v33, %v2984_v29  ;;  %v3005_v29 = vpop.f32.mrf.mxu1 }
 0xa52   : > { %6180 = vmatmul.msk.f32.gmra.mxu3 %vm3748_vm3, %v3677_v2  ;;  %v10971_v2 = vld [vmem:[#allocation38_spill] sm:$0xff] }
 0xa57   : > { %v3679_v32 = vpop.f32.mrf.mxu2  ;;  %v10301_v11 = vpop.f32.mrf.mxu0 }
 0xa58   : > { %v3680_v12 = vadd.f32 %v3679_v32, %v2987_v21  ;;  %v5001_v21 = vpop.f32.mrf.mxu3  ;;  %v3689_v32 = vadd.f32 %v10971_v2, %v2996_v27  ;;  %v10973_v2 = vld [vmem:[#allocation15_spill] sm:$0xff] }
 0xa5a   : > { %6181 = vmatmul.msk.f32.gmra.mxu3 %vm3748_vm3, %v3680_v12  ;;  %v3008_v12 = vpop.f32.mrf.mxu1 }
 0xa5f   : > { %v3682_v59 = vpop.f32.mrf.mxu2  ;;  %v10306_v10 = vpop.f32.mrf.mxu0 }
 0xa60   : > { %v3683_v40 = vadd.f32 %v3682_v59, %v2990_v61  ;;  %v4850_v61 = vadd.f32 %v10154_v15, %v9881_v35 }
 0xa62   : > { %6182 = vmatmul.msk.f32.gmra.mxu3 %vm3748_vm3, %v3683_v40  ;;  %v5044_v59 = vadd.f32 %v5001_v21, %v4850_v61  ;;  %v5004_v40 = vpop.f32.mrf.mxu3  ;;  %v3011_v38 = vpop.f32.mrf.mxu1  ;;  %v10975_v21 = vld [vmem:[#allocation40_spill] sm:$0xff] }
 0xa63   : > { %v5045_v27 = vadd.f32 %v5004_v40, %v4851_v16  ;;  %v3701_v63 = vadd.f32 %v10975_v21, %v3008_v12  ;;  %v10977_v16 = vld [vmem:[#allocation7_spill] sm:$0xff] }
 0xa67   : > { %v10311_v9 = vpop.f32.mrf.mxu0 }
 0xa6a   : > { %6183 = vmatmul.msk.f32.gmra.mxu3 %vm3748_vm3, %v3686_v13  ;;  %v10330_v35 = vpop.f32.mrf.mxu3  ;;  %v3014_v15 = vpop.f32.mrf.mxu1 }
 0xa6f   : > { %v10315_v33 = vpop.f32.mrf.mxu0 }
 0xa72   : > { %6184 = vmatmul.msk.f32.gmra.mxu3 %vm3748_vm3, %v3689_v32  ;;  %v3695_v32 = vadd.f32 %v10973_v2, %v3002_v0  ;;  %v3017_v25 = vpop.f32.mrf.mxu1  ;;  %v10976_v0 = vld [vmem:[#allocation13_spill] sm:$0xff] }
 0xa73   : > { %v3704_v61 = vadd.f32 %v10976_v0, %v3011_v38 }
 0xa77   : > { %v5195_v8 = vpop.f32.mrf.mxu0 }
 0xa78   : > { %v10322_v42 = vadd.f32 %v5195_v8, %v5044_v59  ;;  %v3698_v8 = vadd.f32 %v10974_v6, %v3005_v29  ;;  %v3707_v29 = vadd.f32 %v10977_v16, %v3014_v15  ;;  %v10979_v6 = vld [vmem:[#allocation23_spill] sm:$0xff] }
 0xa7a   : > { %6185 = vmatmul.msk.f32.gmra.mxu3 %vm3748_vm3, %v3692_v14  ;;  %v10335_v14 = vpop.f32.mrf.mxu3  ;;  %v3020_v59 = vpop.f32.mrf.mxu1 }
 0xa7f   : > { %v5198_v13 = vpop.f32.mrf.mxu0 }
 0xa80   : > { %v10328_v36 = vadd.f32 %v5198_v13, %v5045_v27  ;;  %v10978_v13 = vld [vmem:[#allocation24_spill] sm:$0xff] }
 0xa81   : > { %v3710_v2 = vadd.f32 %v10978_v13, %v3017_v25 }
 0xa82   : > { %6186 = vmatmul.msk.f32.gmra.mxu3 %vm3748_vm3, %v3695_v32  ;;  %v10339_v44 = vpop.f32.mrf.mxu3  ;;  %v3023_v27 = vpop.f32.mrf.mxu1 }
 0xa8a   : > { %6187 = vmatmul.msk.f32.gmra.mxu3 %vm3748_vm3, %v3698_v8  ;;  %v10343_v40 = vpop.f32.mrf.mxu3  ;;  %v3026_v12 = vpop.f32.mrf.mxu1  ;;  %v3713_v8 = vadd.f32 %v10979_v6, %v3020_v59  ;;  %v10982_v6 = vld [vmem:[#allocation34_spill] sm:$0xff] }
 0xa92   : > { %6188 = vmatmul.msk.f32.gmra.mxu3 %vm3748_vm3, %v3701_v63  ;;  %v10348_v32 = vpop.f32.mrf.mxu3  ;;  %v3029_v21 = vpop.f32.mrf.mxu1  ;;  %v10980_v63 = vld [vmem:[#allocation36_spill] sm:$0xff] }
 0xa93   : > { %v3716_v0 = vadd.f32 %v10980_v63, %v3023_v27  ;;  %v3722_v27 = vadd.f32 %v10982_v6, %v3029_v21 }
 0xa9a   : > { %6189 = vmatmul.msk.f32.gmra.mxu3 %vm3748_vm3, %v3704_v61  ;;  %v10353_v38 = vpop.f32.mrf.mxu3  ;;  %v10981_v61 = vld [vmem:[#allocation22_spill] sm:$0xff]  ;;  %v3032_v16 = vpop.f32.mrf.mxu1 }
 0xa9b   : > { %v3719_v25 = vadd.f32 %v10981_v61, %v3026_v12 }
 0xaa2   : > { %6190 = vmatmul.msk.f32.gmra.mxu3 %vm3748_vm3, %v3707_v29  ;;  %v10357_v15 = vpop.f32.mrf.mxu3  ;;  %v5222_v29 = vadd.f32 %v10232_v54, %v10017_v34  ;;  %v3035_v63 = vpop.f32.mrf.mxu1  ;;  %v4836_v34 = vadd.f32 %v9921_v55, %v9674_v57  ;;  %v10983_v54 = vld [vmem:[#allocation20_spill] sm:$0xff] }
 0xaaa   : > { %6191 = vmatmul.msk.f32.gmra.mxu3 %vm3748_vm3, %v3710_v2  ;;  %v4835_v2 = vadd.f32 %v9904_v17, %v9657_v7  ;;  %v3038_v17 = vpop.f32.mrf.mxu1 }
 0xab2   : > { %6192 = vmatmul.msk.f32.gmra.mxu3 %vm3748_vm3, %v3713_v8  ;;  %v5029_v8 = vadd.f32 %v10208_v18, %v4835_v2 }
 0xab4   : > { %v5223_v12 = vadd.f32 %v10236_v45, %v5029_v8  ;;  %v4837_v45 = vadd.f32 %v9938_v56, %v9689_v1  ;;  %v10986_v1 = vld [vmem:[#allocation32_spill] sm:$0xff] }
 0xab6   : > { %v5031_v6 = vadd.f32 %v10225_v30, %v4837_v45 }
 0xab8   : > { %v5225_v57 = vadd.f32 %v10244_v39, %v5031_v6 }
 0xaba   : > { %6193 = vmatmul.msk.f32.gmra.mxu3 %vm3748_vm3, %v3716_v0 }
 0xac2   : > { %6194 = vmatmul.msk.f32.gmra.mxu3 %vm3748_vm3, %v3719_v25  ;;  %v3725_v25 = vadd.f32 %v10983_v54, %v3032_v16  ;;  %v3041_v16 = vpop.f32.mrf.mxu1 }
 0xac3   : > { %v3734_v56 = vadd.f32 %v10986_v1, %v3041_v16  ;;  %v4849_v1 = vadd.f32 %v10146_v4, %v9867_v51  ;;  %v4844_v4 = vadd.f32 %v10067_v52, %v9799_v49 }
 0xac5   : > { %v5341_v59 = vpop.f32.mrf.mxu3 }
 0xac6   : > { %v10363_v13 = vadd.f32 %v5341_v59, %v5222_v29  ;;  %v5030_v29 = vadd.f32 %v10218_v19, %v4836_v34  ;;  %v10984_v59 = vld [vmem:[#allocation21_spill] sm:$0xff] }
 0xac7   : > { %v3728_v2 = vadd.f32 %v10984_v59, %v3035_v63 }
 0xac8   : > { %v5224_v7 = vadd.f32 %v10240_v28, %v5030_v29  ;;  %v10985_v28 = vld [vmem:[#allocation33_spill] sm:$0xff] }
 0xaca   : > { %6195 = vmatmul.msk.f32.gmra.mxu3 %vm3748_vm3, %v3722_v27  ;;  %v3731_v27 = vadd.f32 %v10985_v28, %v3038_v17  ;;  %v3044_v63 = vpop.f32.mrf.mxu1 }
 0xacd   : > { %v5344_v0 = vpop.f32.mrf.mxu3 }
 0xace   : > { %v10371_v61 = vadd.f32 %v5344_v0, %v5223_v12  ;;  %v10987_v0 = vld [vmem:[#allocation31_spill] sm:$0xff] }
 0xacf   : > { %v3737_v34 = vadd.f32 %v10987_v0, %v3044_v63 }
 0xad2   : > { %6196 = vmatmul.msk.f32.gmra.mxu3 %vm3748_vm3, %v3725_v25  ;;  %v3047_v54 = vpop.f32.mrf.mxu1 }
 0xad5   : > { %v5347_v18 = vpop.f32.mrf.mxu3 }
 0xad6   : > { %v10379_v21 = vadd.f32 %v5347_v18, %v5224_v7 }
 0xada   : > { %6197 = vmatmul.msk.f32.gmra.mxu3 %vm3748_vm3, %v3728_v2  ;;  %v3050_v17 = vpop.f32.mrf.mxu1 }
 0xadd   : > { %v5350_v55 = vpop.f32.mrf.mxu3 }
 0xade   : > { %v10387_v19 = vadd.f32 %v5350_v55, %v5225_v57 }
 0xae2   : > { %6198 = vmatmul.msk.f32.gmra.mxu3 %vm3748_vm3, %v3731_v27 }
 0xae5   : > { %v5353_v8 = vpop.f32.mrf.mxu3 }
 0xae6   : > { %v10392_v12 = vadd.f32 %v5353_v8, %v10251_v5  ;;  %v10988_v5 = vld [vmem:[#allocation30_spill] sm:$0xff]  ;;  %v4848_v8 = vadd.f32 %v10132_v58, %v9853_v50  ;;  %v4845_v50 = vadd.f32 %v10081_v20, %v9813_v46 }
 0xae7   : > { %v3740_v7 = vadd.f32 %v10988_v5, %v3047_v54 }
 0xaea   : > { %6199 = vmatmul.msk.f32.gmra.mxu3 %vm3748_vm3, %v3734_v56  ;;  %v5042_v56 = vadd.f32 %v10303_v60, %v4848_v8  ;;  %v10436_v60 = vld [vmem:[%s10570_s5] ss:$0 sm:$0xff] }
 0xaec   : > { %v5236_v0 = vadd.f32 %v10311_v9, %v5042_v56 }
 0xaed   : > { %v5356_v30 = vpop.f32.mrf.mxu3 }
 0xaee   : > { %v10397_v39 = vadd.f32 %v5356_v30, %v10257_v47  ;;  %v10989_v47 = vld [vmem:[#allocation17_spill] sm:$0xff]  ;;  %v5043_v30 = vadd.f32 %v10309_v31, %v4849_v1 }
 0xaef   : > { %v3743_v59 = vadd.f32 %v10989_v47, %v3050_v17  ;;  %v10991_v31 = vld [vmem:[#allocation85_spill] sm:$0xff]  ;;  %v10995_v47 = vld [vmem:[#allocation72_spill] sm:$0xff] }
 0xaf0   : > { %v5237_v51 = vadd.f32 %v10315_v33, %v5043_v30  ;;  %v5038_v9 = vadd.f32 %v10991_v31, %v4844_v4  ;;  %v10992_v33 = vld [vmem:[#allocation102_spill] sm:$0xff] }
 0xaf2   : > { %6200 = vmatmul.msk.f32.gmra.mxu3 %vm3748_vm3, %v3737_v34 }
 0xaf5   : > { %v5359_v25 = vpop.f32.mrf.mxu3 }
 0xaf6   : > { %v10402_v29 = vadd.f32 %v5359_v25, %v10268_v41  ;;  %v10994_v25 = vld [vmem:[#allocation74_spill] sm:$0xff] }
 0xaf7   : > { %v5232_v5 = vadd.f32 %v10994_v25, %v5038_v9  ;;  %v10997_v25 = vld [vmem:[#allocation68_spill] sm:$0xff] }
 0xafa   : > { %6201 = vmatmul.msk.f32.gmra.mxu3 %vm3748_vm3, %v3740_v7 }
 0xafd   : > { %v5362_v18 = vpop.f32.mrf.mxu3 }
 0xafe   : > { %v10407_v45 = vadd.f32 %v5362_v18, %v10276_v23  ;;  %v4847_v23 = vadd.f32 %v10117_v37, %v9839_v26 }
 0xb00   : > { %v5041_v63 = vadd.f32 %v10296_v22, %v4847_v23 }
 0xb02   : > { %6202 = vmatmul.msk.f32.gmra.mxu3 %vm3748_vm3, %v3743_v59  ;;  %v5235_v26 = vadd.f32 %v10306_v10, %v5041_v63 }
 0xb05   : > { %v5365_v2 = vpop.f32.mrf.mxu3 }
 0xb06   : > { %v5424_v6 = vadd.f32 %v5365_v2, %v10282_v53  ;;  %v4846_v53 = vadd.f32 %v10097_v43, %v9827_v3  ;;  %v5039_v43 = vadd.f32 %v10284_v62, %v4845_v50  ;;  %v5452_v50 = vadd.f32 %v10436_v60, %v10407_v45 }
 0xb07   : > { %v5449_v45 = vadd.f32 %v10436_v60, %v10392_v12  ;;  %v5445_v12 = vadd.f32 %v10436_v60, %v10363_v13 }
 0xb08   : > { %v5040_v58 = vadd.f32 %v10291_v48, %v4846_v53  ;;  %v10990_v48 = vld [vmem:[#allocation64_spill] sm:$0xff]  ;;  %v5233_v34 = vadd.f32 %v10992_v33, %v5039_v43  ;;  %v5453_v30 = vadd.f32 %v10436_v60, %v5424_v6  ;;  %v5450_v6 = vadd.f32 %v10436_v60, %v10397_v39 }
 0xb09   : > { %v4843_v10 = vadd.f32 %v10990_v48, %v9785_v24  ;;  %v5477_v4 = vmax.f32 %v5452_v50, 0.0  ;;  %v5448_v43 = vadd.f32 %v10436_v60, %v10387_v19  ;;  %v5470_v9 = vmax.f32 %v5445_v12, 0.0 }
 0xb0a   : > { %v5234_v22 = vadd.f32 %v10301_v11, %v5040_v58  ;;  %v10993_v11 = vld [vmem:[#allocation70_spill] sm:$0xff] }
 0xb0b   : > { %v5037_v54 = vadd.f32 %v10993_v11, %v4843_v10  ;;  %v5473_v48 = vmax.f32 %v5448_v43, 0.0  ;;  %v11008_v43 = vld [vmem:[#allocation73_spill] sm:$0xff] }
 0xb0d   : > { %v5368_v57 = vpop.f32.mrf.mxu3  ;;  %v5231_v59 = vadd.f32 %v10995_v47, %v5037_v54  ;;  %v10996_v54 = vld [vmem:[#allocation9_spill] sm:$0xff] }
 0xb0e   : > { %v11000_v47 = vld [vmem:[#allocation77_spill] sm:$0xff] }
 0xb0f   : > { %v5425_v8 = vadd.f32 %v5368_v57, %v5231_v59  ;;  %v11001_v59 = vld [vmem:[#allocation83_spill] sm:$0xff] }
 0xb15   : > { %v5371_v55 = vpop.f32.mrf.mxu3 }
 0xb16   : > { %v5426_v24 = vadd.f32 %v5371_v55, %v5232_v5  ;;  %v5454_v55 = vadd.f32 %v10436_v60, %v5425_v8  ;;  %v4857_v5 = vadd.f32 %v10997_v25, %v10996_v54  ;;  %v11003_v8 = vld [vmem:[#allocation18_spill] sm:$0xff] }
 0xb18   : > { %v5479_v58 = vmax.f32 %v5454_v55, 0.0  ;;  %v11004_v55 = vld [vmem:[#allocation8_spill] sm:$0xff] }
 0xb1d   : > { %v5374_v41 = vpop.f32.mrf.mxu3 }
 0xb1e   : > { %v5427_v7 = vadd.f32 %v5374_v41, %v5233_v34  ;;  %v5455_v41 = vadd.f32 %v10436_v60, %v5426_v24  ;;  %v4858_v24 = vadd.f32 %v11001_v59, %v11000_v47 }
 0xb20   : > { %v5456_v23 = vadd.f32 %v10436_v60, %v5427_v7  ;;  %v10998_v7 = vld [vmem:[#allocation62_spill] sm:$0xff] }
 0xb22   : > { %v5481_v63 = vmax.f32 %v5456_v23, 0.0 }
 0xb25   : > { %v5377_v16 = vpop.f32.mrf.mxu3 }
 0xb26   : > { %v5428_v49 = vadd.f32 %v5377_v16, %v5234_v22  ;;  %v10449_v16 = vpop.f32.mrf.mxu0  ;;  %v5475_v22 = vmax.f32 %v5450_v6, 0.0 }
 0xb28   : > { %v5457_v2 = vadd.f32 %v10436_v60, %v5428_v49 }
 0xb2a   : > { %v5482_v53 = vmax.f32 %v5457_v2, 0.0  ;;  %v5051_v2 = vadd.f32 %v10353_v38, %v4857_v5 }
 0xb2d   : > { %v5380_v28 = vpop.f32.mrf.mxu3 }
 0xb2e   : > { %v5429_v46 = vadd.f32 %v5380_v28, %v5235_v26  ;;  %v10463_v26 = vpop.f32.mrf.mxu0 }
 0xb30   : > { %v5458_v17 = vadd.f32 %v10436_v60, %v5429_v46  ;;  %v5474_v46 = vmax.f32 %v5449_v45, 0.0 }
 0xb32   : > { %v5483_v1 = vmax.f32 %v5458_v17, 0.0  ;;  %v10999_v17 = vld [vmem:[#allocation81_spill] sm:$0xff] }
 0xb35   : > { %v5383_v27 = vpop.f32.mrf.mxu3 }
 0xb36   : > { %v5430_v37 = vadd.f32 %v5383_v27, %v5236_v0  ;;  %v5480_v0 = vmax.f32 %v5455_v41, 0.0  ;;  %v5207_v39 = vpop.f32.mrf.mxu0  ;;  %v5052_v41 = vadd.f32 %v10357_v15, %v4858_v24  ;;  %v11009_v15 = vld [vmem:[#allocation35_spill] sm:$0xff] }
 0xb38   : > { %v5459_v52 = vadd.f32 %v10436_v60, %v5430_v37  ;;  %v5478_v37 = vmax.f32 %v5453_v30, 0.0 }
 0xb3a   : > { %v5484_v28 = vmax.f32 %v5459_v52, 0.0 }
 0xb3d   : > { %v5386_v3 = vpop.f32.mrf.mxu3 }
 0xb3e   : > { %v5431_v20 = vadd.f32 %v5386_v3, %v5237_v51  ;;  %v5451_v51 = vadd.f32 %v10436_v60, %v10402_v29  ;;  %v5447_v29 = vadd.f32 %v10436_v60, %v10379_v21  ;;  %v5210_v21 = vpop.f32.mrf.mxu0 }
 0xb40   : > { %v5460_v62 = vadd.f32 %v10436_v60, %v5431_v20  ;;  %v5476_v3 = vmax.f32 %v5451_v51, 0.0  ;;  %v5446_v20 = vadd.f32 %v10436_v60, %v10371_v61  ;;  %v5472_v10 = vmax.f32 %v5447_v29, 0.0  ;;  %v10484_v61 = vld [vmem:[%s10571_s6] sm:$0x3] }
 0xb41   : > { %v5497_v52 = vperm.slane %v10484_v61, 0  ;;  %v11006_v51 = vld [vmem:[#allocation60_spill] sm:$0xff]  ;;  %v5498_v25 = vperm.slane %v10484_v61, 1 }
 0xb42   : > { %v5485_v18 = vmax.f32 %v5460_v62, 0.0  ;;  %v5471_v19 = vmax.f32 %v5446_v20, 0.0  ;;  %v5544_v61 = vld [vmem:[%s10573_s8] sm:$0x1] }
 0xb44   : > { %5502 = vmatpush.msrb.mxu0 %v5485_v18  ;;  %v4856_v18 = vadd.f32 %v10999_v17, %v10998_v7 }
 0xb45   : > { %v5389_v27 = vpop.f32.mrf.mxu3 }
 0xb46   : > { %v10453_v56 = vadd.f32 %v5389_v27, %v10322_v42  ;;  %5503 = vmatpush.msrb.mxu0 %v5484_v28  ;;  %v5213_v34 = vpop.f32.mrf.mxu0  ;;  %v11002_v27 = vld [vmem:[#allocation75_spill] sm:$0xff] }
 0xb47   : > { %v4855_v23 = vadd.f32 %v11003_v8, %v11002_v27 }
 0xb48   : > { %5504 = vmatpush.msrb.mxu0 %v5483_v1  ;;  %v5050_v1 = vadd.f32 %v10348_v32, %v4856_v18 }
 0xb4a   : > { %5505 = vmatpush.msrb.mxu0 %v5482_v53 }
 0xb4c   : > { %5506 = vmatpush.msrb.mxu0 %v5481_v63  ;;  %v11005_v63 = vld [vmem:[#allocation66_spill] sm:$0xff] }
 0xb4d   : > { %v5392_v57 = vpop.f32.mrf.mxu3  ;;  %v4854_v30 = vadd.f32 %v11005_v63, %v11004_v55 }
 0xb4e   : > { %v10461_v42 = vadd.f32 %v5392_v57, %v10328_v36  ;;  %5507 = vmatpush.msrb.mxu0 %v5480_v0  ;;  %v5216_v62 = vpop.f32.mrf.mxu0  ;;  %v5049_v0 = vadd.f32 %v10343_v40, %v4855_v23  ;;  %v5244_v57 = vadd.f32 %v5213_v34, %v5050_v1 }
 0xb4f   : > { %v5245_v53 = vadd.f32 %v5216_v62, %v5051_v2 }
 0xb50   : > { %5508 = vmatpush.msrb.mxu0 %v5479_v58  ;;  %v5243_v45 = vadd.f32 %v5210_v21, %v5049_v0 }
 0xb52   : > { %5509 = vmatpush.msrb.mxu0 %v5478_v37  ;;  %v11007_v37 = vld [vmem:[#allocation79_spill] sm:$0xff] }
 0xb53   : > { %v4853_v38 = vadd.f32 %v11007_v37, %v11006_v51 }
 0xb54   : > { %5510 = vmatpush.msrb.mxu0 %v5477_v4  ;;  %v5048_v4 = vadd.f32 %v10339_v44, %v4854_v30 }
 0xb55   : > { %v10471_v36 = vpop.f32.mrf.mxu3  ;;  %v5047_v29 = vadd.f32 %v10335_v14, %v4853_v38 }
 0xb56   : > { %5511 = vmatpush.msrb.mxu0 %v5476_v3  ;;  %v5219_v28 = vpop.f32.mrf.mxu0 }
 0xb57   : > { %v5246_v50 = vadd.f32 %v5219_v28, %v5052_v41 }
 0xb58   : > { %5512 = vmatpush.msrb.mxu0 %v5475_v22  ;;  %v4852_v22 = vadd.f32 %v11009_v15, %v11008_v43 }
 0xb5a   : > { %5513 = vmatpush.msrb.mxu0 %v5474_v46  ;;  %v5242_v46 = vadd.f32 %v5207_v39, %v5048_v4  ;;  %v5046_v12 = vadd.f32 %v10330_v35, %v4852_v22 }
 0xb5c   : > { %5514 = vmatpush.msrb.mxu0 %v5473_v48  ;;  %v5240_v21 = vadd.f32 %v10449_v16, %v5046_v12  ;;  %v5462_v16 = vadd.f32 %v10436_v60, %v10461_v42  ;;  %v5543_v42 = vld [vmem:[%s10572_s7 + $0x8] sm:$0xff] }
 0xb5d   : > { %v5398_v31 = vpop.f32.mrf.mxu3 }
 0xb5e   : > { %5515 = vmatpush.msrb.mxu0 %v5472_v10  ;;  %v5241_v10 = vadd.f32 %v10463_v26, %v5047_v29  ;;  %v5434_v39 = vadd.f32 %v10471_v36, %v5240_v21  ;;  %v5461_v36 = vadd.f32 %v10436_v60, %v10453_v56  ;;  %v5487_v54 = vmax.f32 %v5462_v16, 0.0 }
 0xb60   : > { %5516 = vmatpush.msrb.mxu0 %v5471_v19  ;;  %v5435_v34 = vadd.f32 %v5398_v31, %v5241_v10  ;;  %v5486_v5 = vmax.f32 %v5461_v36, 0.0 }
 0xb62   : > { %5517 = vmatpush.msrb.mxu0 %v5470_v9  ;;  %v5464_v35 = vadd.f32 %v10436_v60, %v5435_v34 }
 0xb63   : > { %5518 = vmatmul.f32.vlgmr.msrb.gmra.mxu0 %v5497_v52 }
 0xb64   : > { %v5489_v31 = vmax.f32 %v5464_v35, 0.0 }
 0xb65   : > { %v5401_v33 = vpop.f32.mrf.mxu3 }
 0xb66   : > { %v5436_v19 = vadd.f32 %v5401_v33, %v5242_v46  ;;  %v5463_v33 = vadd.f32 %v10436_v60, %v5434_v39 }
 0xb6d   : > { %v5404_v49 = vpop.f32.mrf.mxu3 }
 0xb6e   : > { %v5437_v20 = vadd.f32 %v5404_v49, %v5243_v45  ;;  %v5465_v49 = vadd.f32 %v10436_v60, %v5436_v19 }
 0xb70   : > { %v5466_v52 = vadd.f32 %v10436_v60, %v5437_v20  ;;  %v5490_v62 = vmax.f32 %v5465_v49, 0.0 }
 0xb72   : > { %v5491_v26 = vmax.f32 %v5466_v52, 0.0 }
 0xb75   : > { %v5407_v13 = vpop.f32.mrf.mxu3 }
 0xb76   : > { %v5438_v3 = vadd.f32 %v5407_v13, %v5244_v57 }
 0xb78   : > { %v5467_v44 = vadd.f32 %v10436_v60, %v5438_v3 }
 0xb7a   : > { %v5492_v13 = vmax.f32 %v5467_v44, 0.0 }
 0xb7d   : > { %v5410_v11 = vpop.f32.mrf.mxu3 }
 0xb7e   : > { %v5439_v58 = vadd.f32 %v5410_v11, %v5245_v53  ;;  %v5488_v11 = vmax.f32 %v5463_v33, 0.0 }
 0xb80   : > { %v5468_v40 = vadd.f32 %v10436_v60, %v5439_v58 }
 0xb82   : > { %v5493_v14 = vmax.f32 %v5468_v40, 0.0 }
 0xb85   : > { %v5413_v6 = vpop.f32.mrf.mxu3 }
 0xb86   : > { %v5440_v32 = vadd.f32 %v5413_v6, %v5246_v50 }
 0xb88   : > { %v5469_v48 = vadd.f32 %v10436_v60, %v5440_v32  ;;  %v5542_v60 = vld [vmem:[%s10572_s7] sm:$0xff] }
 0xb8a   : > { %v5494_v9 = vmax.f32 %v5469_v48, 0.0 }
 0xb8c   : > { %5529 = vmatpush.msra.mxu0 %v5494_v9 }
 0xb8e   : > { %5530 = vmatpush.msra.mxu0 %v5493_v14 }
 0xb90   : > { %5531 = vmatpush.msra.mxu0 %v5492_v13 }
 0xb92   : > { %5532 = vmatpush.msra.mxu0 %v5491_v26 }
 0xb94   : > { %5533 = vmatpush.msra.mxu0 %v5490_v62 }
 0xb96   : > { %5534 = vmatpush.msra.mxu0 %v5489_v31 }
 0xb98   : > { %5535 = vmatpush.msra.mxu0 %v5488_v11 }
 0xb9a   : > { %5536 = vmatpush.msra.mxu0 %v5487_v54 }
 0xb9c   : > { %5537 = vmatpush.msra.mxu0 %v5486_v5 }
 0xb9d   : > { %6203 = vmatmul.msk.f32.vlgmr.msra.gmra.mxu0 %vm1685_vm2, %v5498_v25 }
 0xb9e   : > { %5563 = vmatpush.msrb.mxu0 %v5543_v42 }
 0xba0   : > { %5564 = vmatpush.msrb.mxu0 %v5542_v60 }
 0xbe0   : > { %v5519_v56 = vpop.f32.mrf.mxu0 }
 0xc1a   : > { %v5539_v7 = vpop.f32.mrf.mxu0 }
 0xc1b   : > { %v5540_v17 = vadd.f32 %v5539_v7, %v5519_v56 }
 0xc1d   : > { %6204 = vmatmul.msk.f32.vlgmr.msrb.gmra.mxu0 %vm5545_vm4, %v5540_v17 }
 0xc9a   : > { %v5566_v18 = vpop.f32.mrf.mxu0 }
 0xc9b   : > { %v5567_v47 = vadd.f32 %v5566_v18, %v5544_v61 }
 0xc9d   : > { %5570 = vst.msk [vmem:[%s324_s17] sm:$0x1] %vm5569_vm5, %v5567_v47 }
 0xc9e   : > { %6310 = shalt.err (!%p6307_p3)
}
 0xc9f   : > { %6242 = dma.vmem_to_hbm [thread:$0]  (%p6435_p5), %s5583_s21, 16, %s5585_s22, %s5572_s23  }
 0xca0 PF: > { %p6248_p4 = scmp.ge.s32.totalorder %s6345_s12, 2  ;;  %s5596_s26 = sand.u32 1, %s6333_s30  }
 0xca1   : > { %s5597_s16 = scalar_lea.sflag [#allocation3], %s5596_s26 }
 0xca2   : > { %p6245_p7 = pnand %p6248_p4, %p6439_p6 }
 0xca4   : > { %p6246_p8 = pneg %p6245_p7 }
 0xca6   : > { %6328 = dma.done.wait (%p6246_p8), %s5597_s16, 16  }
 0xca7   : > { %6330 = vsyncadd (%p6246_p8), %s5597_s16, 4294967280  ;;  %p19_p9 = scmp.ge.s32.totalorder %s6422_s15, 4   ;;  %s11010_s30 = smov %s6337_s10 }
 0xca8   : > { %s11011_s10 = smov %s6341_s11  ;;  %s11012_s11 = smov %s6433_s18 }
 0xca9   : > { %s11013_s12 = smov %s6422_s15  ;;  %21 = sbr.rel (!%p19_p9) target bundleno = 3 (0x3), region = 99 }
 0xcae   :  { %5602 = vsyncpa [#allocation3], 1 }
 0xcaf   :  { %5604 = vsyncpa [#allocation3 + $0x1], 1 }

</bundles_post_ra>
